<compile_context>
chip_gen: v6e
topology: v6e:2x2x1
jax: 0.10.0
libtpu: 0.0.40
codegen_flags: <defaults>
</compile_context>

<pallas_src>
import math
import functools

import jax
import jax.numpy as jnp
from jax.experimental import pallas as pl
from jax.experimental.pallas import tpu as pltpu


def _pos_embed_kernel(nm_ref, low_ref, up_ref, tile_ref, sel_ref, a_ref, out_ref, *,
                      normalize, scale, batch_block):
    """One grid step = `batch_block` batch elements.

    nm_ref   : (Bt, H, W)   bf16 not_mask (1.0 = valid pixel)
    low_ref  : (H, H)       bf16 lower-triangular ones  (cumsum over rows)
    up_ref   : (W, W)       bf16 upper-triangular ones  (cumsum over cols)
    tile_ref : (W, HW)      f32  spread matrix   tile[w', h*W+w] = [w' == w]
    sel_ref  : (2H+1, HW)   f32  [row_sel; row_sel; ones]: picks the y / x row per flat lane
                            and keeps the appended ones-row for the phase column of A
    a_ref    : (2F, 2H+1)   f32  fold matrix: 1/dim_t over the y / x column blocks, last
                            column = phase (0 for even channels, pi/2 for odd -> cos)
    out_ref  : (Bt, 2F, HW) f32  NCHW-contiguous output block
    """
    H = low_ref.shape[0]
    W = up_ref.shape[0]

    for bb in range(batch_block):                    # static unroll; Bt is small
        nm = nm_ref[bb]                                                            # (H, W) bf16

        # ---- cumulative sums on the MXU (0/1 bf16 operands, exact f32 accumulation) ----
        y_embed = jnp.dot(low_ref[...], nm, preferred_element_type=jnp.float32)    # (H, W)
        x_embed = jnp.dot(nm, up_ref[...], preferred_element_type=jnp.float32)     # (H, W)

        if normalize:
            eps = 1e-06
            # One reciprocal row / col with `scale` folded in (instead of a full HxW divide).
            y_embed = (y_embed - 0.5) * (scale / (y_embed[H - 1:H, :] + eps))
            x_embed = (x_embed - 0.5) * (scale / (x_embed[:, W - 1:W] + eps))

        # ---- fused flatten + channel scaling + phase:  sin(A @ (sel * ([y; x; 1] @ tile))) ----
        stacked = jnp.concatenate(
            [y_embed, x_embed, jnp.ones((1, W), jnp.float32)], axis=0)             # (2H+1, W)
        spread = jnp.dot(stacked, tile_ref[...],
                         preferred_element_type=jnp.float32)                       # (2H+1, HW)
        b = sel_ref[...] * spread                                                  # (2H+1, HW)
        ang = jnp.dot(a_ref[...], b, preferred_element_type=jnp.float32)           # (2F, HW)

        # sin(theta + pi/2) == cos(theta): exact math; the f32 phase add costs ~|theta|*eps,
        # negligible here / with normalize (re-validate only for very large unnormalized maps).
        out_ref[bb] = jnp.sin(ang)   # single unmasked lane-dense store (HW lanes, 2F sublanes)


def position_embedding_sine(mask, num_pos_feats=64, temperature=10000,
                            normalize=False, scale=None, batch_block=1):
    """mask: (B, H, W) bool. Returns (B, 2*num_pos_feats, H, W) float32 (NCHW), like PyTorch."""
    if scale is not None and normalize is False:
        raise ValueError('normalize should be True if scale is passed')
    if scale is None:
        scale = 2 * math.pi

    B, H, W = mask.shape
    F = num_pos_feats
    HW = H * W
    if B % batch_block != 0:
        raise ValueError('batch_block must divide the batch size')

    # bf16 not_mask: 0/1 values are exact, half the HBM footprint, MXU-native cumsum operand.
    not_mask = jnp.logical_not(mask).astype(jnp.bfloat16)

    # ---- constants, resident across the grid (constant index_map => DMA'd once) ----
    lower = jnp.tril(jnp.ones((H, H), jnp.bfloat16))          # cumsum over rows
    upper = jnp.triu(jnp.ones((W, W), jnp.bfloat16))          # cumsum over cols
    col = jnp.arange(HW, dtype=jnp.int32)
    tile_eye = (jnp.arange(W, dtype=jnp.int32)[:, None] == (col[None, :] % W)).astype(jnp.float32)
    row_sel = (jnp.arange(H, dtype=jnp.int32)[:, None] == (col[None, :] // W)).astype(jnp.float32)
    sel_ext = jnp.concatenate([row_sel, row_sel, jnp.ones((1, HW), jnp.float32)], axis=0)

    i = jnp.arange(F, dtype=jnp.float32)
    dim_t = jnp.power(jnp.float32(temperature), 2.0 * jnp.floor(i / 2.0) / jnp.float32(F))
    inv_half = (1.0 / dim_t)[:, None]                                               # (F, 1)
    phase_half = jnp.where((jnp.arange(F) % 2) == 1,
                           jnp.float32(math.pi / 2.0), jnp.float32(0.0))[:, None]   # (F, 1)
    inv_block = jnp.broadcast_to(inv_half, (F, H))
    zeros_blk = jnp.zeros((F, H), jnp.float32)
    a_mat = jnp.concatenate(
        [jnp.concatenate([inv_block, zeros_blk, phase_half], axis=1),   # y channels 0:F
         jnp.concatenate([zeros_blk, inv_block, phase_half], axis=1)],  # x channels F:2F
        axis=0)                                                         # (2F, 2H+1)

    kernel = functools.partial(_pos_embed_kernel, normalize=normalize, scale=float(scale),
                               batch_block=batch_block)

    # ---- VMEM / cost bookkeeping ----
    const_bytes = 2 * (H * H + W * W) + 4 * (W * HW + (2 * H + 1) * HW + 2 * F * (2 * H + 1))
    io_bytes = batch_block * (2 * HW + 4 * 2 * F * HW)
    interm_bytes = batch_block * 8 * (2 * F * HW) * 4
    vmem_limit = int(min(64 * 1024 * 1024,
                         max(32 * 1024 * 1024,
                             2 * (const_bytes + io_bytes) + interm_bytes + (4 << 20))))
    matmul_flops = 2 * (H * H * W + H * W * W + (2 * H + 1) * W * HW + 2 * F * (2 * H + 1) * HW)
    cost = pl.CostEstimate(
        flops=int(B * (matmul_flops + 8 * 2 * F * HW)),
        transcendentals=int(B * 2 * F * HW),
        bytes_accessed=int(B * (2 * HW + 4 * 2 * F * HW) + const_bytes))

    out_flat = pl.pallas_call(
        kernel,
        out_shape=jax.ShapeDtypeStruct((B, 2 * F, HW), jnp.float32),
        grid_spec=pltpu.PrefetchScalarGridSpec(
            num_scalar_prefetch=0,
            grid=(B // batch_block,),
            in_specs=[
                pl.BlockSpec((batch_block, H, W), lambda g: (g, 0, 0)),
                pl.BlockSpec((H, H), lambda g: (0, 0)),
                pl.BlockSpec((W, W), lambda g: (0, 0)),
                pl.BlockSpec((W, HW), lambda g: (0, 0)),
                pl.BlockSpec((2 * H + 1, HW), lambda g: (0, 0)),
                pl.BlockSpec((2 * F, 2 * H + 1), lambda g: (0, 0)),
            ],
            out_specs=pl.BlockSpec((batch_block, 2 * F, HW), lambda g: (g, 0, 0)),
        ),
        compiler_params=pltpu.CompilerParams(
            dimension_semantics=("parallel",),
            vmem_limit_bytes=vmem_limit),
        cost_estimate=cost,
    )(not_mask, lower, upper, tile_eye, sel_ext, a_mat)

    # Row-major contiguous reshape (no data movement) to PyTorch's NCHW layout.
    return out_flat.reshape(B, 2 * F, H, W)


def _reference(mask, num_pos_feats=64, temperature=10000, normalize=False, scale=None):
    """Pure-JAX transcription of the PyTorch forward for validation."""
    if scale is None:
        scale = 2 * math.pi
    not_mask = (~mask).astype(jnp.float32)
    y_embed = jnp.cumsum(not_mask, axis=1)
    x_embed = jnp.cumsum(not_mask, axis=2)
    if normalize:
        eps = 1e-06
        y_embed = (y_embed - 0.5) / (y_embed[:, -1:, :] + eps) * scale
        x_embed = (x_embed - 0.5) / (x_embed[:, :, -1:] + eps) * scale
    i = jnp.arange(num_pos_feats, dtype=jnp.float32)
    dim_t = jnp.power(jnp.float32(temperature), 2.0 * jnp.floor(i / 2.0) / num_pos_feats)
    pos_x = x_embed[:, :, :, None] / dim_t
    pos_y = y_embed[:, :, :, None] / dim_t
    B, H, W = mask.shape
    pos_x = jnp.stack((jnp.sin(pos_x[:, :, :, 0::2]), jnp.cos(pos_x[:, :, :, 1::2])),
                      axis=4).reshape(B, H, W, -1)
    pos_y = jnp.stack((jnp.sin(pos_y[:, :, :, 0::2]), jnp.cos(pos_y[:, :, :, 1::2])),
                      axis=4).reshape(B, H, W, -1)
    pos = jnp.concatenate((pos_y, pos_x), axis=3)
    return jnp.transpose(pos, (0, 3, 1, 2))


if __name__ == "__main__":
    key = jax.random.PRNGKey(0)
    B, H, W = 2, 16, 16
    F = 64
    # mask: True = padded pixel (as in DETR); ~30% padding, deterministic.
    mask = jax.random.bernoulli(key, 0.3, (B, H, W))

    # normalize=False (module default), one batch element per grid step (v7x: 1 TC per element).
    out = position_embedding_sine(mask, num_pos_feats=F, temperature=10000,
                                  normalize=False, batch_block=1)
    jax.block_until_ready(out)
    ref = _reference(mask, num_pos_feats=F, temperature=10000, normalize=False)
    assert out.shape == (B, 2 * F, H, W)
    assert jnp.allclose(out, ref, atol=1e-5, rtol=1e-5), float(jnp.max(jnp.abs(out - ref)))

    # normalize=True path, exercising the batch-blocked (single grid step) variant.
    out_n = position_embedding_sine(mask, num_pos_feats=F, temperature=10000,
                                    normalize=True, batch_block=2)
    jax.block_until_ready(out_n)
    ref_n = _reference(mask, num_pos_feats=F, temperature=10000, normalize=True)
    assert jnp.allclose(out_n, ref_n, atol=1e-5, rtol=1e-5), float(jnp.max(jnp.abs(out_n - ref_n)))

    print("KERNEL_OK")
</pallas_src>

<mosaic_0001>
module attributes {stable_mosaic.version = 11 : i64} {
  func.func @_pos_embed_kernel(%arg0: i32, %arg1: memref<1x16x16xbf16, #tpu.memory_space<vmem>>, %arg2: memref<16x16xbf16, #tpu.memory_space<vmem>>, %arg3: memref<16x16xbf16, #tpu.memory_space<vmem>>, %arg4: memref<16x256xf32, #tpu.memory_space<vmem>>, %arg5: memref<33x256xf32, #tpu.memory_space<vmem>>, %arg6: memref<128x33xf32, #tpu.memory_space<vmem>>, %arg7: memref<1x128x256xf32, #tpu.memory_space<vmem>>) attributes {dimension_semantics = [#tpu.dimension_semantics<parallel>], iteration_bounds = array<i64: 2>, scalar_prefetch = 0 : i64, scratch_operands = 0 : i64, tpu.core_type = #tpu.core_type<tc>, window_params = [{transform_indices = @transform_0, window_bounds = array<i64: 1, 16, 16>}, {pipeline_mode = #tpu.pipeline_mode<synchronous>, transform_indices = @transform_1, window_bounds = array<i64: 16, 16>}, {pipeline_mode = #tpu.pipeline_mode<synchronous>, transform_indices = @transform_2, window_bounds = array<i64: 16, 16>}, {pipeline_mode = #tpu.pipeline_mode<synchronous>, transform_indices = @transform_3, window_bounds = array<i64: 16, 256>}, {pipeline_mode = #tpu.pipeline_mode<synchronous>, transform_indices = @transform_4, window_bounds = array<i64: 33, 256>}, {pipeline_mode = #tpu.pipeline_mode<synchronous>, transform_indices = @transform_5, window_bounds = array<i64: 128, 33>}, {transform_indices = @transform_6, window_bounds = array<i64: 1, 128, 256>}]} {
    %c0 = arith.constant 0 : index
    %c0_0 = arith.constant 0 : index
    %c0_1 = arith.constant 0 : index
    %0 = vector.load %arg1[%c0, %c0_0, %c0_1] : memref<1x16x16xbf16, #tpu.memory_space<vmem>>, vector<1x16x16xbf16>
    %1 = vector.shape_cast %0 : vector<1x16x16xbf16> to vector<16x16xbf16>
    %c0_2 = arith.constant 0 : index
    %c0_3 = arith.constant 0 : index
    %2 = vector.load %arg2[%c0_2, %c0_3] : memref<16x16xbf16, #tpu.memory_space<vmem>>, vector<16x16xbf16>
    %cst = arith.constant dense<0.000000e+00> : vector<16x16xf32>
    %3 = tpu.matmul %2, %1, %cst {dimension_numbers = #tpu.dot_dimension_numbers<[1], [0], [0], [1], [0, 0, 1, 1], [], []>} : vector<16x16xbf16>, vector<16x16xbf16>, vector<16x16xf32> -> vector<16x16xf32>
    %c0_4 = arith.constant 0 : index
    %c0_5 = arith.constant 0 : index
    %4 = vector.load %arg3[%c0_4, %c0_5] : memref<16x16xbf16, #tpu.memory_space<vmem>>, vector<16x16xbf16>
    %cst_6 = arith.constant dense<0.000000e+00> : vector<16x16xf32>
    %5 = tpu.matmul %1, %4, %cst_6 {dimension_numbers = #tpu.dot_dimension_numbers<[1], [0], [0], [1], [0, 0, 1, 1], [], []>} : vector<16x16xbf16>, vector<16x16xbf16>, vector<16x16xf32> -> vector<16x16xf32>
    %cst_7 = arith.constant 1.000000e+00 : f32
    %6 = vector.broadcast %cst_7 : f32 to vector<1x16xf32>
    %7 = tpu.concatenate %3, %5, %6 in 0 : vector<16x16xf32>, vector<16x16xf32>, vector<1x16xf32> -> vector<33x16xf32>
    %c0_8 = arith.constant 0 : index
    %c0_9 = arith.constant 0 : index
    %8 = vector.load %arg4[%c0_8, %c0_9] : memref<16x256xf32, #tpu.memory_space<vmem>>, vector<16x256xf32>
    %cst_10 = arith.constant dense<0.000000e+00> : vector<33x256xf32>
    %9 = tpu.matmul %7, %8, %cst_10 {dimension_numbers = #tpu.dot_dimension_numbers<[1], [0], [0], [1], [0, 0, 1, 1], [], []>} : vector<33x16xf32>, vector<16x256xf32>, vector<33x256xf32> -> vector<33x256xf32>
    %c0_11 = arith.constant 0 : index
    %c0_12 = arith.constant 0 : index
    %10 = vector.load %arg5[%c0_11, %c0_12] : memref<33x256xf32, #tpu.memory_space<vmem>>, vector<33x256xf32>
    %11 = arith.mulf %10, %9 : vector<33x256xf32>
    %c0_13 = arith.constant 0 : index
    %c0_14 = arith.constant 0 : index
    %12 = vector.load %arg6[%c0_13, %c0_14] : memref<128x33xf32, #tpu.memory_space<vmem>>, vector<128x33xf32>
    %cst_15 = arith.constant dense<0.000000e+00> : vector<128x256xf32>
    %13 = tpu.matmul %12, %11, %cst_15 {dimension_numbers = #tpu.dot_dimension_numbers<[1], [0], [0], [1], [0, 0, 1, 1], [], []>} : vector<128x33xf32>, vector<33x256xf32>, vector<128x256xf32> -> vector<128x256xf32>
    %14 = math.sin %13 : vector<128x256xf32>
    %c0_16 = arith.constant 0 : index
    %c0_17 = arith.constant 0 : index
    %c0_18 = arith.constant 0 : index
    %15 = vector.load %arg7[%c0_16, %c0_17, %c0_18] : memref<1x128x256xf32, #tpu.memory_space<vmem>>, vector<1x128x256xf32>
    %16 = vector.shape_cast %15 : vector<1x128x256xf32> to vector<128x256xf32>
    %17 = vector.shape_cast %14 : vector<128x256xf32> to vector<1x128x256xf32>
    tpu.vector_store %arg7[%c0_16, %c0_17, %c0_18], %17 {strides = array<i32>} : memref<1x128x256xf32, #tpu.memory_space<vmem>>, vector<1x128x256xf32>,
    return
  }
  func.func @transform_0(%arg0: i32) -> (i32, i32, i32) {
    %c0_i32 = arith.constant 0 : i32
    %c0_i32_0 = arith.constant 0 : i32
    %c0_i32_1 = arith.constant 0 : i32
    return %arg0, %c0_i32, %c0_i32_0 : i32, i32, i32
  }
  func.func @transform_1(%arg0: i32) -> (i32, i32) {
    %c0_i32 = arith.constant 0 : i32
    %c0_i32_0 = arith.constant 0 : i32
    %c0_i32_1 = arith.constant 0 : i32
    return %c0_i32, %c0_i32_0 : i32, i32
  }
  func.func @transform_2(%arg0: i32) -> (i32, i32) {
    %c0_i32 = arith.constant 0 : i32
    %c0_i32_0 = arith.constant 0 : i32
    %c0_i32_1 = arith.constant 0 : i32
    return %c0_i32, %c0_i32_0 : i32, i32
  }
  func.func @transform_3(%arg0: i32) -> (i32, i32) {
    %c0_i32 = arith.constant 0 : i32
    %c0_i32_0 = arith.constant 0 : i32
    %c0_i32_1 = arith.constant 0 : i32
    return %c0_i32, %c0_i32_0 : i32, i32
  }
  func.func @transform_4(%arg0: i32) -> (i32, i32) {
    %c0_i32 = arith.constant 0 : i32
    %c0_i32_0 = arith.constant 0 : i32
    %c0_i32_1 = arith.constant 0 : i32
    return %c0_i32, %c0_i32_0 : i32, i32
  }
  func.func @transform_5(%arg0: i32) -> (i32, i32) {
    %c0_i32 = arith.constant 0 : i32
    %c0_i32_0 = arith.constant 0 : i32
    %c0_i32_1 = arith.constant 0 : i32
    return %c0_i32, %c0_i32_0 : i32, i32
  }
  func.func @transform_6(%arg0: i32) -> (i32, i32, i32) {
    %c0_i32 = arith.constant 0 : i32
    %c0_i32_0 = arith.constant 0 : i32
    %c0_i32_1 = arith.constant 0 : i32
    return %arg0, %c0_i32, %c0_i32_0 : i32, i32, i32
  }
}

</mosaic_0001>

<bundles_post_ra>
// kernel: tpu_custom_call.1
= control target key start
LH: loop header
LB: loop body
LE: loop exit
PB: predicated region body
PF: predicated region fallthrough
CT: control target
= control target key end

     0   :  { %11 = vsyncpa [#allocation3], 0  ;;  %s7469_s0 = inlined_call_operand.vmem [shape: bf16[2,16,16], index: 0, kind: input, shape index: {}]   ;;  %s7470_s1 = inlined_call_operand.vmem [shape: bf16[16,16], index: 1, kind: input, shape index: {}]   ;;  %s7471_s2 = inlined_call_operand.vmem [shape: bf16[16,16], index: 2, kind: input, shape index: {}]   ;;  %s7472_s3 = inlined_call_operand.vmem [shape: f32[16,256], index: 3, kind: input, shape index: {}]   ;;  %s7473_s4 = inlined_call_operand.vmem [shape: f32[33,256], index: 4, kind: input, shape index: {}]   ;;  %s7474_s5 = inlined_call_operand.vmem [shape: f32[128,33], index: 5, kind: input, shape index: {}]   ;;  %s7475_s6 = inlined_call_operand.hbm [shape: f32[2,128,256], index: 6, kind: output, shape index: {}]  }
   0x1   :  { %13 = vsyncpa [#allocation3 + $0x1], 0  ;;  %s4780_s21 = smov 0   ;;  %s4782_s22 = smov 0  }
   0x2   :  { %s4784_s23 = smov 0   ;;  %s4786_s24 = smov 0  }
   0x3 LB: > { %s4801_s25 = sadd.s32 4294967295, %s4731_s24   ;;  %s4166_s26 = sadd.s32 4294967294, %s4731_s24   ;;  %s4731_s24 = sphi %s4786_s24, %s7541_s24   ;;  %s4727_s23 = sphi %s4784_s23, %s7540_s23   ;;  %s4723_s22 = sphi %s4782_s22, %s7539_s22   ;;  %s4719_s21 = sphi %s4780_s21, %s7538_s21  }
   0x4   : > { %s4805_s27 = sadd.s32 1, %s4731_s24   ;;  %s157_s28 = sadd.s32 1, %s4727_s23 }
   0x5   : > { %s154_s29 = ssub.s32 %s4731_s24, %s4805_s27  ;;  %p167_p0 = scmp.ne.s32.totalorder %s4727_s23, %s4723_s22 }
   0x6   : > { %p155_p1 = scmp.eq.s32.totalorder %s154_s29, 0  ;;  %p168_p2 = scmp.eq.s32.totalorder %s4801_s25, 1 }
   0x7   : > { %p173_p3 = scmp.ne.s32.totalorder %s4723_s22, %s4719_s21  ;;  %p174_p4 = scmp.eq.s32.totalorder %s4166_s26, 1 }
   0x8   : > { %s4816_s30 = scalar_select %p155_p1, %s4727_s23, %s157_s28  }
   0x9   : > { %p4818_p5 = por %p168_p2, %p167_p0  ;;  %p4822_p6 = por %p174_p4, %p173_p3 }
   0xa   : > { %p4169_p7 = scmp.ge.s32.totalorder %s4731_s24, 1  ;;  %p215_p8 = scmp.lt.s32.totalorder %s4731_s24, 3 }
   0xc   : > { %p216_p9 = pnand %p4169_p7, %p215_p8 }
   0xd   : > { %p245_p10 = scmp.lt.s32.totalorder (!%p216_p9), %s4801_s25, 1  ;;  %s242_s18 = sand.u32 (!%p216_p9), 1, %s4723_s22  }
   0xe   : > { %219 = sbr.rel (%p216_p9) target bundleno = 1474 (0x5c2), region = 44  ;;  %s4170_s19 = sshll.u32 (!%p216_p9), %s242_s18, 8 }
   0xf   : > { %s5293_s20 = scalar_lea.vmem (!%p216_p9), [#allocation2], %s4170_s19  ;;  %s4335_s26 = sshll.u32 (!%p216_p9), %s4801_s25, 12 }
  0x10   : > { %s4104_s28 = sshll.u32 (!%p216_p9), %s5293_s20, 4  ;;  %s7421_s10 = scalar_lea.hbm (!%p216_p9), %s7475_s6, %s4335_s26  ;;  %s7423_s28 = int_to_ptr.vmem [resolvable:$true] %s4104_s28 }
  0x13   : > { %v4541_v0 = vld [vmem:[%s7471_s2] sm:$0xff]   ;;  %v4733_v1 = vmov 0.0   ;;  %s246_s11 = scalar_select %p245_p10, %s4801_s25, 1  ;;  %vm4734_vm0 = vmmov 0   ;;  %v366_v2 = vld [vmem:[%s7472_s3 + $0x18] sm:$0xff]  ;;  %vm266_vm1 = vcmask 130048  }
  0x14   : > { %4340 = vmatprep.subr.bf16.mxu0 %v4733_v1  ;;  %4346 = vmatprep.subr.bf16.mxu1 %v4733_v1  ;;  %v4542_v4 = vld [vmem:[%s7470_s1] sm:$0xff]   ;;  %v365_v5 = vld [vmem:[%s7472_s3 + $0x10] sm:$0xff]  ;;  %v364_v6 = vld [vmem:[%s7472_s3 + $0x8] sm:$0xff]  ;;  %v4735_v16 = vmov 1.0   ;;  %vm562_vm2 = vcmask 1040384   ;;  %vm513_vm3 = vcmask 269312  }
  0x15   : > { %4342 = vmatprep.mubr.msk.bf16.mxu0 %vm4734_vm0, %v4733_v1  ;;  %4347 = vmatpush3.bf16.msra.mxu1 %v4541_v0  ;;  %s4334_s12 = sshll.u32 %s246_s11, 3  ;;  %v363_v7 = vld [vmem:[%s7472_s3] sm:$0xff]  ;;  %v486_v26 = vld [vmem:[%s7473_s4 + $0x48] sm:$0x1]  ;;  %v484_v28 = vld [vmem:[%s7473_s4 + $0x38] sm:$0xff]  ;;  %s7429_s25 = scalar_lea.sflag [#allocation3], %s242_s18 }
  0x16   : > { %4348 = vmatprep.mubr.msk.bf16.mxu1 %vm4734_vm0, %v4733_v1  ;;  %s249_s15 = scalar_lea.vmem %s7469_s0, %s4334_s12  ;;  %v485_v27 = vld [vmem:[%s7473_s4 + $0x40] sm:$0x1]  ;;  %v483_v30 = vld [vmem:[%s7473_s4 + $0x30] sm:$0xff]  ;;  %v482_v32 = vld [vmem:[%s7473_s4 + $0x28] sm:$0xff]  ;;  %s4671_s11 = scalar_lea.vmem %s7423_s28, 4096 }
  0x17   : > { %v4540_v3 = vld [vmem:[%s249_s15] sm:$0xff]   ;;  %v480_v36 = vld [vmem:[%s7473_s4 + $0x18] sm:$0xff]  ;;  %v479_v38 = vld [vmem:[%s7473_s4 + $0x10] sm:$0xff]  ;;  %p4672_p11 = scmp.ne.s32.totalorder %s7423_s28, %s4671_s11  ;;  %s4742_s12 = smov [#allocation2]  }
  0x18   : > { %4341 = vmatpush3.bf16.msra.mxu0 %v4540_v3  ;;  %4349 = vmatmul.mubr.msk.bf16.vlgmr.msra.gmra.mxu1 %vm266_vm1, %v4540_v3  ;;  %v481_v34 = vld [vmem:[%s7473_s4 + $0x20] sm:$0xff]  ;;  %v478_v40 = vld [vmem:[%s7473_s4 + $0x8] sm:$0xff]  ;;  %v503_v50 = vld [vmem:[%s7474_s5 + $0x30] sm:$0xff]  ;;  %s4675_s13 = sshll.u32 %s4742_s12, 4  ;;  %s4676_s13 = int_to_ptr.vmem [resolvable:$false] %s4675_s13 }
  0x19   : > { %410 = vmatprep.subr.mxu0 %v366_v2  ;;  %663 = vmatprep.mubr.f32.mxu1 %v4733_v1  ;;  %v477_v42 = vld [vmem:[%s7473_s4] sm:$0xff]  ;;  %v502_v48 = vld [vmem:[%s7474_s5 + $0x28] sm:$0xff]  ;;  %v499_v51 = vld [vmem:[%s7474_s5 + $0x10] sm:$0xff]  ;;  %p4673_p12 = pnand %p4672_p11, %p4818_p5  ;;  %s4677_s14 = scalar_lea.vmem %s4676_s13, 8192 }
  0x1a   : > { %v497_v47 = vld [vmem:[%s7474_s5] sm:$0xff]  ;;  %v498_v49 = vld [vmem:[%s7474_s5 + $0x8] sm:$0xff]  ;;  %v504_v52 = vld [vmem:[%s7474_s5 + $0x38] sm:$0xff]  ;;  %p4678_p0 = scmp.lt.s32.totalorder %s7423_s28, %s4676_s13  ;;  %p4679_p1 = scmp.lt.s32.totalorder %s4677_s14, %s4671_s11 }
  0x1b   : > { %4343 = vmatmul.mubr.msk.bf16.vlgmr.msra.gmra.mxu0 %vm266_vm1, %v4542_v4  ;;  %v500_v53 = vld [vmem:[%s7474_s5 + $0x18] sm:$0xff]  ;;  %v505_v54 = vld [vmem:[%s7474_s5 + $0x40] sm:$0xff]  ;;  %v506_v56 = vld [vmem:[%s7474_s5 + $0x48] sm:$0xff]  ;;  %p4674_p13 = pneg %p4673_p12 }
  0x1c   : > { %411 = vmatpush1.msra.mxu0 %v365_v5  ;;  %446 = vmatprep.mubr.f32.mxu0 %v4733_v1  ;;  %v501_v55 = vld [vmem:[%s7474_s5 + $0x20] sm:$0xff]  ;;  %v507_v57 = vld [vmem:[%s7474_s5 + $0x50] sm:$0xff]  ;;  %v508_v58 = vld [vmem:[%s7474_s5 + $0x58] sm:$0xff]  ;;  %p4680_p2 = por %p4679_p1, %p4678_p0 }
  0x1d   : > { %412 = vmatprep.subr.mxu0 %v364_v6  ;;  %v509_v59 = vld [vmem:[%s7474_s5 + $0x60] sm:$0xff]  ;;  %v510_v60 = vld [vmem:[%s7474_s5 + $0x68] sm:$0xff]  ;;  %v511_v61 = vld [vmem:[%s7474_s5 + $0x70] sm:$0xff] }
  0x1e   : > { %413 = vmatpush1.msra.mxu0 %v363_v7  ;;  %v512_v62 = vld [vmem:[%s7474_s5 + $0x78] sm:$0xff]  ;;  %p4681_p3 = pnand %p4680_p2, %p4674_p13 }
  0xd8   : > { %v356_v8 = vpop.f32.mrf.mxu1 }
  0xda   : > { %v4350_v9 = vpop.f32.mrf.mxu1 }
  0xdb   : > { %v304_v10 = vpop.f32.mrf.mxu0 }
  0xdc   : > { %4178 = vmatmul.mubr.msk.f32.vlgmr.msra.gmra.mxu0 %vm266_vm1, %v304_v10  ;;  %v359_v11 = vpop.f32.mrf.mxu1 }
  0xdd   : > { %v4344_v12 = vpop.f32.mrf.mxu0  ;;  %452 = vmatprep.mubr.f32.mxu0 %v4733_v1 }
  0xde   : > { %v4351_v13 = vpop.f32.mrf.mxu1 }
  0xdf   : > { %v307_v14 = vpop.f32.mrf.mxu0 }
  0xe0   : > { %4179 = vmatmul.mubr.msk.f32.gmra.mxu0 %vm266_vm1, %v307_v14 }
  0xe1   : > { %v4345_v15 = vpop.f32.mrf.mxu0  ;;  %458 = vmatprep.mubr.f32.mxu0 %v4733_v1 }
  0xe4   : > { %4180 = vmatmul.mubr.msk.f32.gmra.mxu0 %vm266_vm1, %v356_v8 }
  0xe5   : > { %464 = vmatprep.mubr.f32.mxu0 %v4733_v1 }
  0xe8   : > { %4181 = vmatmul.mubr.msk.f32.gmra.mxu0 %vm266_vm1, %v359_v11 }
  0xe9   : > { %470 = vmatprep.mubr.f32.mxu0 %v4733_v1 }
  0xec   : > { %4182 = vmatmul.mubr.msk.f32.gmra.mxu0 %vm266_vm1, %v4735_v16 }
  0xed   : > { %633 = vmatprep.mubr.f32.mxu0 %v4733_v1 }
 0x19c   : > { %v448_v17 = vpop.f32.mrf.mxu0 }
 0x19d   : > { %v487_v46 = vmul.f32 %v477_v42, %v448_v17 }
 0x19e   : > { %v450_v18 = vpop.f32.mrf.mxu0 }
 0x19f   : > { %v488_v45 = vmul.f32 %v478_v40, %v450_v18 }
 0x1a0   : > { %v454_v19 = vpop.f32.mrf.mxu0 }
 0x1a1   : > { %v489_v44 = vmul.f32 %v479_v38, %v454_v19 }
 0x1a2   : > { %v456_v20 = vpop.f32.mrf.mxu0 }
 0x1a3   : > { %v490_v43 = vmul.f32 %v480_v36, %v456_v20  ;;  %v4740_v36 = vmov 920167782  }
 0x1a4   : > { %v460_v21 = vpop.f32.mrf.mxu0 }
 0x1a5   : > { %v491_v41 = vmul.f32 %v481_v34, %v460_v21  ;;  %v4739_v34 = vmov 2102212464  }
 0x1a6   : > { %v462_v22 = vpop.f32.mrf.mxu0 }
 0x1a7   : > { %v492_v39 = vmul.f32 %v482_v32, %v462_v22  ;;  %v4738_v32 = vmov 2131351028  }
 0x1a8   : > { %v466_v23 = vpop.f32.mrf.mxu0 }
 0x1a9   : > { %v493_v37 = vmul.f32 %v483_v30, %v466_v23  ;;  %v4737_v30 = vmov 2475754826  }
 0x1aa   : > { %v468_v24 = vpop.f32.mrf.mxu0 }
 0x1ab   : > { %v494_v35 = vmul.f32 %v484_v28, %v468_v24  ;;  %v4736_v28 = vmov 683565275  }
 0x1ac   : > { %v472_v25 = vpop.f32.mrf.mxu0 }
 0x1ad   : > { %v495_v33 = vmul.f32 %v485_v27, %v472_v25 }
 0x1ae   : > { %v474_v29 = vpop.f32.mrf.mxu0 }
 0x1af   : > { %v496_v31 = vmul.f32 %v486_v26, %v474_v29 }
 0x1b1   : > { %4183 = vmatprep.subr.msk.mxu0 %vm562_vm2, %v496_v31  ;;  %4352 = vmatprep.subr.msk.mxu1 %vm562_vm2, %v496_v31 }
 0x1b2   : > { %4184 = vmatpush1.msk.msra.mxu0 %vm562_vm2, %v495_v33  ;;  %4357 = vmatpush1.msk.msra.mxu1 %vm562_vm2, %v495_v33 }
 0x1b3   : > { %593 = vmatprep.subr.mxu0 %v494_v35  ;;  %4353 = vmatprep.subr.mxu1 %v494_v35 }
 0x1b4   : > { %594 = vmatpush1.msra.mxu0 %v493_v37  ;;  %4358 = vmatpush1.msra.mxu1 %v493_v37 }
 0x1b5   : > { %595 = vmatprep.subr.mxu0 %v492_v39  ;;  %4354 = vmatprep.subr.mxu1 %v492_v39 }
 0x1b6   : > { %596 = vmatpush1.msra.mxu0 %v491_v41  ;;  %4359 = vmatpush1.msra.mxu1 %v491_v41 }
 0x1b7   : > { %597 = vmatprep.subr.mxu0 %v490_v43  ;;  %4355 = vmatprep.subr.mxu1 %v490_v43 }
 0x1b8   : > { %598 = vmatpush1.msra.mxu0 %v489_v44  ;;  %4360 = vmatpush1.msra.mxu1 %v489_v44 }
 0x1b9   : > { %599 = vmatprep.subr.mxu0 %v488_v45  ;;  %4356 = vmatprep.subr.mxu1 %v488_v45  ;;  %v4741_v45 = vmov 1326507024  }
 0x1ba   : > { %600 = vmatpush1.msra.mxu0 %v487_v46  ;;  %4361 = vmatpush1.msra.mxu1 %v487_v46 }
 0x1bb   : > { %4185 = vmatmul.mubr.msk.f32.vlgmr.msra.gmra.mxu0 %vm513_vm3, %v497_v47  ;;  %4190 = vmatmul.mubr.msk.f32.vlgmr.msra.gmra.mxu1 %vm513_vm3, %v502_v48 }
 0x1bc   : > { %639 = vmatprep.mubr.f32.mxu0 %v4733_v1  ;;  %669 = vmatprep.mubr.f32.mxu1 %v4733_v1 }
 0x1bf   : > { %4186 = vmatmul.mubr.msk.f32.gmra.mxu0 %vm513_vm3, %v498_v49  ;;  %4191 = vmatmul.mubr.msk.f32.gmra.mxu1 %vm513_vm3, %v503_v50 }
 0x1c0   : > { %645 = vmatprep.mubr.f32.mxu0 %v4733_v1  ;;  %675 = vmatprep.mubr.f32.mxu1 %v4733_v1 }
 0x1c3   : > { %4187 = vmatmul.mubr.msk.f32.gmra.mxu0 %vm513_vm3, %v499_v51  ;;  %4192 = vmatmul.mubr.msk.f32.gmra.mxu1 %vm513_vm3, %v504_v52 }
 0x1c4   : > { %651 = vmatprep.mubr.f32.mxu0 %v4733_v1  ;;  %681 = vmatprep.mubr.f32.mxu1 %v4733_v1 }
 0x1c7   : > { %4188 = vmatmul.mubr.msk.f32.gmra.mxu0 %vm513_vm3, %v500_v53  ;;  %4193 = vmatmul.mubr.msk.f32.gmra.mxu1 %vm513_vm3, %v505_v54 }
 0x1c8   : > { %657 = vmatprep.mubr.f32.mxu0 %v4733_v1  ;;  %687 = vmatprep.mubr.f32.mxu1 %v4733_v1 }
 0x1cb   : > { %4189 = vmatmul.mubr.msk.f32.gmra.mxu0 %vm513_vm3, %v501_v55  ;;  %4194 = vmatmul.mubr.msk.f32.gmra.mxu1 %vm513_vm3, %v506_v56 }
 0x1cc   : > { %693 = vmatprep.mubr.f32.mxu1 %v4733_v1 }
 0x1cf   : > { %4195 = vmatmul.mubr.msk.f32.gmra.mxu1 %vm513_vm3, %v507_v57 }
 0x1d0   : > { %699 = vmatprep.mubr.f32.mxu1 %v4733_v1 }
 0x1d3   : > { %4196 = vmatmul.mubr.msk.f32.gmra.mxu1 %vm513_vm3, %v508_v58 }
 0x1d4   : > { %705 = vmatprep.mubr.f32.mxu1 %v4733_v1 }
 0x1d7   : > { %4197 = vmatmul.mubr.msk.f32.gmra.mxu1 %vm513_vm3, %v509_v59 }
 0x1d8   : > { %711 = vmatprep.mubr.f32.mxu1 %v4733_v1 }
 0x1db   : > { %4198 = vmatmul.mubr.msk.f32.gmra.mxu1 %vm513_vm3, %v510_v60 }
 0x1dc   : > { %717 = vmatprep.mubr.f32.mxu1 %v4733_v1 }
 0x1df   : > { %4199 = vmatmul.mubr.msk.f32.gmra.mxu1 %vm513_vm3, %v511_v61 }
 0x1e0   : > { %723 = vmatprep.mubr.f32.mxu1 %v4733_v1 }
 0x1e3   : > { %4200 = vmatmul.mubr.msk.f32.gmra.mxu1 %vm513_vm3, %v512_v62 }
 0x27b   : > { %v4977_v63 = vpop.f32.mrf.mxu0  ;;  %v4979_v0 = vpop.f32.mrf.mxu1 }
 0x27c   : > { %v730_v2 = vand.u32 2147483647, %v4977_v63  ;;  %v733_v3 = vand.u32 2139095040, %v4977_v63  ;;  %v1770_v4 = vand.u32 2147483647, %v4979_v0  ;;  %v1773_v5 = vand.u32 2139095040, %v4979_v0 }
 0x27d   : > { %v4985_v6 = vpop.f32.mrf.mxu0  ;;  %vm732_vm3 = vcmp.lt.s32.totalorder %v4977_v63, 0 }
 0x27e   : > { %v734_v1 = vshrl.u32 %v733_v3, 23  ;;  %v737_v7 = vand.u32 8388607, %v730_v2  ;;  %v1774_v8 = vshrl.u32 %v1773_v5, 23  ;;  %v1777_v9 = vand.u32 8388607, %v1770_v4 }
 0x27f   : > { %v837_v10 = vand.u32 2139095040, %v4985_v6  ;;  %v834_v22 = vand.u32 2147483647, %v4985_v6 }
 0x280   : > { %v4201_v11 = vadd.s32 4294967169, %v734_v1  ;;  %v4241_v12 = vadd.s32 4294967169, %v1774_v8  ;;  %v738_v15 = vor.u32 8388608, %v737_v7  ;;  %v1778_v16 = vor.u32 8388608, %v1777_v9 }
 0x281   : > { %v838_v13 = vshrl.u32 %v837_v10, 23 }
 0x282   : > { %v740_v14 = vadd.s32 1, %v4201_v11  ;;  %v1780_v17 = vadd.s32 1, %v4241_v12  ;;  %v4993_v24 = vshll.u32 %v738_v15, 8  ;;  %v4997_v26 = vshll.u32 %v1778_v16, 8 }
 0x283   : > { %v4205_v19 = vadd.s32 4294967169, %v838_v13 }
 0x284   : > { %vm741_vm4 = vcmp.gt.s32.totalorder %v740_v14, 0  ;;  %vm1781_vm5 = vcmp.gt.s32.totalorder %v1780_v17, 0 }
 0x285   : > { %v742_v18 = vsel %vm741_vm4, %v740_v14, 0  ;;  %v1782_v21 = vsel %vm1781_vm5, %v1780_v17, 0  ;;  %v5006_v39 = vadd.s32 1, %v4205_v19  ;;  %vm5117_vm5 = vcmp.le.f32.partialorder %v730_v2, 0.7853982 }
 0x286   : > { %v744_v20 = vand.u32 31, %v742_v18  ;;  %v743_v23 = vshrl.u32 %v742_v18, 5  ;;  %v4995_v25 = vand.u32 31, %v1782_v21  ;;  %v5004_v38 = vshrl.u32 %v1782_v21, 5 }
 0x287   : > { %vm845_vm10 = vcmp.gt.s32.totalorder %v5006_v39, 0 }
 0x288   : > { %v745_v27 = vsub.s32 32, %v744_v20  ;;  %v747_v29 = vshll.u32 %v4736_v28, %v744_v20  ;;  %v750_v31 = vshll.u32 %v4737_v30, %v744_v20  ;;  %v753_v33 = vshll.u32 %v4738_v32, %v744_v20 }
 0x289   : > { %v756_v35 = vshll.u32 %v4739_v34, %v744_v20  ;;  %v759_v37 = vshll.u32 %v4740_v36, %v744_v20  ;;  %vm762_vm6 = vcmp.lt.s32.totalorder %v743_v23, 1  ;;  %vm765_vm7 = vcmp.lt.s32.totalorder %v743_v23, 4 }
 0x28a   : > { %v746_v40 = vshrl.u32 %v4736_v28, %v745_v27  ;;  %v748_v41 = vshrl.u32 %v4737_v30, %v745_v27  ;;  %v751_v42 = vshrl.u32 %v4738_v32, %v745_v27  ;;  %v754_v43 = vshrl.u32 %v4739_v34, %v745_v27 }
 0x28b   : > { %v757_v44 = vshrl.u32 %v4740_v36, %v745_v27  ;;  %v760_v46 = vshrl.u32 %v4741_v45, %v745_v27  ;;  %v1785_v50 = vsub.s32 32, %v4995_v25  ;;  %vm763_vm8 = vcmp.lt.s32.totalorder %v743_v23, 2 }
 0x28c   : > { %v749_v47 = vor.u32 %v748_v41, %v747_v29  ;;  %v752_v48 = vor.u32 %v751_v42, %v750_v31  ;;  %v755_v49 = vor.u32 %v754_v43, %v753_v33  ;;  %vm764_vm9 = vcmp.lt.s32.totalorder %v743_v23, 3 }
 0x28d   : > { %v758_v51 = vor.u32 %v757_v44, %v756_v35  ;;  %v761_v52 = vor.u32 %v760_v46, %v759_v37  ;;  %v1787_v60 = vshll.u32 %v4736_v28, %v4995_v25  ;;  %v1788_v3 = vshrl.u32 %v4737_v30, %v1785_v50 }
 0x28e   : > { %v766_v53 = vsel %vm762_vm6, %v746_v40, %v749_v47  ;;  %v767_v54 = vsel %vm765_vm7, %v755_v49, 2102212464  ;;  %v770_v55 = vsel %vm762_vm6, %v749_v47, %v752_v48  ;;  %v774_v56 = vsel %vm762_vm6, %v752_v48, %v755_v49 }
 0x28f   : > { %v768_v57 = vsel %vm764_vm9, %v752_v48, %v767_v54  ;;  %v771_v58 = vsel %vm765_vm7, %v758_v51, 920167782  ;;  %v775_v59 = vsel %vm765_vm7, %v761_v52, 1326507024  ;;  %v1790_v5 = vshll.u32 %v4737_v30, %v4995_v25 }
 0x290   : > { %v772_v61 = vsel %vm764_vm9, %v755_v49, %v771_v58  ;;  %v776_v62 = vsel %vm764_vm9, %v758_v51, %v775_v59  ;;  %v769_v1 = vsel %vm763_vm8, %v766_v53, %v768_v57  ;;  %v1791_v9 = vshrl.u32 %v4738_v32, %v1785_v50  ;;  %v5058_v51 = vpop.f32.mrf.mxu1 }
 0x291   : > { %v773_v7 = vsel %vm763_vm8, %v770_v55, %v772_v61  ;;  %v777_v8 = vsel %vm763_vm8, %v774_v56, %v776_v62  ;;  %v1789_v14 = vor.u32 %v1788_v3, %v1787_v60  ;;  %v1793_v16 = vshll.u32 %v4738_v32, %v4995_v25 }
 0x292   : > { %v5026_v10 = vmul.u32.u64.low %v4993_v24, %v777_v8  ;;  %v5027_v11 = vmul.u32.u64.high %v4993_v24, %v777_v8, %v5026_v10  ;;  %v5030_v12 = vmul.u32.u64.low %v4993_v24, %v773_v7  ;;  %v5031_v13 = vmul.u32.u64.high %v4993_v24, %v773_v7, %v5030_v12 }
 0x293   : > { %v1792_v15 = vor.u32 %v1791_v9, %v1790_v5  ;;  %v1794_v17 = vshrl.u32 %v4739_v34, %v1785_v50  ;;  %v1786_v18 = vshrl.u32 %v4736_v28, %v1785_v50  ;;  %v1796_v19 = vshll.u32 %v4739_v34, %v4995_v25 }
 0x294   : > { %v1797_v20 = vshrl.u32 %v4740_v36, %v1785_v50  ;;  %v1800_v21 = vshrl.u32 %v4741_v45, %v1785_v50  ;;  %v785_v23 = vmul.u32 %v4993_v24, %v769_v1  ;;  %v1799_v29 = vshll.u32 %v4740_v36, %v4995_v25 }
 0x295   : > { %v1795_v27 = vor.u32 %v1794_v17, %v1793_v16  ;;  %vm1802_vm11 = vcmp.lt.s32.totalorder %v5004_v38, 1  ;;  %vm787_vm12 = vc.u32 %v5027_v11, %v5030_v12  ;;  %v788_v31 = vadd.s32 1, %v5031_v13 }
 0x296   : > { %v1798_v33 = vor.u32 %v1797_v20, %v1796_v19  ;;  %vm1803_vm13 = vcmp.lt.s32.totalorder %v5004_v38, 2  ;;  %v1801_v35 = vor.u32 %v1800_v21, %v1799_v29  ;;  %vm1804_vm14 = vcmp.lt.s32.totalorder %v5004_v38, 3 }
 0x297   : > { %vm1805_vm15 = vcmp.lt.s32.totalorder %v5004_v38, 4  ;;  %v1810_v24 = vsel %vm1802_vm11, %v1789_v14, %v1792_v15  ;;  %v789_v37 = vsel %vm787_vm12, %v788_v31, %v5031_v13  ;;  %v1814_v41 = vsel %vm1802_vm11, %v1792_v15, %v1795_v27 }
 0x298   : > { %v1807_v40 = vsel %vm1805_vm15, %v1795_v27, 2102212464  ;;  %v1811_v25 = vsel %vm1805_vm15, %v1798_v33, 920167782  ;;  %v790_v42 = vadd.s32 %v789_v37, %v785_v23  ;;  %v1806_v43 = vsel %vm1802_vm11, %v1786_v18, %v1789_v14 }
 0x299   : > { %v1812_v44 = vsel %vm1804_vm14, %v1795_v27, %v1811_v25  ;;  %v1815_v46 = vsel %vm1805_vm15, %v1801_v35, 1326507024  ;;  %v1808_v47 = vsel %vm1804_vm14, %v1792_v15, %v1807_v40  ;;  %v846_v50 = vsel %vm845_vm10, %v5006_v39, 0 }
 0x29a   : > { %v1813_v48 = vsel %vm1803_vm13, %v1810_v24, %v1812_v44  ;;  %v1816_v49 = vsel %vm1804_vm14, %v1798_v33, %v1815_v46  ;;  %v791_v52 = vadd.s32 536870912, %v790_v42  ;;  %v841_v58 = vand.u32 8388607, %v834_v22 }
 0x29b   : > { %v1817_v53 = vsel %vm1803_vm13, %v1814_v41, %v1816_v49  ;;  %v5063_v54 = vmul.u32.u64.low %v4997_v26, %v1813_v48  ;;  %v5064_v55 = vmul.u32.u64.high %v4997_v26, %v1813_v48, %v5063_v54  ;;  %v1809_v39 = vsel %vm1803_vm13, %v1806_v43, %v1808_v47 }
 0x29c   : > { %v5068_v56 = vmul.u32.u64.low %v4997_v26, %v1817_v53  ;;  %v5069_v57 = vmul.u32.u64.high %v4997_v26, %v1817_v53, %v5068_v56  ;;  %v5073_v59 = vshrl.u32 %v791_v52, 30  ;;  %v848_v60 = vand.u32 31, %v846_v50 }
 0x29d   : > { %v1874_v61 = vand.u32 2147483647, %v5058_v51  ;;  %v1828_v3 = vadd.s32 1, %v5064_v55  ;;  %v1825_v1 = vmul.u32 %v4997_v26, %v1809_v39  ;;  %v842_v7 = vor.u32 8388608, %v841_v58 }
 0x29e   : > { %v793_v62 = vshll.u32 %v5073_v59, 30  ;;  %v849_v5 = vsub.s32 32, %v848_v60  ;;  %vm1827_vm0 = vc.u32 %v5069_v57, %v5063_v54  ;;  %v1877_v8 = vand.u32 2139095040, %v5058_v51 }
 0x29f   : > { %v1829_v38 = vsel %vm1827_vm0, %v1828_v3, %v5064_v55  ;;  %v5087_v10 = vshrl.u32 %v846_v50, 5  ;;  %v5091_v13 = vand.u32 8388607, %v1874_v61  ;;  %v851_v15 = vshll.u32 %v4736_v28, %v848_v60 }
 0x2a0   : > { %v5084_v9 = vsub.s32 %v790_v42, %v793_v62  ;;  %v1830_v14 = vadd.s32 %v1829_v38, %v1825_v1  ;;  %v852_v26 = vshrl.u32 %v4737_v30, %v849_v5  ;;  %v854_v16 = vshll.u32 %v4737_v30, %v848_v60 }
 0x2a1   : > { %v855_v18 = vshrl.u32 %v4738_v32, %v849_v5  ;;  %v857_v19 = vshll.u32 %v4738_v32, %v848_v60  ;;  %v858_v20 = vshrl.u32 %v4739_v34, %v849_v5  ;;  %v860_v23 = vshll.u32 %v4739_v34, %v848_v60 }
 0x2a2   : > { %v796_v17 = vsub.s32 0, %v5084_v9  ;;  %v1831_v21 = vadd.s32 536870912, %v1830_v14  ;;  %v5101_v27 = vshll.u32 %v842_v7, 8  ;;  %v1878_v29 = vshrl.u32 %v1877_v8, 23 }
 0x2a3   : > { %v786_v31 = vadd.s32 %v5030_v12, %v5027_v11  ;;  %v861_v35 = vshrl.u32 %v4740_v36, %v849_v5  ;;  %vm866_vm1 = vcmp.lt.s32.totalorder %v5087_v10, 1  ;;  %v863_v37 = vshll.u32 %v4740_v36, %v848_v60 }
 0x2a4   : > { %v4202_v33 = vmin.u32 %v796_v17, %v5084_v9  ;;  %v1832_v24 = vshrl.u32 %v1831_v21, 30  ;;  %v864_v40 = vshrl.u32 %v4741_v45, %v849_v5  ;;  %vm869_vm2 = vcmp.lt.s32.totalorder %v5087_v10, 4 }
 0x2a5   : > { %v853_v41 = vor.u32 %v852_v26, %v851_v15  ;;  %v856_v42 = vor.u32 %v855_v18, %v854_v16  ;;  %v859_v43 = vor.u32 %v858_v20, %v857_v19  ;;  %v850_v12 = vshrl.u32 %v4736_v28, %v849_v5 }
 0x2a6   : > { %v798_v25 = vclz %v4202_v33  ;;  %v1833_v11 = vshll.u32 %v1832_v24, 30  ;;  %v862_v44 = vor.u32 %v861_v35, %v860_v23  ;;  %vm868_vm4 = vcmp.lt.s32.totalorder %v5087_v10, 3 }
 0x2a7   : > { %v865_v47 = vor.u32 %v864_v40, %v863_v37  ;;  %v4245_v48 = vadd.s32 4294967169, %v1878_v29  ;;  %v1882_v49 = vor.u32 8388608, %v5091_v13  ;;  %vm867_vm6 = vcmp.lt.s32.totalorder %v5087_v10, 2 }
 0x2a8   : > { %v4203_v46 = vadd.s32 4294967294, %v798_v25  ;;  %v5121_v52 = vsub.s32 %v1830_v14, %v1833_v11  ;;  %v871_v53 = vsel %vm869_vm2, %v859_v43, 2102212464  ;;  %v875_v55 = vsel %vm869_vm2, %v862_v44, 920167782 }
 0x2a9   : > { %v816_v56 = vsub.s32 4, %v5073_v59  ;;  %vm1772_vm8 = vcmp.lt.s32.totalorder %v4979_v0, 0  ;;  %v874_v2 = vsel %vm866_vm1, %v853_v41, %v856_v42  ;;  %v876_v58 = vsel %vm868_vm4, %v859_v43, %v875_v55 }
 0x2aa   : > { %vm4204_vm7 = vcmp.lt.s32.totalorder %v4203_v46, 0  ;;  %v1836_v60 = vsub.s32 0, %v5121_v52  ;;  %v870_v62 = vsel %vm866_vm1, %v850_v12, %v853_v41  ;;  %v878_v3 = vsel %vm866_vm1, %v856_v42, %v859_v43 }
 0x2ab   : > { %v801_v39 = vsel %vm4204_vm7, 0, %v4203_v46  ;;  %v872_v7 = vsel %vm868_vm4, %v856_v42, %v871_v53  ;;  %v879_v8 = vsel %vm869_vm2, %v865_v47, 1326507024  ;;  %vm5146_vm9 = vcmp.le.f32.partialorder %v1770_v4, 0.7853982 }
 0x2ac   : > { %v802_v5 = vsub.s32 32, %v801_v39  ;;  %v806_v1 = vsub.s32 4294967266, %v801_v39  ;;  %v803_v38 = vshll.u32 %v5084_v9, %v801_v39  ;;  %v4242_v15 = vmin.u32 %v1836_v60, %v5121_v52 }
 0x2ad   : > { %v877_v26 = vsel %vm867_vm6, %v874_v2, %v876_v58  ;;  %v880_v16 = vsel %vm868_vm4, %v862_v44, %v879_v8  ;;  %v1884_v9 = vadd.s32 1, %v4245_v48  ;;  %v817_v4 = vsel %vm732_vm3, %v816_v56, %v5073_v59 }
 0x2ae   : > { %v804_v17 = vshrl.u32 %v786_v31, %v802_v5  ;;  %v807_v18 = vadd.s32 127, %v806_v1  ;;  %v881_v19 = vsel %vm867_vm6, %v878_v3, %v880_v16  ;;  %v1838_v20 = vclz %v4242_v15 }
 0x2af   : > { %v1856_v21 = vsub.s32 4, %v1832_v24  ;;  %v873_v23 = vsel %vm867_vm6, %v870_v62, %v872_v7  ;;  %v5163_v35 = vmul.u32.u64.low %v5101_v27, %v881_v19  ;;  %v5164_v37 = vmul.u32.u64.high %v5101_v27, %v881_v19, %v5163_v35 }
 0x2b0   : > { %v805_v29 = vor.u32 %v804_v17, %v803_v38  ;;  %v808_v33 = vshll.u32 %v807_v18, 23  ;;  %v4243_v31 = vadd.s32 4294967294, %v1838_v20  ;;  %vm1885_vm10 = vcmp.gt.s32.totalorder %v1884_v9, 0 }
 0x2b1   : > { %v5167_v40 = vmul.u32.u64.low %v5101_v27, %v877_v26  ;;  %v5168_v25 = vmul.u32.u64.high %v5101_v27, %v877_v26, %v5167_v40  ;;  %v819_v59 = vsel %vm5117_vm5, 0, %v817_v4  ;;  %v1826_v10 = vadd.s32 %v5063_v54, %v5069_v57 }
 0x2b2   : > { %v809_v41 = vor.u32 4788187, %v808_v33  ;;  %v1886_v42 = vsel %vm1885_vm10, %v1884_v9, 0  ;;  %vm4244_vm11 = vcmp.lt.s32.totalorder %v4243_v31, 0  ;;  %v1857_v43 = vsel %vm1772_vm8, %v1856_v21, %v1832_v24 }
 0x2b3   : > { %v889_v11 = vmul.u32 %v5101_v27, %v873_v23  ;;  %v1888_v12 = vand.u32 31, %v1886_v42  ;;  %v812_v46 = vcvt.s32.f32 %v805_v29  ;;  %v1841_v47 = vsel %vm4244_vm11, 0, %v4243_v31 }
 0x2b4   : > { %v810_v44 = vand.u32 2147483647, %v809_v41  ;;  %vm891_vm12 = vc.u32 %v5164_v37, %v5167_v40  ;;  %v823_v48 = vadd.s32 3, %v819_v59  ;;  %v1842_v53 = vsub.s32 32, %v1841_v47 }
 0x2b5   : > { %v1846_v55 = vsub.s32 4294967266, %v1841_v47  ;;  %v892_v56 = vadd.s32 1, %v5168_v25  ;;  %v1859_v57 = vsel %vm5146_vm9, 0, %v1857_v43  ;;  %v5183_v2 = vshrl.u32 %v1886_v42, 5 }
 0x2b6   : > { %v813_v54 = vmul.f32 %v812_v46, %v810_v44  ;;  %v1889_v24 = vsub.s32 32, %v1888_v12  ;;  %v1843_v27 = vshll.u32 %v5121_v52, %v1841_v47  ;;  %v1844_v58 = vshrl.u32 %v1826_v10, %v1842_v53 }
 0x2b7   : > { %v1847_v39 = vadd.s32 127, %v1846_v55  ;;  %v893_v60 = vsel %vm891_vm12, %v892_v56, %v5168_v25  ;;  %v1891_v5 = vshll.u32 %v4736_v28, %v1888_v12  ;;  %v1894_v38 = vshll.u32 %v4737_v30, %v1888_v12 }
 0x2b8   : > { %v814_v62 = vxor.u32 2147483648, %v813_v54  ;;  %v894_v3 = vadd.s32 %v893_v60, %v889_v11  ;;  %v1892_v1 = vshrl.u32 %v4737_v30, %v1889_v24  ;;  %v1845_v7 = vor.u32 %v1844_v58, %v1843_v27 }
 0x2b9   : > { %v1848_v8 = vshll.u32 %v1847_v39, 23  ;;  %v1895_v15 = vshrl.u32 %v4738_v32, %v1889_v24  ;;  %v1897_v16 = vshll.u32 %v4738_v32, %v1888_v12  ;;  %v1898_v17 = vshrl.u32 %v4739_v34, %v1889_v24 }
 0x2ba   : > { %v815_v26 = vsel %vm732_vm3, %v814_v62, %v813_v54  ;;  %v895_v52 = vadd.s32 536870912, %v894_v3  ;;  %v1893_v9 = vor.u32 %v1892_v1, %v1891_v5  ;;  %v1900_v4 = vshll.u32 %v4739_v34, %v1888_v12  ;;  %v5248_v62 = vpop.f32.mrf.mxu0 }
 0x2bb   : > { %v818_v18 = vsel %vm5117_vm5, %v4977_v63, %v815_v26  ;;  %v1849_v19 = vor.u32 4788187, %v1848_v8  ;;  %v1852_v20 = vcvt.s32.f32 %v1845_v7  ;;  %v1901_v23 = vshrl.u32 %v4740_v36, %v1889_v24 }
 0x2bc   : > { %4543 = vcosq.f32 %v818_v18  ;;  %v896_v21 = vshrl.u32 %v895_v52, 30  ;;  %v1896_v33 = vor.u32 %v1895_v15, %v1894_v38  ;;  %v1904_v35 = vshrl.u32 %v4741_v45, %v1889_v24 }
 0x2bd   : > { %4545 = vsinq.f32 %v818_v18  ;;  %v1850_v29 = vand.u32 2147483647, %v1849_v19  ;;  %v5201_v31 = vand.u32 3, %v823_v48  ;;  %v1902_v41 = vor.u32 %v1901_v23, %v1900_v4 }
 0x2be   : > { %v897_v25 = vshll.u32 %v896_v21, 30  ;;  %v1863_v59 = vadd.s32 3, %v1859_v57  ;;  %vm836_vm13 = vcmp.lt.s32.totalorder %v4985_v6, 0  ;;  %v1899_v10 = vor.u32 %v1898_v17, %v1897_v16 }
 0x2bf   : > { %v1853_v50 = vmul.f32 %v1852_v20, %v1850_v29  ;;  %v1903_v42 = vshll.u32 %v4740_v36, %v1888_v12  ;;  %v1890_v11 = vshrl.u32 %v4736_v28, %v1889_v24  ;;  %vm1906_vm14 = vcmp.lt.s32.totalorder %v5183_v2, 1 }
 0x2c0   : > { %v5205_v43 = vsub.s32 %v894_v3, %v897_v25  ;;  %v5211_v44 = vshll.u32 %v1882_v49, 8  ;;  %vm1909_vm15 = vcmp.lt.s32.totalorder %v5183_v2, 4  ;;  %v1914_v48 = vsel %vm1906_vm14, %v1893_v9, %v1896_v33 }
 0x2c1   : > { %v1854_v46 = vxor.u32 2147483648, %v1853_v50  ;;  %v1905_v47 = vor.u32 %v1904_v35, %v1903_v42  ;;  %vm5218_vm0 = vcmp.le.f32.partialorder %v834_v22, 0.7853982  ;;  %v920_v55 = vsub.s32 4, %v896_v21 }
 0x2c2   : > { %v900_v53 = vsub.s32 0, %v5205_v43  ;;  %vm1908_vm1 = vcmp.lt.s32.totalorder %v5183_v2, 3  ;;  %v1915_v13 = vsel %vm1909_vm15, %v1902_v41, 920167782  ;;  %vm1907_vm2 = vcmp.lt.s32.totalorder %v5183_v2, 2 }
 0x2c3   : > { %v1855_v49 = vsel %vm1772_vm8, %v1854_v46, %v1853_v50  ;;  %v1911_v22 = vsel %vm1909_vm15, %v1899_v10, 2102212464  ;;  %v1916_v56 = vsel %vm1908_vm1, %v1899_v10, %v1915_v13  ;;  %v1918_v27 = vsel %vm1906_vm14, %v1896_v33, %v1899_v10 }
 0x2c4   : > { %v1858_v54 = vsel %vm5146_vm9, %v4979_v0, %v1855_v49  ;;  %v4206_v57 = vmin.u32 %v900_v53, %v5205_v43  ;;  %v1917_v24 = vsel %vm1907_vm2, %v1914_v48, %v1916_v56  ;;  %v1919_v58 = vsel %vm1909_vm15, %v1905_v47, 1326507024 }
 0x2c5   : > { %4547 = vcosq.f32 %v1858_v54  ;;  %v5244_v39 = vmul.u32.u64.low %v5211_v44, %v1917_v24  ;;  %v5245_v60 = vmul.u32.u64.high %v5211_v44, %v1917_v24, %v5244_v39  ;;  %vm822_vm3 = vweird.f32 %v4977_v63 }
 0x2c6   : > { %4549 = vsinq.f32 %v1858_v54  ;;  %v902_v14 = vclz %v4206_v57  ;;  %v1910_v3 = vsel %vm1906_vm14, %v1890_v11, %v1893_v9  ;;  %v1912_v5 = vsel %vm1908_vm1, %v1896_v33, %v1911_v22 }
 0x2c7   : > { %vm825_vm4 = vcmp.lt.s32.totalorder %v5201_v31, 2  ;;  %vm826_vm5 = vcmp.eq.s32.totalorder %v5201_v31, 0  ;;  %vm829_vm6 = vcmp.eq.s32.totalorder %v5201_v31, 2  ;;  %v1920_v1 = vsel %vm1908_vm1, %v1902_v41, %v1919_v58 }
 0x2c8   : > { %v4207_v7 = vadd.s32 4294967294, %v902_v14  ;;  %v921_v8 = vsel %vm836_vm13, %v920_v55, %v896_v21  ;;  %v1921_v38 = vsel %vm1907_vm2, %v1918_v27, %v1920_v1  ;;  %v941_v15 = vand.u32 2139095040, %v5248_v62 }
 0x2c9   : > { %v4544_v26 = vpop.eup %4543  ;;  %v1864_v52 = vand.u32 3, %v1863_v59  ;;  %v1913_v16 = vsel %vm1907_vm2, %v1910_v3, %v1912_v5  ;;  %v5269_v17 = vmul.u32.u64.low %v5211_v44, %v1921_v38  ;;  %v5270_v18 = vmul.u32.u64.high %v5211_v44, %v1921_v38, %v5269_v17 }
 0x2ca   : > { %v4546_v19 = vpop.eup %4545  ;;  %v830_v9 = vxor.u32 2147483648, %v4544_v26  ;;  %vm4208_vm7 = vcmp.lt.s32.totalorder %v4207_v7, 0  ;;  %v1932_v4 = vadd.s32 1, %v5245_v60  ;;  %v942_v20 = vshrl.u32 %v941_v15, 23  ;;  %v5306_v15 = vpop.f32.mrf.mxu1 }
 0x2cb   : > { %v827_v21 = vxor.u32 2147483648, %v4546_v19  ;;  %v890_v23 = vadd.s32 %v5167_v40, %v5164_v37  ;;  %v905_v29 = vsel %vm4208_vm7, 0, %v4207_v7  ;;  %v923_v2 = vsel %vm5218_vm0, 0, %v921_v8 }
 0x2cc   : > { %v831_v33 = vsel %vm829_vm6, %v830_v9, %v4546_v19  ;;  %v906_v35 = vsub.s32 32, %v905_v29  ;;  %v910_v25 = vsub.s32 4294967266, %v905_v29  ;;  %v1929_v41 = vmul.u32 %v5211_v44, %v1913_v16 }
 0x2cd   : > { %v828_v50 = vsel %vm826_vm5, %v4544_v26, %v827_v21  ;;  %v907_v59 = vshll.u32 %v5205_v43, %v905_v29  ;;  %vm1931_vm8 = vc.u32 %v5270_v18, %v5244_v39  ;;  %v4209_v37 = vadd.s32 4294967169, %v942_v20 }
 0x2ce   : > { %v832_v40 = vsel %vm825_vm4, %v828_v50, %v831_v33  ;;  %v908_v10 = vshrl.u32 %v890_v23, %v906_v35  ;;  %v911_v42 = vadd.s32 127, %v910_v25  ;;  %v1933_v11 = vsel %vm1931_vm8, %v1932_v4, %v5245_v60 }
 0x2cf   : > { %v833_v46 = vsel %vm822_vm3, nan, %v832_v40  ;;  %v1934_v44 = vadd.s32 %v1933_v11, %v1929_v41  ;;  %v938_v47 = vand.u32 2147483647, %v5248_v62  ;;  %v948_v48 = vadd.s32 1, %v4209_v37 }
 0x2d0   : > { %4058 = vst [vmem:[%s5293_s20] sm:$0xff] %v833_v46  ;;  %v909_v43 = vor.u32 %v908_v10, %v907_v59  ;;  %v912_v53 = vshll.u32 %v911_v42, 23  ;;  %vm1862_vm9 = vweird.f32 %v4979_v0  ;;  %vm1865_vm11 = vcmp.lt.s32.totalorder %v1864_v52, 2 }
 0x2d1   : > { %v1935_v31 = vadd.s32 536870912, %v1934_v44  ;;  %vm949_vm10 = vcmp.gt.s32.totalorder %v948_v48, 0  ;;  %v927_v49 = vadd.s32 3, %v923_v2  ;;  %v945_v57 = vand.u32 8388607, %v938_v47 }
 0x2d2   : > { %v4548_v55 = vpop.eup %4547  ;;  %v913_v13 = vor.u32 4788187, %v912_v53  ;;  %v950_v63 = vsel %vm949_vm10, %v948_v48, 0  ;;  %vm1869_vm12 = vcmp.eq.s32.totalorder %v1864_v52, 2  ;;  %v916_v60 = vcvt.s32.f32 %v909_v43 }
 0x2d3   : > { %v4550_v22 = vpop.eup %4549  ;;  %v1870_v56 = vxor.u32 2147483648, %v4548_v55  ;;  %v5297_v54 = vshrl.u32 %v1935_v31, 30  ;;  %v952_v24 = vand.u32 31, %v950_v63  ;;  %vm1866_vm14 = vcmp.eq.s32.totalorder %v1864_v52, 0 }
 0x2d4   : > { %v1867_v27 = vxor.u32 2147483648, %v4550_v22  ;;  %v914_v58 = vand.u32 2147483647, %v913_v13  ;;  %v5302_v8 = vand.u32 3, %v927_v49  ;;  %v1930_v38 = vadd.s32 %v5244_v39, %v5270_v18 }
 0x2d5   : > { %v1871_v14 = vsel %vm1869_vm12, %v1870_v56, %v4550_v22  ;;  %v1937_v3 = vshll.u32 %v5297_v54, 30  ;;  %v953_v5 = vsub.s32 32, %v952_v24  ;;  %v946_v17 = vor.u32 8388608, %v945_v57 }
 0x2d6   : > { %v1868_v1 = vsel %vm1866_vm14, %v4548_v55, %v1867_v27  ;;  %v917_v7 = vmul.f32 %v916_v60, %v914_v58  ;;  %v955_v19 = vshll.u32 %v4736_v28, %v952_v24  ;;  %v958_v21 = vshll.u32 %v4737_v30, %v952_v24 }
 0x2d7   : > { %v1872_v26 = vsel %vm1865_vm11, %v1868_v1, %v1871_v14  ;;  %v5309_v16 = vsub.s32 %v1934_v44, %v1937_v3  ;;  %v956_v20 = vshrl.u32 %v4737_v30, %v953_v5  ;;  %v951_v18 = vshrl.u32 %v950_v63, 5 }
 0x2d8   : > { %v1873_v9 = vsel %vm1862_vm9, nan, %v1872_v26  ;;  %v918_v4 = vxor.u32 2147483648, %v917_v7  ;;  %v959_v52 = vshrl.u32 %v4738_v32, %v953_v5  ;;  %v1981_v23 = vand.u32 2139095040, %v5306_v15 }
 0x2d9   : > { %4068 = vst [vmem:[%s5293_s20 + $0x50] sm:$0xff] %v1873_v9  ;;  %v1940_v39 = vsub.s32 0, %v5309_v16  ;;  %v961_v2 = vshll.u32 %v4738_v32, %v952_v24  ;;  %v962_v0 = vshrl.u32 %v4739_v34, %v953_v5  ;;  %v964_v33 = vshll.u32 %v4739_v34, %v952_v24 }
 0x2da   : > { %v919_v29 = vsel %vm836_vm13, %v918_v4, %v917_v7  ;;  %v954_v41 = vshrl.u32 %v4736_v28, %v953_v5  ;;  %v957_v50 = vor.u32 %v956_v20, %v955_v19  ;;  %v960_v59 = vor.u32 %v959_v52, %v958_v21 }
 0x2db   : > { %v922_v35 = vsel %vm5218_vm0, %v4985_v6, %v919_v29  ;;  %v4246_v25 = vmin.u32 %v1940_v39, %v5309_v16  ;;  %v965_v37 = vshrl.u32 %v4740_v36, %v953_v5  ;;  %v967_v40 = vshll.u32 %v4740_v36, %v952_v24 }
 0x2dc   : > { %4551 = vcosq.f32 %v922_v35  ;;  %v5332_v42 = vshll.u32 %v946_v17, 8  ;;  %v1982_v11 = vshrl.u32 %v1981_v23, 23  ;;  %v963_v46 = vor.u32 %v962_v0, %v961_v2 }
 0x2dd   : > { %4553 = vsinq.f32 %v922_v35  ;;  %v1942_v10 = vclz %v4246_v25  ;;  %v966_v44 = vor.u32 %v965_v37, %v964_v33  ;;  %v968_v12 = vshrl.u32 %v4741_v45, %v953_v5  ;;  %v5373_v37 = vpop.f32.mrf.mxu0 }
 0x2de   : > { %vm970_vm13 = vcmp.lt.s32.totalorder %v951_v18, 1  ;;  %vm971_vm15 = vcmp.lt.s32.totalorder %v951_v18, 2  ;;  %vm972_vm0 = vcmp.lt.s32.totalorder %v951_v18, 3  ;;  %vm973_vm1 = vcmp.lt.s32.totalorder %v951_v18, 4 }
 0x2df   : > { %v4247_v48 = vadd.s32 4294967294, %v1942_v10  ;;  %v969_v43 = vor.u32 %v968_v12, %v967_v40  ;;  %v974_v53 = vsel %vm970_vm13, %v954_v41, %v957_v50  ;;  %v975_v31 = vsel %vm973_vm1, %v963_v46, 2102212464 }
 0x2e0   : > { %v978_v55 = vsel %vm970_vm13, %v957_v50, %v960_v59  ;;  %v1960_v13 = vsub.s32 4, %v5297_v54  ;;  %v976_v49 = vsel %vm972_vm0, %v960_v59, %v975_v31  ;;  %v979_v63 = vsel %vm973_vm1, %v966_v44, 920167782 }
 0x2e1   : > { %vm4248_vm2 = vcmp.lt.s32.totalorder %v4247_v48, 0  ;;  %v980_v56 = vsel %vm972_vm0, %v963_v46, %v979_v63  ;;  %v982_v57 = vsel %vm970_vm13, %v960_v59, %v963_v46  ;;  %v983_v24 = vsel %vm973_vm1, %v969_v43, 1326507024 }
 0x2e2   : > { %v1945_v22 = vsel %vm4248_vm2, 0, %v4247_v48  ;;  %v977_v60 = vsel %vm971_vm15, %v974_v53, %v976_v49  ;;  %v981_v14 = vsel %vm971_vm15, %v978_v55, %v980_v56  ;;  %v984_v5 = vsel %vm972_vm0, %v966_v44, %v983_v24 }
 0x2e3   : > { %v1946_v27 = vsub.s32 32, %v1945_v22  ;;  %v1950_v58 = vsub.s32 4294967266, %v1945_v22  ;;  %v1947_v3 = vshll.u32 %v5309_v16, %v1945_v22  ;;  %v985_v19 = vsel %vm971_vm15, %v982_v57, %v984_v5 }
 0x2e4   : > { %v5343_v1 = vmul.u32.u64.low %v5332_v42, %v981_v14  ;;  %v5344_v7 = vmul.u32.u64.high %v5332_v42, %v981_v14, %v5343_v1  ;;  %v4249_v9 = vadd.s32 4294967169, %v1982_v11  ;;  %vm926_vm3 = vweird.f32 %v4985_v6 }
 0x2e5   : > { %v1948_v26 = vshrl.u32 %v1930_v38, %v1946_v27  ;;  %v1951_v17 = vadd.s32 127, %v1950_v58  ;;  %vm1876_vm4 = vcmp.lt.s32.totalorder %v5058_v51, 0  ;;  %vm929_vm5 = vcmp.lt.s32.totalorder %v5302_v8, 2 }
 0x2e6   : > { %v5351_v4 = vmul.u32.u64.low %v5332_v42, %v985_v19  ;;  %v5352_v20 = vmul.u32.u64.high %v5332_v42, %v985_v19, %v5351_v4  ;;  %v1961_v39 = vsel %vm1876_vm4, %v1960_v13, %v5297_v54  ;;  %v1988_v52 = vadd.s32 1, %v4249_v9 }
 0x2e7   : > { %v1949_v16 = vor.u32 %v1948_v26, %v1947_v3  ;;  %v1952_v21 = vshll.u32 %v1951_v17, 23  ;;  %vm5360_vm6 = vcmp.le.f32.partialorder %v1874_v61, 0.7853982  ;;  %v993_v18 = vmul.u32 %v5332_v42, %v977_v60 }
 0x2e8   : > { %v996_v23 = vadd.s32 1, %v5344_v7  ;;  %vm933_vm7 = vcmp.eq.s32.totalorder %v5302_v8, 2  ;;  %v1978_v0 = vand.u32 2147483647, %v5306_v15  ;;  %vm1989_vm8 = vcmp.gt.s32.totalorder %v1988_v52, 0 }
 0x2e9   : > { %v4552_v29 = vpop.eup %4551  ;;  %v1953_v2 = vor.u32 4788187, %v1952_v21  ;;  %v1963_v35 = vsel %vm5360_vm6, 0, %v1961_v39  ;;  %vm995_vm9 = vc.u32 %v5352_v20, %v5343_v1  ;;  %v1990_v61 = vsel %vm1989_vm8, %v1988_v52, 0 }
 0x2ea   : > { %v4554_v54 = vpop.eup %4553  ;;  %v934_v33 = vxor.u32 2147483648, %v4552_v29  ;;  %v1956_v50 = vcvt.s32.f32 %v1949_v16  ;;  %v997_v59 = vsel %vm995_vm9, %v996_v23, %v5344_v7  ;;  %vm930_vm10 = vcmp.eq.s32.totalorder %v5302_v8, 0 }
 0x2eb   : > { %v931_v25 = vxor.u32 2147483648, %v4554_v54  ;;  %v1954_v41 = vand.u32 2147483647, %v1953_v2  ;;  %v998_v10 = vadd.s32 %v997_v59, %v993_v18  ;;  %v1992_v42 = vand.u32 31, %v1990_v61 }
 0x2ec   : > { %v935_v40 = vsel %vm933_vm7, %v934_v33, %v4554_v54  ;;  %v1967_v44 = vadd.s32 3, %v1963_v35  ;;  %v1985_v12 = vand.u32 8388607, %v1978_v0  ;;  %v1045_v31 = vand.u32 2139095040, %v5373_v37 }
 0x2ed   : > { %v932_v11 = vsel %vm930_vm10, %v4552_v29, %v931_v25  ;;  %v1957_v46 = vmul.f32 %v1956_v50, %v1954_v41  ;;  %v999_v43 = vadd.s32 536870912, %v998_v10  ;;  %v1993_v53 = vsub.s32 32, %v1992_v42 }
 0x2ee   : > { %v936_v48 = vsel %vm929_vm5, %v932_v11, %v935_v40  ;;  %v1995_v49 = vshll.u32 %v4736_v28, %v1992_v42  ;;  %v1998_v63 = vshll.u32 %v4737_v30, %v1992_v42  ;;  %v2001_v57 = vshll.u32 %v4738_v32, %v1992_v42 }
 0x2ef   : > { %v937_v55 = vsel %vm926_vm3, nan, %v936_v48  ;;  %v1958_v13 = vxor.u32 2147483648, %v1957_v46  ;;  %v5386_v22 = vshrl.u32 %v999_v43, 30  ;;  %v1996_v56 = vshrl.u32 %v4737_v30, %v1993_v53 }
 0x2f0   : > { %4059 = vst [vmem:[%s5293_s20 + $0x8] sm:$0xff] %v937_v55  ;;  %v1999_v8 = vshrl.u32 %v4738_v32, %v1993_v53  ;;  %v2002_v6 = vshrl.u32 %v4739_v34, %v1993_v53  ;;  %v2004_v27 = vshll.u32 %v4739_v34, %v1992_v42  ;;  %v2005_v58 = vshrl.u32 %v4740_v36, %v1993_v53 }
 0x2f1   : > { %v1959_v24 = vsel %vm1876_vm4, %v1958_v13, %v1957_v46  ;;  %v1001_v14 = vshll.u32 %v5386_v22, 30  ;;  %v1991_v3 = vshrl.u32 %v1990_v61, 5  ;;  %v1997_v5 = vor.u32 %v1996_v56, %v1995_v49 }
 0x2f2   : > { %v1962_v60 = vsel %vm5360_vm6, %v5058_v51, %v1959_v24  ;;  %v2000_v7 = vor.u32 %v1999_v8, %v1998_v63  ;;  %v2003_v26 = vor.u32 %v2002_v6, %v2001_v57  ;;  %v2006_v17 = vor.u32 %v2005_v58, %v2004_v27 }
 0x2f3   : > { %4555 = vcosq.f32 %v1962_v60  ;;  %v5400_v19 = vsub.s32 %v998_v10, %v1001_v14  ;;  %v1986_v9 = vor.u32 8388608, %v1985_v12  ;;  %v5402_v4 = vand.u32 3, %v1967_v44 }
 0x2f4   : > { %4557 = vsinq.f32 %v1962_v60  ;;  %v2007_v16 = vshll.u32 %v4740_v36, %v1992_v42  ;;  %v2008_v21 = vshrl.u32 %v4741_v45, %v1993_v53  ;;  %v1046_v39 = vshrl.u32 %v1045_v31, 23 }
 0x2f5   : > { %v1004_v52 = vsub.s32 0, %v5400_v19  ;;  %vm2010_vm11 = vcmp.lt.s32.totalorder %v1991_v3, 1  ;;  %vm2012_vm12 = vcmp.lt.s32.totalorder %v1991_v3, 3  ;;  %vm2013_vm14 = vcmp.lt.s32.totalorder %v1991_v3, 4 }
 0x2f6   : > { %v2009_v38 = vor.u32 %v2008_v21, %v2007_v16  ;;  %v2015_v18 = vsel %vm2013_vm14, %v2003_v26, 2102212464  ;;  %v2018_v23 = vsel %vm2010_vm11, %v1997_v5, %v2000_v7  ;;  %v2019_v29 = vsel %vm2013_vm14, %v2006_v17, 920167782 }
 0x2f7   : > { %v4210_v2 = vmin.u32 %v1004_v52, %v5400_v19  ;;  %v1994_v54 = vshrl.u32 %v4736_v28, %v1993_v53  ;;  %vm2011_vm13 = vcmp.lt.s32.totalorder %v1991_v3, 2  ;;  %v2020_v33 = vsel %vm2012_vm12, %v2003_v26, %v2019_v29 }
 0x2f8   : > { %v2021_v35 = vsel %vm2011_vm13, %v2018_v23, %v2020_v33  ;;  %v2022_v61 = vsel %vm2010_vm11, %v2000_v7, %v2003_v26  ;;  %v2023_v25 = vsel %vm2013_vm14, %v2009_v38, 1326507024  ;;  %v2026_v41 = vshll.u32 %v1986_v9, 8 }
 0x2f9   : > { %v1006_v50 = vclz %v4210_v2  ;;  %v2014_v59 = vsel %vm2010_vm11, %v1994_v54, %v1997_v5  ;;  %v2016_v40 = vsel %vm2012_vm12, %v2000_v7, %v2015_v18  ;;  %v2024_v10 = vsel %vm2012_vm12, %v2006_v17, %v2023_v25 }
 0x2fa   : > { %v5416_v42 = vmul.u32.u64.low %v2026_v41, %v2021_v35  ;;  %v5417_v11 = vmul.u32.u64.high %v2026_v41, %v2021_v35, %v5416_v42  ;;  %v4213_v46 = vadd.s32 4294967169, %v1046_v39  ;;  %vm1969_vm15 = vcmp.lt.s32.totalorder %v5402_v4, 2 }
 0x2fb   : > { %vm940_vm0 = vcmp.lt.s32.totalorder %v5248_v62, 0  ;;  %v4211_v44 = vadd.s32 4294967294, %v1006_v50  ;;  %v2025_v12 = vsel %vm2011_vm13, %v2022_v61, %v2024_v10  ;;  %vm1966_vm1 = vweird.f32 %v5058_v51 }
 0x2fc   : > { %vm1970_vm2 = vcmp.eq.s32.totalorder %v5402_v4, 0  ;;  %v5425_v48 = vmul.u32.u64.low %v2026_v41, %v2025_v12  ;;  %v5426_v43 = vmul.u32.u64.high %v2026_v41, %v2025_v12, %v5425_v48  ;;  %v1052_v53 = vadd.s32 1, %v4213_v46 }
 0x2fd   : > { %vm1973_vm3 = vcmp.eq.s32.totalorder %v5402_v4, 2  ;;  %vm4212_vm4 = vcmp.lt.s32.totalorder %v4211_v44, 0  ;;  %v2017_v31 = vsel %vm2011_vm13, %v2014_v59, %v2016_v40  ;;  %v1042_v55 = vand.u32 2147483647, %v5373_v37  ;;  %v5475_v48 = vpop.f32.mrf.mxu1 }
 0x2fe   : > { %v1009_v13 = vsel %vm4212_vm4, 0, %v4211_v44  ;;  %v1024_v49 = vsub.s32 4, %v5386_v22  ;;  %v2036_v63 = vadd.s32 1, %v5417_v11  ;;  %vm1053_vm5 = vcmp.gt.s32.totalorder %v1052_v53, 0 }
 0x2ff   : > { %vm5435_vm6 = vcmp.le.f32.partialorder %v938_v47, 0.7853982  ;;  %v994_v57 = vadd.s32 %v5343_v1, %v5352_v20  ;;  %v1010_v24 = vsub.s32 32, %v1009_v13  ;;  %v1014_v6 = vsub.s32 4294967266, %v1009_v13 }
 0x300   : > { %v4556_v56 = vpop.eup %4555  ;;  %v1054_v27 = vsel %vm1053_vm5, %v1052_v53, 0  ;;  %v1011_v14 = vshll.u32 %v5400_v19, %v1009_v13  ;;  %v2033_v3 = vmul.u32 %v2026_v41, %v2017_v31  ;;  %vm2035_vm7 = vc.u32 %v5426_v43, %v5416_v42 }
 0x301   : > { %v4558_v58 = vpop.eup %4557  ;;  %v1974_v60 = vxor.u32 2147483648, %v4556_v56  ;;  %v1012_v7 = vshrl.u32 %v994_v57, %v1010_v24  ;;  %v1015_v47 = vadd.s32 127, %v1014_v6  ;;  %v2037_v26 = vsel %vm2035_vm7, %v2036_v63, %v5417_v11 }
 0x302   : > { %v1971_v5 = vxor.u32 2147483648, %v4558_v58  ;;  %v1025_v1 = vsel %vm940_vm0, %v1024_v49, %v5386_v22  ;;  %v2038_v20 = vadd.s32 %v2037_v26, %v2033_v3  ;;  %v1056_v9 = vand.u32 31, %v1054_v27 }
 0x303   : > { %v1975_v17 = vsel %vm1973_vm3, %v1974_v60, %v4558_v58  ;;  %v1013_v16 = vor.u32 %v1012_v7, %v1011_v14  ;;  %v1016_v21 = vshll.u32 %v1015_v47, 23  ;;  %v1049_v39 = vand.u32 8388607, %v1042_v55 }
 0x304   : > { %v1972_v19 = vsel %vm1970_vm2, %v4556_v56, %v1971_v5  ;;  %v2039_v38 = vadd.s32 536870912, %v2038_v20  ;;  %v5456_v18 = vshrl.u32 %v1054_v27, 5  ;;  %v1057_v23 = vsub.s32 32, %v1056_v9 }
 0x305   : > { %v1976_v52 = vsel %vm1969_vm15, %v1972_v19, %v1975_v17  ;;  %v1017_v29 = vor.u32 4788187, %v1016_v21  ;;  %v1020_v2 = vcvt.s32.f32 %v1013_v16  ;;  %v1059_v54 = vshll.u32 %v4736_v28, %v1056_v9 }
 0x306   : > { %v1977_v22 = vsel %vm1966_vm1, nan, %v1976_v52  ;;  %v2040_v33 = vshrl.u32 %v2039_v38, 30  ;;  %v1060_v35 = vshrl.u32 %v4737_v30, %v1057_v23  ;;  %v1062_v61 = vshll.u32 %v4737_v30, %v1056_v9 }
 0x307   : > { %4069 = vst [vmem:[%s5293_s20 + $0x58] sm:$0xff] %v1977_v22  ;;  %v1063_v4 = vshrl.u32 %v4738_v32, %v1057_v23  ;;  %v1018_v25 = vand.u32 2147483647, %v1017_v29  ;;  %v1065_v41 = vshll.u32 %v4738_v32, %v1056_v9  ;;  %v1066_v50 = vshrl.u32 %v4739_v34, %v1057_v23 }
 0x308   : > { %v1068_v51 = vshll.u32 %v4739_v34, %v1056_v9  ;;  %v1027_v59 = vsel %vm5435_vm6, 0, %v1025_v1  ;;  %v2041_v40 = vshll.u32 %v2040_v33, 30  ;;  %v1050_v10 = vor.u32 8388608, %v1049_v39 }
 0x309   : > { %vm1074_vm8 = vcmp.lt.s32.totalorder %v5456_v18, 1  ;;  %v1021_v11 = vmul.f32 %v1020_v2, %v1018_v25  ;;  %vm1980_vm9 = vcmp.lt.s32.totalorder %v5306_v15, 0  ;;  %v1058_v46 = vshrl.u32 %v4736_v28, %v1057_v23 }
 0x30a   : > { %v1069_v44 = vshrl.u32 %v4740_v36, %v1057_v23  ;;  %v1071_v12 = vshll.u32 %v4740_v36, %v1056_v9  ;;  %v5477_v53 = vsub.s32 %v2038_v20, %v2041_v40  ;;  %v1061_v31 = vor.u32 %v1060_v35, %v1059_v54 }
 0x30b   : > { %v1064_v13 = vor.u32 %v1063_v4, %v1062_v61  ;;  %v1072_v49 = vshrl.u32 %v4741_v45, %v1057_v23  ;;  %v1022_v63 = vxor.u32 2147483648, %v1021_v11  ;;  %v1067_v56 = vor.u32 %v1066_v50, %v1065_v41 }
 0x30c   : > { %v1070_v57 = vor.u32 %v1069_v44, %v1068_v51  ;;  %vm1077_vm10 = vcmp.lt.s32.totalorder %v5456_v18, 4  ;;  %vm5483_vm11 = vcmp.le.f32.partialorder %v1978_v0, 0.7853982  ;;  %v2044_v6 = vsub.s32 0, %v5477_v53 }
 0x30d   : > { %vm1075_vm12 = vcmp.lt.s32.totalorder %v5456_v18, 2  ;;  %vm1076_vm14 = vcmp.lt.s32.totalorder %v5456_v18, 3  ;;  %v2085_v27 = vand.u32 2139095040, %v5475_v48  ;;  %v1023_v58 = vsel %vm940_vm0, %v1022_v63, %v1021_v11 }
 0x30e   : > { %v1073_v60 = vor.u32 %v1072_v49, %v1071_v12  ;;  %v1079_v14 = vsel %vm1077_vm10, %v1067_v56, 2102212464  ;;  %v1083_v0 = vsel %vm1077_vm10, %v1070_v57, 920167782  ;;  %v1026_v3 = vsel %vm5435_vm6, %v5248_v62, %v1023_v58 }
 0x30f   : > { %v4250_v5 = vmin.u32 %v2044_v6, %v5477_v53  ;;  %v2064_v7 = vsub.s32 4, %v2040_v33  ;;  %v1082_v47 = vsel %vm1074_vm8, %v1061_v31, %v1064_v13  ;;  %4559 = vcosq.f32 %v1026_v3 }
 0x310   : > { %v1031_v26 = vadd.s32 3, %v1027_v59  ;;  %v1078_v17 = vsel %vm1074_vm8, %v1058_v46, %v1061_v31  ;;  %v1084_v1 = vsel %vm1076_vm14, %v1067_v56, %v1083_v0  ;;  %4561 = vsinq.f32 %v1026_v3 }
 0x311   : > { %v2046_v20 = vclz %v4250_v5  ;;  %v1080_v8 = vsel %vm1076_vm14, %v1064_v13, %v1079_v14  ;;  %v1086_v9 = vsel %vm1074_vm8, %v1064_v13, %v1067_v56  ;;  %v1085_v19 = vsel %vm1075_vm12, %v1082_v47, %v1084_v1 }
 0x312   : > { %v1087_v16 = vsel %vm1077_vm10, %v1073_v60, 1326507024  ;;  %v1090_v21 = vshll.u32 %v1050_v10, 8  ;;  %v2082_v39 = vand.u32 2147483647, %v5475_v48  ;;  %v2065_v38 = vsel %vm1980_vm9, %v2064_v7, %v2040_v33 }
 0x313   : > { %v4251_v52 = vadd.s32 4294967294, %v2046_v20  ;;  %v1088_v23 = vsel %vm1076_vm14, %v1070_v57, %v1087_v16  ;;  %v2086_v22 = vshrl.u32 %v2085_v27, 23  ;;  %v1081_v29 = vsel %vm1075_vm12, %v1078_v17, %v1080_v8 }
 0x314   : > { %v1089_v2 = vsel %vm1075_vm12, %v1086_v9, %v1088_v23  ;;  %v5524_v54 = vmul.u32.u64.low %v1090_v21, %v1085_v19  ;;  %v5525_v35 = vmul.u32.u64.high %v1090_v21, %v1085_v19, %v5524_v54  ;;  %v2034_v33 = vadd.s32 %v5416_v42, %v5426_v43  ;;  %v5541_v42 = vpop.f32.mrf.mxu0 }
 0x315   : > { %vm4252_vm13 = vcmp.lt.s32.totalorder %v4251_v52, 0  ;;  %v5528_v61 = vmul.u32.u64.low %v1090_v21, %v1089_v2  ;;  %v5529_v4 = vmul.u32.u64.high %v1090_v21, %v1089_v2, %v5528_v61  ;;  %v4253_v25 = vadd.s32 4294967169, %v2086_v22 }
 0x316   : > { %v2049_v41 = vsel %vm4252_vm13, 0, %v4251_v52  ;;  %v2067_v50 = vsel %vm5483_vm11, 0, %v2065_v38  ;;  %v2089_v18 = vand.u32 8388607, %v2082_v39  ;;  %v1097_v40 = vmul.u32 %v1090_v21, %v1081_v29 }
 0x317   : > { %v2050_v51 = vsub.s32 32, %v2049_v41  ;;  %v2054_v59 = vsub.s32 4294967266, %v2049_v41  ;;  %v2092_v10 = vadd.s32 1, %v4253_v25  ;;  %v1032_v11 = vand.u32 3, %v1031_v26 }
 0x318   : > { %v1100_v46 = vadd.s32 1, %v5525_v35  ;;  %v2051_v44 = vshll.u32 %v5477_v53, %v2049_v41  ;;  %vm1099_vm15 = vc.u32 %v5529_v4, %v5524_v54  ;;  %v2071_v43 = vadd.s32 3, %v2067_v50 }
 0x319   : > { %v2052_v12 = vshrl.u32 %v2034_v33, %v2050_v51  ;;  %v2055_v31 = vadd.s32 127, %v2054_v59  ;;  %v2090_v49 = vor.u32 8388608, %v2089_v18  ;;  %vm2093_vm0 = vcmp.gt.s32.totalorder %v2092_v10, 0 }
 0x31a   : > { %v1101_v13 = vsel %vm1099_vm15, %v1100_v46, %v5525_v35  ;;  %v2094_v6 = vsel %vm2093_vm0, %v2092_v10, 0  ;;  %vm1030_vm1 = vweird.f32 %v5248_v62  ;;  %vm1033_vm2 = vcmp.lt.s32.totalorder %v1032_v11, 2 }
 0x31b   : > { %v2053_v63 = vor.u32 %v2052_v12, %v2051_v44  ;;  %v2056_v56 = vshll.u32 %v2055_v31, 23  ;;  %v1102_v57 = vadd.s32 %v1101_v13, %v1097_v40  ;;  %v2096_v53 = vand.u32 31, %v2094_v6 }
 0x31c   : > { %v1149_v27 = vand.u32 2139095040, %v5541_v42  ;;  %v4560_v58 = vpop.eup %4559  ;;  %vm1034_vm3 = vcmp.eq.s32.totalorder %v1032_v11, 0  ;;  %vm1037_vm4 = vcmp.eq.s32.totalorder %v1032_v11, 2  ;;  %v5546_v5 = vand.u32 3, %v2071_v43 }
 0x31d   : > { %v2057_v60 = vor.u32 4788187, %v2056_v56  ;;  %v1103_v14 = vadd.s32 536870912, %v1102_v57  ;;  %v4562_v0 = vpop.eup %4561  ;;  %v1038_v3 = vxor.u32 2147483648, %v4560_v58  ;;  %v2097_v7 = vsub.s32 32, %v2096_v53 }
 0x31e   : > { %v5548_v47 = vshll.u32 %v2090_v49, 8  ;;  %v1035_v26 = vxor.u32 2147483648, %v4562_v0  ;;  %v2060_v1 = vcvt.s32.f32 %v2053_v63  ;;  %v1146_v19 = vand.u32 2147483647, %v5541_v42 }
 0x31f   : > { %v2058_v17 = vand.u32 2147483647, %v2057_v60  ;;  %v5550_v20 = vshrl.u32 %v1103_v14, 30  ;;  %v1039_v8 = vsel %vm1037_vm4, %v1038_v3, %v4562_v0  ;;  %v2100_v9 = vshrl.u32 %v4737_v30, %v2097_v7 }
 0x320   : > { %v1150_v16 = vshrl.u32 %v1149_v27, 23  ;;  %v1036_v21 = vsel %vm1034_vm3, %v4560_v58, %v1035_v26  ;;  %v2103_v23 = vshrl.u32 %v4738_v32, %v2097_v7  ;;  %v2099_v29 = vshll.u32 %v4736_v28, %v2096_v53 }
 0x321   : > { %v2061_v52 = vmul.f32 %v2060_v1, %v2058_v17  ;;  %v1105_v38 = vshll.u32 %v5550_v20, 30  ;;  %v1040_v22 = vsel %vm1033_vm2, %v1036_v21, %v1039_v8  ;;  %v2102_v2 = vshll.u32 %v4737_v30, %v2096_v53 }
 0x322   : > { %v2106_v35 = vshrl.u32 %v4739_v34, %v2097_v7  ;;  %v1041_v61 = vsel %vm1030_vm1, nan, %v1040_v22  ;;  %v2105_v41 = vshll.u32 %v4738_v32, %v2096_v53  ;;  %v2095_v50 = vshrl.u32 %v2094_v6, 5 }
 0x323   : > { %v2062_v25 = vxor.u32 2147483648, %v2061_v52  ;;  %v5563_v33 = vsub.s32 %v1102_v57, %v1105_v38  ;;  %4060 = vst [vmem:[%s5293_s20 + $0x10] sm:$0xff] %v1041_v61  ;;  %v2101_v18 = vor.u32 %v2100_v9, %v2099_v29  ;;  %v2108_v51 = vshll.u32 %v4739_v34, %v2096_v53 }
 0x324   : > { %v2109_v59 = vshrl.u32 %v4740_v36, %v2097_v7  ;;  %v2104_v11 = vor.u32 %v2103_v23, %v2102_v2  ;;  %v2107_v62 = vor.u32 %v2106_v35, %v2105_v41  ;;  %v2111_v12 = vshll.u32 %v4740_v36, %v2096_v53 }
 0x325   : > { %v2063_v40 = vsel %vm1980_vm9, %v2062_v25, %v2061_v52  ;;  %v1108_v10 = vsub.s32 0, %v5563_v33  ;;  %v2112_v31 = vshrl.u32 %v4741_v45, %v2097_v7  ;;  %v1098_v43 = vadd.s32 %v5524_v54, %v5529_v4 }
 0x326   : > { %v2066_v46 = vsel %vm5483_vm11, %v5306_v15, %v2063_v40  ;;  %v2110_v44 = vor.u32 %v2109_v59, %v2108_v51  ;;  %v5582_v49 = vand.u32 8388607, %v1146_v19  ;;  %v2098_v63 = vshrl.u32 %v4736_v28, %v2097_v7 }
 0x327   : > { %4563 = vcosq.f32 %v2066_v46  ;;  %v4214_v13 = vmin.u32 %v1108_v10, %v5563_v33  ;;  %v2113_v24 = vor.u32 %v2112_v31, %v2111_v12  ;;  %v4217_v56 = vadd.s32 4294967169, %v1150_v16 }
 0x328   : > { %4565 = vsinq.f32 %v2066_v46  ;;  %vm1044_vm5 = vcmp.lt.s32.totalorder %v5373_v37, 0  ;;  %vm2114_vm6 = vcmp.lt.s32.totalorder %v2095_v50, 1  ;;  %vm2115_vm7 = vcmp.lt.s32.totalorder %v2095_v50, 2 }
 0x329   : > { %v1110_v57 = vclz %v4214_v13  ;;  %vm2117_vm8 = vcmp.lt.s32.totalorder %v2095_v50, 4  ;;  %vm2116_vm9 = vcmp.lt.s32.totalorder %v2095_v50, 3  ;;  %v2122_v54 = vsel %vm2114_vm6, %v2101_v18, %v2104_v11 }
 0x32a   : > { %v2119_v6 = vsel %vm2117_vm8, %v2107_v62, 2102212464  ;;  %v2123_v4 = vsel %vm2117_vm8, %v2110_v44, 920167782  ;;  %v2118_v27 = vsel %vm2114_vm6, %v2098_v63, %v2101_v18  ;;  %v2126_v60 = vsel %vm2114_vm6, %v2104_v11, %v2107_v62 }
 0x32b   : > { %v4215_v53 = vadd.s32 4294967294, %v1110_v57  ;;  %v2124_v58 = vsel %vm2116_vm9, %v2107_v62, %v2123_v4  ;;  %v2120_v14 = vsel %vm2116_vm9, %v2104_v11, %v2119_v6  ;;  %v2127_v3 = vsel %vm2117_vm8, %v2113_v24, 1326507024 }
 0x32c   : > { %v2125_v0 = vsel %vm2115_vm7, %v2122_v54, %v2124_v58  ;;  %v1156_v7 = vadd.s32 1, %v4217_v56  ;;  %v2128_v26 = vsel %vm2116_vm9, %v2110_v44, %v2127_v3  ;;  %vm2077_vm11 = vcmp.eq.s32.totalorder %v5546_v5, 2 }
 0x32d   : > { %vm4216_vm10 = vcmp.lt.s32.totalorder %v4215_v53, 0  ;;  %v5588_v17 = vmul.u32.u64.low %v5548_v47, %v2125_v0  ;;  %v5589_v1 = vmul.u32.u64.high %v5548_v47, %v2125_v0, %v5588_v17  ;;  %v1128_v9 = vsub.s32 4, %v5550_v20 }
 0x32e   : > { %v1113_v8 = vsel %vm4216_vm10, 0, %v4215_v53  ;;  %v2129_v16 = vsel %vm2115_vm7, %v2126_v60, %v2128_v26  ;;  %vm1157_vm12 = vcmp.gt.s32.totalorder %v1156_v7, 0  ;;  %vm2074_vm14 = vcmp.eq.s32.totalorder %v5546_v5, 0 }
 0x32f   : > { %v1114_v21 = vsub.s32 32, %v1113_v8  ;;  %v1118_v52 = vsub.s32 4294967266, %v1113_v8  ;;  %v2121_v38 = vsel %vm2115_vm7, %v2118_v27, %v2120_v14  ;;  %v1158_v23 = vsel %vm1157_vm12, %v1156_v7, 0 }
 0x330   : > { %vm2073_vm13 = vcmp.lt.s32.totalorder %v5546_v5, 2  ;;  %v5599_v22 = vmul.u32.u64.low %v5548_v47, %v2129_v16  ;;  %v5600_v29 = vmul.u32.u64.high %v5548_v47, %v2129_v16, %v5599_v22  ;;  %v1154_v2 = vor.u32 8388608, %v5582_v49 }
 0x331   : > { %v1160_v35 = vand.u32 31, %v1158_v23  ;;  %vm2070_vm15 = vweird.f32 %v5306_v15  ;;  %vm5606_vm0 = vcmp.le.f32.partialorder %v1042_v55, 0.7853982  ;;  %v1115_v25 = vshll.u32 %v5563_v33, %v1113_v8 }
 0x332   : > { %v1116_v41 = vshrl.u32 %v1098_v43, %v1114_v21  ;;  %v1119_v50 = vadd.s32 127, %v1118_v52  ;;  %v2140_v18 = vadd.s32 1, %v5589_v1  ;;  %v1129_v51 = vsel %vm1044_vm5, %v1128_v9, %v5550_v20 }
 0x333   : > { %v2137_v59 = vmul.u32 %v5548_v47, %v2121_v38  ;;  %v5616_v40 = vshrl.u32 %v1158_v23, 5  ;;  %v1161_v10 = vsub.s32 32, %v1160_v35  ;;  %v1163_v62 = vshll.u32 %v4736_v28, %v1160_v35 }
 0x334   : > { %v1117_v11 = vor.u32 %v1116_v41, %v1115_v25  ;;  %v1120_v55 = vshll.u32 %v1119_v50, 23  ;;  %v1166_v46 = vshll.u32 %v4737_v30, %v1160_v35  ;;  %v4564_v33 = vpop.eup %4563  ;;  %vm2139_vm1 = vc.u32 %v5600_v29, %v5588_v17 }
 0x335   : > { %v1164_v44 = vshrl.u32 %v4737_v30, %v1161_v10  ;;  %v1169_v12 = vshll.u32 %v4738_v32, %v1160_v35  ;;  %v1172_v20 = vshll.u32 %v4739_v34, %v1160_v35  ;;  %v4566_v47 = vpop.eup %4565  ;;  %v2078_v31 = vxor.u32 2147483648, %v4564_v33 }
 0x336   : > { %v1121_v43 = vor.u32 4788187, %v1120_v55  ;;  %v2141_v13 = vsel %vm2139_vm1, %v2140_v18, %v5589_v1  ;;  %v1175_v49 = vshll.u32 %v4740_v36, %v1160_v35  ;;  %v2075_v63 = vxor.u32 2147483648, %v4566_v47 }
 0x337   : > { %v1124_v24 = vcvt.s32.f32 %v1117_v11  ;;  %v2142_v56 = vadd.s32 %v2141_v13, %v2137_v59  ;;  %v1167_v57 = vshrl.u32 %v4738_v32, %v1161_v10  ;;  %v2079_v6 = vsel %vm2077_vm11, %v2078_v31, %v4566_v47  ;;  %v5666_v11 = vpop.f32.mrf.mxu1 }
 0x338   : > { %v1122_v54 = vand.u32 2147483647, %v1121_v43  ;;  %v1170_v4 = vshrl.u32 %v4739_v34, %v1161_v10  ;;  %v1173_v53 = vshrl.u32 %v4740_v36, %v1161_v10  ;;  %v2076_v27 = vsel %vm2074_vm14, %v4564_v33, %v2075_v63 }
 0x339   : > { %v2143_v58 = vadd.s32 536870912, %v2142_v56  ;;  %v1165_v60 = vor.u32 %v1164_v44, %v1163_v62  ;;  %v1176_v14 = vshrl.u32 %v4741_v45, %v1161_v10  ;;  %v2080_v0 = vsel %vm2073_vm13, %v2076_v27, %v2079_v6 }
 0x33a   : > { %v1125_v3 = vmul.f32 %v1124_v24, %v1122_v54  ;;  %v1168_v7 = vor.u32 %v1167_v57, %v1166_v46  ;;  %v1174_v26 = vor.u32 %v1173_v53, %v1172_v20  ;;  %v2081_v1 = vsel %vm2070_vm15, nan, %v2080_v0 }
 0x33b   : > { %v1131_v8 = vsel %vm5606_vm0, 0, %v1129_v51  ;;  %v2144_v9 = vshrl.u32 %v2143_v58, 30  ;;  %vm1178_vm2 = vcmp.lt.s32.totalorder %v5616_v40, 1  ;;  %4070 = vst [vmem:[%s5293_s20 + $0x60] sm:$0xff] %v2081_v1  ;;  %v1162_v21 = vshrl.u32 %v4736_v28, %v1161_v10 }
 0x33c   : > { %v1126_v16 = vxor.u32 2147483648, %v1125_v3  ;;  %v1171_v52 = vor.u32 %v1170_v4, %v1169_v12  ;;  %vm1181_vm3 = vcmp.lt.s32.totalorder %v5616_v40, 4  ;;  %v1177_v38 = vor.u32 %v1176_v14, %v1175_v49  ;;  %v5702_v14 = vpop.f32.mrf.mxu0 }
 0x33d   : > { %v2145_v5 = vshll.u32 %v2144_v9, 30  ;;  %vm1180_vm4 = vcmp.lt.s32.totalorder %v5616_v40, 3  ;;  %v1194_v23 = vshll.u32 %v1154_v2, 8  ;;  %vm1179_vm6 = vcmp.lt.s32.totalorder %v5616_v40, 2 }
 0x33e   : > { %v1127_v15 = vsel %vm1044_vm5, %v1126_v16, %v1125_v3  ;;  %v1186_v22 = vsel %vm1178_vm2, %v1165_v60, %v1168_v7  ;;  %v1187_v35 = vsel %vm1181_vm3, %v1174_v26, 920167782  ;;  %v1183_v50 = vsel %vm1181_vm3, %v1171_v52, 2102212464 }
 0x33f   : > { %v1130_v25 = vsel %vm5606_vm0, %v5373_v37, %v1127_v15  ;;  %v2146_v41 = vsub.s32 %v2142_v56, %v2145_v5  ;;  %v1135_v2 = vadd.s32 3, %v1131_v8  ;;  %v1182_v18 = vsel %vm1178_vm2, %v1162_v21, %v1165_v60 }
 0x340   : > { %4567 = vcosq.f32 %v1130_v25  ;;  %v1188_v51 = vsel %vm1180_vm4, %v1171_v52, %v1187_v35  ;;  %v1190_v61 = vsel %vm1178_vm2, %v1168_v7, %v1171_v52  ;;  %v1184_v55 = vsel %vm1180_vm4, %v1168_v7, %v1183_v50 }
 0x341   : > { %4569 = vsinq.f32 %v1130_v25  ;;  %v2148_v59 = vsub.s32 0, %v2146_v41  ;;  %v1189_v10 = vsel %vm1179_vm6, %v1186_v22, %v1188_v51  ;;  %v1191_v62 = vsel %vm1181_vm3, %v1177_v38, 1326507024 }
 0x342   : > { %v5672_v46 = vmul.u32.u64.low %v1194_v23, %v1189_v10  ;;  %v5673_v33 = vmul.u32.u64.high %v1194_v23, %v1189_v10, %v5672_v46  ;;  %v1192_v12 = vsel %vm1180_vm4, %v1174_v26, %v1191_v62  ;;  %v2168_v20 = vsub.s32 4, %v2144_v9 }
 0x343   : > { %v4254_v44 = vmin.u32 %v2148_v59, %v2146_v41  ;;  %v1193_v47 = vsel %vm1179_vm6, %v1190_v61, %v1192_v12  ;;  %v2189_v31 = vand.u32 2139095040, %v5666_v11  ;;  %v1185_v13 = vsel %vm1179_vm6, %v1182_v18, %v1184_v55 }
 0x344   : > { %v1136_v49 = vand.u32 3, %v1135_v2  ;;  %v5683_v63 = vmul.u32.u64.low %v1194_v23, %v1193_v47  ;;  %v5684_v24 = vmul.u32.u64.high %v1194_v23, %v1193_v47, %v5683_v63  ;;  %vm2084_vm5 = vcmp.lt.s32.totalorder %v5475_v48, 0 }
 0x345   : > { %v2150_v43 = vclz %v4254_v44  ;;  %v1204_v57 = vadd.s32 1, %v5673_v33  ;;  %v2190_v6 = vshrl.u32 %v2189_v31, 23  ;;  %v2169_v54 = vsel %vm2084_vm5, %v2168_v20, %v2144_v9 }
 0x346   : > { %v1201_v4 = vmul.u32 %v1194_v23, %v1185_v13  ;;  %v2186_v53 = vand.u32 2147483647, %v5666_v11  ;;  %vm5693_vm7 = vcmp.le.f32.partialorder %v2082_v39, 0.7853982  ;;  %vm1134_vm9 = vweird.f32 %v5373_v37 }
 0x347   : > { %v4255_v56 = vadd.s32 4294967294, %v2150_v43  ;;  %v4257_v27 = vadd.s32 4294967169, %v2190_v6  ;;  %vm1138_vm10 = vcmp.eq.s32.totalorder %v1136_v49, 0  ;;  %v2138_v58 = vadd.s32 %v5588_v17, %v5600_v29 }
 0x348   : > { %vm1203_vm11 = vc.u32 %v5684_v24, %v5672_v46  ;;  %v2171_v39 = vsel %vm5693_vm7, 0, %v2169_v54  ;;  %vm1141_vm12 = vcmp.eq.s32.totalorder %v1136_v49, 2  ;;  %v2193_v1 = vand.u32 8388607, %v2186_v53 }
 0x349   : > { %vm4256_vm8 = vcmp.lt.s32.totalorder %v4255_v56, 0  ;;  %v1205_v7 = vsel %vm1203_vm11, %v1204_v57, %v5673_v33  ;;  %v2196_v8 = vadd.s32 1, %v4257_v27  ;;  %v1253_v21 = vand.u32 2139095040, %v5702_v14 }
 0x34a   : > { %v2153_v60 = vsel %vm4256_vm8, 0, %v4255_v56  ;;  %v1206_v26 = vadd.s32 %v1205_v7, %v1201_v4  ;;  %v2175_v38 = vadd.s32 3, %v2171_v39  ;;  %v2194_v18 = vor.u32 8388608, %v2193_v1 }
 0x34b   : > { %v2154_v0 = vsub.s32 32, %v2153_v60  ;;  %v2158_v3 = vsub.s32 4294967266, %v2153_v60  ;;  %v2155_v29 = vshll.u32 %v2146_v41, %v2153_v60  ;;  %vm2197_vm14 = vcmp.gt.s32.totalorder %v2196_v8, 0 }
 0x34c   : > { %v1207_v23 = vadd.s32 536870912, %v1206_v26  ;;  %v2198_v25 = vsel %vm2197_vm14, %v2196_v8, 0  ;;  %vm1137_vm13 = vcmp.lt.s32.totalorder %v1136_v49, 2  ;;  %v1254_v10 = vshrl.u32 %v1253_v21, 23 }
 0x34d   : > { %v4568_v17 = vpop.eup %4567  ;;  %v2156_v9 = vshrl.u32 %v2138_v58, %v2154_v0  ;;  %v2159_v16 = vadd.s32 127, %v2158_v3  ;;  %v2200_v41 = vand.u32 31, %v2198_v25  ;;  %v5714_v55 = vand.u32 3, %v2175_v38 }
 0x34e   : > { %v4570_v52 = vpop.eup %4569  ;;  %v1142_v5 = vxor.u32 2147483648, %v4568_v17  ;;  %v5711_v2 = vshrl.u32 %v1207_v23, 30  ;;  %v1250_v47 = vand.u32 2147483647, %v5702_v14  ;;  %v1202_v31 = vadd.s32 %v5672_v46, %v5684_v24 }
 0x34f   : > { %v1139_v15 = vxor.u32 2147483648, %v4570_v52  ;;  %v2157_v22 = vor.u32 %v2156_v9, %v2155_v29  ;;  %v2160_v35 = vshll.u32 %v2159_v16, 23  ;;  %v2201_v33 = vsub.s32 32, %v2200_v41 }
 0x350   : > { %v1143_v50 = vsel %vm1141_vm12, %v1142_v5, %v4570_v52  ;;  %v1209_v62 = vshll.u32 %v5711_v2, 30  ;;  %v5726_v49 = vshll.u32 %v2194_v18, 8  ;;  %v2203_v56 = vshll.u32 %v4736_v28, %v2200_v41 }
 0x351   : > { %v1140_v51 = vsel %vm1138_vm10, %v4568_v17, %v1139_v15  ;;  %v2161_v59 = vor.u32 4788187, %v2160_v35  ;;  %v2164_v20 = vcvt.s32.f32 %v2157_v22  ;;  %v2204_v13 = vshrl.u32 %v4737_v30, %v2201_v33 }
 0x352   : > { %v1144_v61 = vsel %vm1137_vm13, %v1140_v51, %v1143_v50  ;;  %v5723_v43 = vsub.s32 %v1206_v26, %v1209_v62  ;;  %v2207_v37 = vshrl.u32 %v4738_v32, %v2201_v33  ;;  %v4221_v57 = vadd.s32 4294967169, %v1254_v10 }
 0x353   : > { %v1145_v44 = vsel %vm1134_vm9, nan, %v1144_v61  ;;  %v2162_v12 = vand.u32 2147483647, %v2161_v59  ;;  %v2206_v54 = vshll.u32 %v4737_v30, %v2200_v41  ;;  %v2209_v4 = vshll.u32 %v4738_v32, %v2200_v41 }
 0x354   : > { %4061 = vst [vmem:[%s5293_s20 + $0x18] sm:$0xff] %v1145_v44  ;;  %v1212_v6 = vsub.s32 0, %v5723_v43  ;;  %v2210_v46 = vshrl.u32 %v4739_v34, %v2201_v33  ;;  %v2199_v27 = vshrl.u32 %v2198_v25, 5  ;;  %v2212_v58 = vshll.u32 %v4739_v34, %v2200_v41 }
 0x355   : > { %v2165_v63 = vmul.f32 %v2164_v20, %v2162_v12  ;;  %v2213_v60 = vshrl.u32 %v4740_v36, %v2201_v33  ;;  %v2205_v3 = vor.u32 %v2204_v13, %v2203_v56  ;;  %v2208_v39 = vor.u32 %v2207_v37, %v2206_v54 }
 0x356   : > { %v4218_v0 = vmin.u32 %v1212_v6, %v5723_v43  ;;  %v2211_v7 = vor.u32 %v2210_v46, %v2209_v4  ;;  %v2215_v8 = vshll.u32 %v4740_v36, %v2200_v41  ;;  %v2216_v17 = vshrl.u32 %v4741_v45, %v2201_v33  ;;  %v5775_v46 = vpop.f32.mrf.mxu1 }
 0x357   : > { %v2166_v24 = vxor.u32 2147483648, %v2165_v63  ;;  %v2214_v1 = vor.u32 %v2213_v60, %v2212_v58  ;;  %vm1148_vm15 = vcmp.lt.s32.totalorder %v5541_v42, 0  ;;  %v5747_v16 = vand.u32 8388607, %v1250_v47 }
 0x358   : > { %v1214_v9 = vclz %v4218_v0  ;;  %v1260_v21 = vadd.s32 1, %v4221_v57  ;;  %v1232_v52 = vsub.s32 4, %v5711_v2  ;;  %v2202_v5 = vshrl.u32 %v4736_v28, %v2201_v33 }
 0x359   : > { %v2167_v26 = vsel %vm2084_vm5, %v2166_v24, %v2165_v63  ;;  %v2217_v38 = vor.u32 %v2216_v17, %v2215_v8  ;;  %vm2218_vm0 = vcmp.lt.s32.totalorder %v2199_v27, 1  ;;  %vm2221_vm1 = vcmp.lt.s32.totalorder %v2199_v27, 4 }
 0x35a   : > { %v2170_v29 = vsel %vm5693_vm7, %v5475_v48, %v2167_v26  ;;  %v4219_v23 = vadd.s32 4294967294, %v1214_v9  ;;  %vm2220_vm2 = vcmp.lt.s32.totalorder %v2199_v27, 3  ;;  %v2223_v40 = vsel %vm2221_vm1, %v2211_v7, 2102212464 }
 0x35b   : > { %4571 = vcosq.f32 %v2170_v29  ;;  %v2226_v15 = vsel %vm2218_vm0, %v2205_v3, %v2208_v39  ;;  %v2227_v22 = vsel %vm2221_vm1, %v2214_v1, 920167782  ;;  %vm2219_vm4 = vcmp.lt.s32.totalorder %v2199_v27, 2 }
 0x35c   : > { %4573 = vsinq.f32 %v2170_v29  ;;  %vm4220_vm3 = vcmp.lt.s32.totalorder %v4219_v23, 0  ;;  %v2228_v35 = vsel %vm2220_vm2, %v2211_v7, %v2227_v22  ;;  %v2230_v25 = vsel %vm2218_vm0, %v2208_v39, %v2211_v7 }
 0x35d   : > { %v1217_v50 = vsel %vm4220_vm3, 0, %v4219_v23  ;;  %v2222_v18 = vsel %vm2218_vm0, %v2202_v5, %v2205_v3  ;;  %v2229_v41 = vsel %vm2219_vm4, %v2226_v15, %v2228_v35  ;;  %v2231_v51 = vsel %vm2221_vm1, %v2217_v38, 1326507024 }
 0x35e   : > { %v1218_v59 = vsub.s32 32, %v1217_v50  ;;  %v1222_v10 = vsub.s32 4294967266, %v1217_v50  ;;  %v2224_v61 = vsel %vm2220_vm2, %v2208_v39, %v2223_v40  ;;  %v2232_v62 = vsel %vm2220_vm2, %v2214_v1, %v2231_v51 }
 0x35f   : > { %v1219_v33 = vshll.u32 %v5723_v43, %v1217_v50  ;;  %v2233_v44 = vsel %vm2219_vm4, %v2230_v25, %v2232_v62  ;;  %v5755_v12 = vmul.u32.u64.low %v5726_v49, %v2229_v41  ;;  %v5756_v20 = vmul.u32.u64.high %v5726_v49, %v2229_v41, %v5755_v12 }
 0x360   : > { %v1220_v13 = vshrl.u32 %v1202_v31, %v1218_v59  ;;  %v1223_v63 = vadd.s32 127, %v1222_v10  ;;  %v5760_v56 = vmul.u32.u64.low %v5726_v49, %v2233_v44  ;;  %v5761_v37 = vmul.u32.u64.high %v5726_v49, %v2233_v44, %v5760_v56 }
 0x361   : > { %vm5765_vm6 = vcmp.le.f32.partialorder %v1146_v19, 0.7853982  ;;  %v1233_v43 = vsel %vm1148_vm15, %v1232_v52, %v5711_v2  ;;  %v2225_v6 = vsel %vm2219_vm4, %v2222_v18, %v2224_v61  ;;  %vm1261_vm5 = vcmp.gt.s32.totalorder %v1260_v21, 0 }
 0x362   : > { %vm2177_vm7 = vcmp.lt.s32.totalorder %v5714_v55, 2  ;;  %vm2178_vm8 = vcmp.eq.s32.totalorder %v5714_v55, 0  ;;  %v1221_v31 = vor.u32 %v1220_v13, %v1219_v33  ;;  %v1224_v54 = vshll.u32 %v1223_v63, 23 }
 0x363   : > { %v1262_v4 = vsel %vm1261_vm5, %v1260_v21, 0  ;;  %vm2174_vm9 = vweird.f32 %v5475_v48  ;;  %vm2181_vm10 = vcmp.eq.s32.totalorder %v5714_v55, 2  ;;  %v2244_v19 = vadd.s32 1, %v5756_v20 }
 0x364   : > { %v1258_v2 = vor.u32 8388608, %v5747_v16  ;;  %v1264_v24 = vand.u32 31, %v1262_v4  ;;  %v1225_v27 = vor.u32 4788187, %v1224_v54  ;;  %v1235_v58 = vsel %vm5765_vm6, 0, %v1233_v43 }
 0x365   : > { %v2241_v60 = vmul.u32 %v5726_v49, %v2225_v6  ;;  %vm2243_vm11 = vc.u32 %v5761_v37, %v5755_v12  ;;  %v5787_v3 = vshrl.u32 %v1262_v4, 5  ;;  %v2293_v7 = vand.u32 2139095040, %v5775_v46 }
 0x366   : > { %v2245_v0 = vsel %vm2243_vm11, %v2244_v19, %v5756_v20  ;;  %v1265_v39 = vsub.s32 32, %v1264_v24  ;;  %v1226_v1 = vand.u32 2147483647, %v1225_v27  ;;  %v1228_v8 = vcvt.s32.f32 %v1221_v31 }
 0x367   : > { %v2246_v17 = vadd.s32 %v2245_v0, %v2241_v60  ;;  %v1267_v29 = vshll.u32 %v4736_v28, %v1264_v24  ;;  %v1270_v21 = vshll.u32 %v4737_v30, %v1264_v24  ;;  %v1273_v52 = vshll.u32 %v4738_v32, %v1264_v24 }
 0x368   : > { %v4572_v26 = vpop.eup %4571  ;;  %v1268_v49 = vshrl.u32 %v4737_v30, %v1265_v39  ;;  %v1229_v38 = vmul.f32 %v1228_v8, %v1226_v1  ;;  %v1271_v40 = vshrl.u32 %v4738_v32, %v1265_v39  ;;  %v1266_v22 = vshrl.u32 %v4736_v28, %v1265_v39 }
 0x369   : > { %v4574_v9 = vpop.eup %4573  ;;  %v2182_v16 = vxor.u32 2147483648, %v4572_v26  ;;  %v2247_v23 = vadd.s32 536870912, %v2246_v17  ;;  %v1276_v35 = vshll.u32 %v4739_v34, %v1264_v24  ;;  %v1277_v25 = vshrl.u32 %v4740_v36, %v1265_v39 }
 0x36a   : > { %v2179_v5 = vxor.u32 2147483648, %v4574_v9  ;;  %v1230_v18 = vxor.u32 2147483648, %v1229_v38  ;;  %v1274_v51 = vshrl.u32 %v4739_v34, %v1265_v39  ;;  %v1269_v10 = vor.u32 %v1268_v49, %v1267_v29 }
 0x36b   : > { %v2183_v15 = vsel %vm2181_vm10, %v2182_v16, %v4574_v9  ;;  %v5802_v41 = vshrl.u32 %v2247_v23, 30  ;;  %v1279_v61 = vshll.u32 %v4740_v36, %v1264_v24  ;;  %v1280_v62 = vshrl.u32 %v4741_v45, %v1265_v39 }
 0x36c   : > { %v2180_v50 = vsel %vm2178_vm8, %v4572_v26, %v2179_v5  ;;  %v1231_v44 = vsel %vm1148_vm15, %v1230_v18, %v1229_v38  ;;  %v1272_v13 = vor.u32 %v1271_v40, %v1270_v21  ;;  %v1278_v63 = vor.u32 %v1277_v25, %v1276_v35 }
 0x36d   : > { %v2184_v59 = vsel %vm2177_vm7, %v2180_v50, %v2183_v15  ;;  %v2249_v20 = vshll.u32 %v5802_v41, 30  ;;  %v1234_v55 = vsel %vm5765_vm6, %v5541_v42, %v1231_v44  ;;  %v1281_v56 = vor.u32 %v1280_v62, %v1279_v61 }
 0x36e   : > { %v2185_v33 = vsel %vm2174_vm9, nan, %v2184_v59  ;;  %vm1282_vm12 = vcmp.lt.s32.totalorder %v5787_v3, 1  ;;  %4575 = vcosq.f32 %v1234_v55  ;;  %v1239_v43 = vadd.s32 3, %v1235_v58 }
 0x36f   : > { %4071 = vst [vmem:[%s5293_s20 + $0x68] sm:$0xff] %v2185_v33  ;;  %v5819_v6 = vsub.s32 %v2246_v17, %v2249_v20  ;;  %v1275_v48 = vor.u32 %v1274_v51, %v1273_v52  ;;  %4577 = vsinq.f32 %v1234_v55  ;;  %vm1284_vm14 = vcmp.lt.s32.totalorder %v5787_v3, 3 }
 0x370   : > { %vm1285_vm13 = vcmp.lt.s32.totalorder %v5787_v3, 4  ;;  %v2294_v31 = vshrl.u32 %v2293_v7, 23  ;;  %vm1283_vm15 = vcmp.lt.s32.totalorder %v5787_v3, 2  ;;  %v1290_v4 = vsel %vm1282_vm12, %v1269_v10, %v1272_v13 }
 0x371   : > { %v2252_v54 = vsub.s32 0, %v5819_v6  ;;  %v1287_v57 = vsel %vm1285_vm13, %v1275_v48, 2102212464  ;;  %v1286_v19 = vsel %vm1282_vm12, %v1266_v22, %v1269_v10  ;;  %v1291_v24 = vsel %vm1285_vm13, %v1278_v63, 920167782 }
 0x372   : > { %v1295_v27 = vsel %vm1285_vm13, %v1281_v56, 1326507024  ;;  %v1298_v58 = vshll.u32 %v1258_v2, 8  ;;  %v1288_v0 = vsel %vm1284_vm14, %v1272_v13, %v1287_v57  ;;  %v1292_v39 = vsel %vm1284_vm14, %v1275_v48, %v1291_v24 }
 0x373   : > { %v4258_v60 = vmin.u32 %v2252_v54, %v5819_v6  ;;  %v1294_v7 = vsel %vm1282_vm12, %v1272_v13, %v1275_v48  ;;  %v1293_v26 = vsel %vm1283_vm15, %v1290_v4, %v1292_v39  ;;  %v1296_v1 = vsel %vm1284_vm14, %v1278_v63, %v1295_v27  ;;  %v5870_v13 = vpop.f32.mrf.mxu0 }
 0x374   : > { %v4261_v8 = vadd.s32 4294967169, %v2294_v31  ;;  %v1240_v17 = vand.u32 3, %v1239_v43  ;;  %v1289_v29 = vsel %vm1283_vm15, %v1286_v19, %v1288_v0  ;;  %v1297_v9 = vsel %vm1283_vm15, %v1294_v7, %v1296_v1 }
 0x375   : > { %v2254_v2 = vclz %v4258_v60  ;;  %v5844_v16 = vmul.u32.u64.low %v1298_v58, %v1293_v26  ;;  %v5845_v49 = vmul.u32.u64.high %v1298_v58, %v1293_v26, %v5844_v16  ;;  %vm2188_vm0 = vcmp.lt.s32.totalorder %v5666_v11, 0 }
 0x376   : > { %v5848_v52 = vmul.u32.u64.low %v1298_v58, %v1297_v9  ;;  %v5849_v5 = vmul.u32.u64.high %v1298_v58, %v1297_v9, %v5848_v52  ;;  %v2300_v38 = vadd.s32 1, %v4261_v8  ;;  %v2290_v23 = vand.u32 2147483647, %v5775_v46 }
 0x377   : > { %v4259_v21 = vadd.s32 4294967294, %v2254_v2  ;;  %vm1238_vm1 = vweird.f32 %v5541_v42  ;;  %vm1241_vm2 = vcmp.lt.s32.totalorder %v1240_v17, 2  ;;  %vm1242_vm3 = vcmp.eq.s32.totalorder %v1240_v17, 0 }
 0x378   : > { %vm2301_vm6 = vcmp.gt.s32.totalorder %v2300_v38, 0  ;;  %v1305_v40 = vmul.u32 %v1298_v58, %v1289_v29  ;;  %v1308_v15 = vadd.s32 1, %v5845_v49  ;;  %v2242_v35 = vadd.s32 %v5755_v12, %v5761_v37 }
 0x379   : > { %vm4260_vm4 = vcmp.lt.s32.totalorder %v4259_v21, 0  ;;  %v2302_v22 = vsel %vm2301_vm6, %v2300_v38, 0  ;;  %v2272_v18 = vsub.s32 4, %v5802_v41  ;;  %vm5860_vm5 = vcmp.le.f32.partialorder %v2186_v53, 0.7853982 }
 0x37a   : > { %v2257_v3 = vsel %vm4260_vm4, 0, %v4259_v21  ;;  %vm1307_vm7 = vc.u32 %v5849_v5, %v5844_v16  ;;  %v2297_v61 = vand.u32 8388607, %v2290_v23  ;;  %v2304_v12 = vand.u32 31, %v2302_v22 }
 0x37b   : > { %v2258_v25 = vsub.s32 32, %v2257_v3  ;;  %v2262_v50 = vsub.s32 4294967266, %v2257_v3  ;;  %v4576_v51 = vpop.eup %4575  ;;  %v2259_v10 = vshll.u32 %v5819_v6, %v2257_v3  ;;  %v1309_v20 = vsel %vm1307_vm7, %v1308_v15, %v5845_v49 }
 0x37c   : > { %v4578_v37 = vpop.eup %4577  ;;  %v1246_v62 = vxor.u32 2147483648, %v4576_v51  ;;  %vm1245_vm8 = vcmp.eq.s32.totalorder %v1240_v17, 2  ;;  %v1310_v55 = vadd.s32 %v1309_v20, %v1305_v40  ;;  %v2305_v63 = vsub.s32 32, %v2304_v12 }
 0x37d   : > { %v2260_v33 = vshrl.u32 %v2242_v35, %v2258_v25  ;;  %v2263_v44 = vadd.s32 127, %v2262_v50  ;;  %v1243_v53 = vxor.u32 2147483648, %v4578_v37  ;;  %v2273_v48 = vsel %vm2188_vm0, %v2272_v18, %v5802_v41 }
 0x37e   : > { %v1247_v56 = vsel %vm1245_vm8, %v1246_v62, %v4578_v37  ;;  %v1311_v54 = vadd.s32 536870912, %v1310_v55  ;;  %v2298_v57 = vor.u32 8388608, %v2297_v61  ;;  %v1357_v4 = vand.u32 2139095040, %v5870_v13 }
 0x37f   : > { %v2261_v43 = vor.u32 %v2260_v33, %v2259_v10  ;;  %v2264_v6 = vshll.u32 %v2263_v44, 23  ;;  %v1244_v31 = vsel %vm1242_vm3, %v4576_v51, %v1243_v53  ;;  %v2303_v27 = vshrl.u32 %v2302_v22, 5 }
 0x380   : > { %v1248_v19 = vsel %vm1241_vm2, %v1244_v31, %v1247_v56  ;;  %v2308_v58 = vshrl.u32 %v4737_v30, %v2305_v63  ;;  %v5881_v0 = vshrl.u32 %v1311_v54, 30  ;;  %v2307_v39 = vshll.u32 %v4736_v28, %v2304_v12 }
 0x381   : > { %v2265_v24 = vor.u32 4788187, %v2264_v6  ;;  %v1249_v60 = vsel %vm1238_vm1, nan, %v1248_v19  ;;  %v2311_v41 = vshrl.u32 %v4738_v32, %v2305_v63  ;;  %v2268_v26 = vcvt.s32.f32 %v2261_v43 }
 0x382   : > { %4062 = vst [vmem:[%s5293_s20 + $0x20] sm:$0xff] %v1249_v60  ;;  %v2310_v1 = vshll.u32 %v4737_v30, %v2304_v12  ;;  %v2314_v8 = vshrl.u32 %v4739_v34, %v2305_v63  ;;  %v1313_v17 = vshll.u32 %v5881_v0, 30  ;;  %v2313_v2 = vshll.u32 %v4738_v32, %v2304_v12 }
 0x383   : > { %v2266_v7 = vand.u32 2147483647, %v2265_v24  ;;  %v2316_v42 = vshll.u32 %v4739_v34, %v2304_v12  ;;  %v2317_v29 = vshrl.u32 %v4740_v36, %v2305_v63  ;;  %v2275_v49 = vsel %vm5860_vm5, 0, %v2273_v48 }
 0x384   : > { %v2309_v21 = vor.u32 %v2308_v58, %v2307_v39  ;;  %v2320_v52 = vshrl.u32 %v4741_v45, %v2305_v63  ;;  %v5895_v38 = vsub.s32 %v1310_v55, %v1313_v17  ;;  %v2312_v3 = vor.u32 %v2311_v41, %v2310_v1 }
 0x385   : > { %v2269_v9 = vmul.f32 %v2268_v26, %v2266_v7  ;;  %v2315_v40 = vor.u32 %v2314_v8, %v2313_v2  ;;  %v2318_v15 = vor.u32 %v2317_v29, %v2316_v42  ;;  %v2319_v35 = vshll.u32 %v4740_v36, %v2304_v12 }
 0x386   : > { %v5898_v25 = vshll.u32 %v2298_v57, 8  ;;  %v1354_v50 = vand.u32 2147483647, %v5870_v13  ;;  %v1316_v18 = vsub.s32 0, %v5895_v38  ;;  %vm2322_vm9 = vcmp.lt.s32.totalorder %v2303_v27, 1 }
 0x387   : > { %v2270_v22 = vxor.u32 2147483648, %v2269_v9  ;;  %vm2325_vm10 = vcmp.lt.s32.totalorder %v2303_v27, 4  ;;  %v1358_v51 = vshrl.u32 %v1357_v4, 23  ;;  %v2321_v61 = vor.u32 %v2320_v52, %v2319_v35 }
 0x388   : > { %vm2324_vm11 = vcmp.lt.s32.totalorder %v2303_v27, 3  ;;  %v2331_v37 = vsel %vm2325_vm10, %v2318_v15, 920167782  ;;  %v4222_v62 = vmin.u32 %v1316_v18, %v5895_v38  ;;  %v2327_v33 = vsel %vm2325_vm10, %v2315_v40, 2102212464 }
 0x389   : > { %v2271_v10 = vsel %vm2188_vm0, %v2270_v22, %v2269_v9  ;;  %v2330_v44 = vsel %vm2322_vm9, %v2309_v21, %v2312_v3  ;;  %v1336_v20 = vsub.s32 4, %v5881_v0  ;;  %v2306_v53 = vshrl.u32 %v4736_v28, %v2305_v63 }
 0x38a   : > { %v2274_v12 = vsel %vm5860_vm5, %v5666_v11, %v2271_v10  ;;  %v2332_v55 = vsel %vm2324_vm11, %v2315_v40, %v2331_v37  ;;  %v1318_v56 = vclz %v4222_v62  ;;  %vm2323_vm12 = vcmp.lt.s32.totalorder %v2303_v27, 2 }
 0x38b   : > { %4579 = vcosq.f32 %v2274_v12  ;;  %v2334_v43 = vsel %vm2322_vm9, %v2312_v3, %v2315_v40  ;;  %v2326_v59 = vsel %vm2322_vm9, %v2306_v53, %v2309_v21  ;;  %v2328_v6 = vsel %vm2324_vm11, %v2312_v3, %v2327_v33  ;;  %v5950_v40 = vpop.f32.mrf.mxu1 }
 0x38c   : > { %4581 = vsinq.f32 %v2274_v12  ;;  %v2333_v48 = vsel %vm2323_vm12, %v2330_v44, %v2332_v55  ;;  %v2335_v31 = vsel %vm2325_vm10, %v2321_v61, 1326507024  ;;  %v4223_v54 = vadd.s32 4294967294, %v1318_v56 }
 0x38d   : > { %v2336_v57 = vsel %vm2324_vm11, %v2318_v15, %v2335_v31  ;;  %v5920_v4 = vmul.u32.u64.low %v5898_v25, %v2333_v48  ;;  %v5921_v63 = vmul.u32.u64.high %v5898_v25, %v2333_v48, %v5920_v4  ;;  %v2279_v19 = vadd.s32 3, %v2275_v49 }
 0x38e   : > { %vm1252_vm14 = vcmp.lt.s32.totalorder %v5702_v14, 0  ;;  %v2337_v24 = vsel %vm2323_vm12, %v2334_v43, %v2336_v57  ;;  %v4225_v58 = vadd.s32 4294967169, %v1358_v51  ;;  %vm4224_vm13 = vcmp.lt.s32.totalorder %v4223_v54, 0 }
 0x38f   : > { %v2329_v60 = vsel %vm2323_vm12, %v2326_v59, %v2328_v6  ;;  %v5926_v39 = vmul.u32.u64.low %v5898_v25, %v2337_v24  ;;  %v5927_v41 = vmul.u32.u64.high %v5898_v25, %v2337_v24, %v5926_v39  ;;  %v1306_v27 = vadd.s32 %v5844_v16, %v5849_v5 }
 0x390   : > { %v1321_v7 = vsel %vm4224_vm13, 0, %v4223_v54  ;;  %v1361_v26 = vand.u32 8388607, %v1354_v50  ;;  %v1364_v1 = vadd.s32 1, %v4225_v58  ;;  %v1337_v2 = vsel %vm1252_vm14, %v1336_v20, %v5881_v0 }
 0x391   : > { %v1322_v8 = vsub.s32 32, %v1321_v7  ;;  %v1326_v17 = vsub.s32 4294967266, %v1321_v7  ;;  %v2348_v42 = vadd.s32 1, %v5921_v63  ;;  %v2280_v29 = vand.u32 3, %v2279_v19 }
 0x392   : > { %vm5939_vm15 = vcmp.le.f32.partialorder %v1250_v47, 0.7853982  ;;  %v2345_v16 = vmul.u32 %v5898_v25, %v2329_v60  ;;  %vm1365_vm0 = vcmp.gt.s32.totalorder %v1364_v1, 0  ;;  %v1323_v5 = vshll.u32 %v5895_v38, %v1321_v7 }
 0x393   : > { %v1324_v49 = vshrl.u32 %v1306_v27, %v1322_v8  ;;  %v1327_v21 = vadd.s32 127, %v1326_v17  ;;  %vm2347_vm1 = vc.u32 %v5927_v41, %v5920_v4  ;;  %v1339_v0 = vsel %vm5939_vm15, 0, %v1337_v2 }
 0x394   : > { %v2349_v52 = vsel %vm2347_vm1, %v2348_v42, %v5921_v63  ;;  %v1362_v3 = vor.u32 8388608, %v1361_v26  ;;  %v1366_v47 = vsel %vm1365_vm0, %v1364_v1, 0  ;;  %vm2278_vm2 = vweird.f32 %v5666_v11 }
 0x395   : > { %v1325_v15 = vor.u32 %v1324_v49, %v1323_v5  ;;  %v1328_v22 = vshll.u32 %v1327_v21, 23  ;;  %v2350_v35 = vadd.s32 %v2349_v52, %v2345_v16  ;;  %vm2281_vm3 = vcmp.lt.s32.totalorder %v2280_v29, 2 }
 0x396   : > { %vm2282_vm4 = vcmp.eq.s32.totalorder %v2280_v29, 0  ;;  %vm2285_vm6 = vcmp.eq.s32.totalorder %v2280_v29, 2  ;;  %v1368_v38 = vand.u32 31, %v1366_v47  ;;  %v5953_v51 = vadd.s32 3, %v1339_v0 }
 0x397   : > { %v1329_v18 = vor.u32 4788187, %v1328_v22  ;;  %v2351_v10 = vadd.s32 536870912, %v2350_v35  ;;  %v2394_v61 = vand.u32 2147483647, %v5950_v40  ;;  %v5956_v33 = vshll.u32 %v1362_v3, 8 }
 0x398   : > { %v4580_v25 = vpop.eup %4579  ;;  %v1369_v62 = vsub.s32 32, %v1368_v38  ;;  %v2397_v44 = vand.u32 2139095040, %v5950_v40  ;;  %v1332_v55 = vcvt.s32.f32 %v1325_v15  ;;  %v1371_v59 = vshll.u32 %v4736_v28, %v1368_v38 }
 0x399   : > { %v4582_v37 = vpop.eup %4581  ;;  %v2286_v12 = vxor.u32 2147483648, %v4580_v25  ;;  %v1330_v53 = vand.u32 2147483647, %v1329_v18  ;;  %v5959_v56 = vshrl.u32 %v2351_v10, 30  ;;  %v1374_v48 = vshll.u32 %v4737_v30, %v1368_v38 }
 0x39a   : > { %v2283_v20 = vxor.u32 2147483648, %v4582_v37  ;;  %v1372_v6 = vshrl.u32 %v4737_v30, %v1369_v62  ;;  %v1375_v63 = vshrl.u32 %v4738_v32, %v1369_v62  ;;  %v1377_v24 = vshll.u32 %v4738_v32, %v1368_v38 }
 0x39b   : > { %v2287_v43 = vsel %vm2285_vm6, %v2286_v12, %v4582_v37  ;;  %v1333_v54 = vmul.f32 %v1332_v55, %v1330_v53  ;;  %v2353_v57 = vshll.u32 %v5959_v56, 30  ;;  %v1378_v58 = vshrl.u32 %v4739_v34, %v1369_v62 }
 0x39c   : > { %v2284_v31 = vsel %vm2282_vm4, %v4580_v25, %v2283_v20  ;;  %v2398_v60 = vshrl.u32 %v2397_v44, 23  ;;  %v1367_v26 = vshrl.u32 %v1366_v47, 5  ;;  %v1370_v1 = vshrl.u32 %v4736_v28, %v1369_v62 }
 0x39d   : > { %v2288_v19 = vsel %vm2281_vm3, %v2284_v31, %v2287_v43  ;;  %v1334_v27 = vxor.u32 2147483648, %v1333_v54  ;;  %v5973_v7 = vsub.s32 %v2350_v35, %v2353_v57  ;;  %v1373_v8 = vor.u32 %v1372_v6, %v1371_v59 }
 0x39e   : > { %v2289_v39 = vsel %vm2278_vm2, nan, %v2288_v19  ;;  %v1380_v17 = vshll.u32 %v4739_v34, %v1368_v38  ;;  %v1381_v2 = vshrl.u32 %v4740_v36, %v1369_v62  ;;  %v1376_v16 = vor.u32 %v1375_v63, %v1374_v48 }
 0x39f   : > { %4072 = vst [vmem:[%s5293_s20 + $0x70] sm:$0xff] %v2289_v39  ;;  %v1335_v42 = vsel %vm1252_vm14, %v1334_v27, %v1333_v54  ;;  %v2356_v29 = vsub.s32 0, %v5973_v7  ;;  %v1383_v11 = vshll.u32 %v4740_v36, %v1368_v38  ;;  %v1379_v49 = vor.u32 %v1378_v58, %v1377_v24 }
 0x3a0   : > { %v1338_v5 = vsel %vm5939_vm15, %v5702_v14, %v1335_v42  ;;  %v1382_v21 = vor.u32 %v1381_v2, %v1380_v17  ;;  %v1384_v0 = vshrl.u32 %v4741_v45, %v1369_v62  ;;  %vm1386_vm5 = vcmp.lt.s32.totalorder %v1367_v26, 1 }
 0x3a1   : > { %4583 = vcosq.f32 %v1338_v5  ;;  %v4262_v52 = vmin.u32 %v2356_v29, %v5973_v7  ;;  %v4265_v3 = vadd.s32 4294967169, %v2398_v60  ;;  %vm1388_vm7 = vcmp.lt.s32.totalorder %v1367_v26, 3 }
 0x3a2   : > { %4585 = vsinq.f32 %v1338_v5  ;;  %v1385_v47 = vor.u32 %v1384_v0, %v1383_v11  ;;  %vm1389_vm8 = vcmp.lt.s32.totalorder %v1367_v26, 4  ;;  %vm1387_vm9 = vcmp.lt.s32.totalorder %v1367_v26, 2 }
 0x3a3   : > { %v2358_v15 = vclz %v4262_v52  ;;  %v1390_v22 = vsel %vm1386_vm5, %v1370_v1, %v1373_v8  ;;  %v2401_v9 = vand.u32 8388607, %v2394_v61  ;;  %v1391_v35 = vsel %vm1389_vm8, %v1379_v49, 2102212464 }
 0x3a4   : > { %v1394_v38 = vsel %vm1386_vm5, %v1373_v8, %v1376_v16  ;;  %v1395_v25 = vsel %vm1389_vm8, %v1382_v21, 920167782  ;;  %v1398_v18 = vsel %vm1386_vm5, %v1376_v16, %v1379_v49  ;;  %v1392_v37 = vsel %vm1388_vm7, %v1376_v16, %v1391_v35 }
 0x3a5   : > { %v4263_v10 = vadd.s32 4294967294, %v2358_v15  ;;  %v1396_v12 = vsel %vm1388_vm7, %v1379_v49, %v1395_v25  ;;  %v1399_v62 = vsel %vm1389_vm8, %v1385_v47, 1326507024  ;;  %v1393_v44 = vsel %vm1387_vm9, %v1390_v22, %v1392_v37 }
 0x3a6   : > { %v1397_v20 = vsel %vm1387_vm9, %v1394_v38, %v1396_v12  ;;  %v1400_v53 = vsel %vm1388_vm7, %v1382_v21, %v1399_v62  ;;  %v2404_v55 = vadd.s32 1, %v4265_v3  ;;  %v1344_v48 = vand.u32 3, %v5953_v51 }
 0x3a7   : > { %vm4264_vm10 = vcmp.lt.s32.totalorder %v4263_v10, 0  ;;  %v1401_v43 = vsel %vm1387_vm9, %v1398_v18, %v1400_v53  ;;  %v5997_v59 = vmul.u32.u64.low %v5956_v33, %v1397_v20  ;;  %v5998_v6 = vmul.u32.u64.high %v5956_v33, %v1397_v20, %v5997_v59 }
 0x3a8   : > { %v2361_v31 = vsel %vm4264_vm10, 0, %v4263_v10  ;;  %v6003_v54 = vmul.u32.u64.low %v5956_v33, %v1401_v43  ;;  %v6004_v57 = vmul.u32.u64.high %v5956_v33, %v1401_v43, %v6003_v54  ;;  %v2346_v63 = vadd.s32 %v5920_v4, %v5927_v41 }
 0x3a9   : > { %v2362_v19 = vsub.s32 32, %v2361_v31  ;;  %v2366_v24 = vsub.s32 4294967266, %v2361_v31  ;;  %vm2405_vm11 = vcmp.gt.s32.totalorder %v2404_v55, 0  ;;  %v2376_v58 = vsub.s32 4, %v5959_v56 }
 0x3aa   : > { %v1409_v60 = vmul.u32 %v5956_v33, %v1393_v44  ;;  %v2402_v39 = vor.u32 8388608, %v2401_v9  ;;  %v2406_v27 = vsel %vm2405_vm11, %v2404_v55, 0  ;;  %v2363_v26 = vshll.u32 %v5973_v7, %v2361_v31  ;;  %v6043_v55 = vpop.f32.mrf.mxu0 }
 0x3ab   : > { %v2364_v51 = vshrl.u32 %v2346_v63, %v2362_v19  ;;  %v2367_v1 = vadd.s32 127, %v2366_v24  ;;  %v1412_v8 = vadd.s32 1, %v5998_v6  ;;  %vm1342_vm12 = vweird.f32 %v5702_v14 }
 0x3ac   : > { %vm2292_vm14 = vcmp.lt.s32.totalorder %v5775_v46, 0  ;;  %vm1411_vm13 = vc.u32 %v6004_v57, %v5997_v59  ;;  %v2408_v4 = vand.u32 31, %v2406_v27  ;;  %vm1345_vm15 = vcmp.lt.s32.totalorder %v1344_v48, 2 }
 0x3ad   : > { %v2365_v41 = vor.u32 %v2364_v51, %v2363_v26  ;;  %v2368_v17 = vshll.u32 %v2367_v1, 23  ;;  %v1413_v33 = vsel %vm1411_vm13, %v1412_v8, %v5998_v6  ;;  %vm1346_vm0 = vcmp.eq.s32.totalorder %v1344_v48, 0 }
 0x3ae   : > { %v4584_v2 = vpop.eup %4583  ;;  %vm1349_vm1 = vcmp.eq.s32.totalorder %v1344_v48, 2  ;;  %vm6019_vm2 = vcmp.le.f32.partialorder %v2290_v23, 0.7853982  ;;  %v1414_v42 = vadd.s32 %v1413_v33, %v1409_v60  ;;  %v2409_v29 = vsub.s32 32, %v2408_v4 }
 0x3af   : > { %v4586_v16 = vpop.eup %4585  ;;  %v1350_v11 = vxor.u32 2147483648, %v4584_v2  ;;  %v2369_v5 = vor.u32 4788187, %v2368_v17  ;;  %v2377_v49 = vsel %vm2292_vm14, %v2376_v58, %v5959_v56  ;;  %v6026_v21 = vshll.u32 %v2402_v39, 8 }
 0x3b0   : > { %v1347_v0 = vxor.u32 2147483648, %v4586_v16  ;;  %v1415_v52 = vadd.s32 536870912, %v1414_v42  ;;  %v2407_v3 = vshrl.u32 %v2406_v27, 5  ;;  %v2411_v47 = vshll.u32 %v4736_v28, %v2408_v4 }
 0x3b1   : > { %v1351_v23 = vsel %vm1349_vm1, %v1350_v11, %v4586_v16  ;;  %v2370_v15 = vand.u32 2147483647, %v2369_v5  ;;  %v2372_v22 = vcvt.s32.f32 %v2365_v41  ;;  %v2418_v9 = vshrl.u32 %v4739_v34, %v2409_v29 }
 0x3b2   : > { %v1348_v35 = vsel %vm1346_vm0, %v4584_v2, %v1347_v0  ;;  %v6031_v38 = vshrl.u32 %v1415_v52, 30  ;;  %v2412_v25 = vshrl.u32 %v4737_v30, %v2409_v29  ;;  %v2415_v56 = vshrl.u32 %v4738_v32, %v2409_v29 }
 0x3b3   : > { %v1352_v18 = vsel %vm1345_vm15, %v1348_v35, %v1351_v23  ;;  %v2373_v10 = vmul.f32 %v2372_v22, %v2370_v15  ;;  %v2414_v37 = vshll.u32 %v4737_v30, %v2408_v4  ;;  %v2417_v12 = vshll.u32 %v4738_v32, %v2408_v4 }
 0x3b4   : > { %v1353_v62 = vsel %vm1342_vm12, nan, %v1352_v18  ;;  %v1417_v44 = vshll.u32 %v6031_v38, 30  ;;  %v2420_v20 = vshll.u32 %v4739_v34, %v2408_v4  ;;  %v2421_v53 = vshrl.u32 %v4740_v36, %v2409_v29 }
 0x3b5   : > { %4063 = vst [vmem:[%s5293_s20 + $0x28] sm:$0xff] %v1353_v62  ;;  %v2374_v43 = vxor.u32 2147483648, %v2373_v10  ;;  %v2419_v6 = vor.u32 %v2418_v9, %v2417_v12  ;;  %v2423_v48 = vshll.u32 %v4740_v36, %v2408_v4  ;;  %v2424_v31 = vshrl.u32 %v4741_v45, %v2409_v29 }
 0x3b6   : > { %v6048_v54 = vsub.s32 %v1414_v42, %v1417_v44  ;;  %v2413_v63 = vor.u32 %v2412_v25, %v2411_v47  ;;  %v2416_v14 = vor.u32 %v2415_v56, %v2414_v37  ;;  %v2422_v19 = vor.u32 %v2421_v53, %v2420_v20 }
 0x3b7   : > { %v2375_v24 = vsel %vm2292_vm14, %v2374_v43, %v2373_v10  ;;  %v2379_v58 = vsel %vm6019_vm2, 0, %v2377_v49  ;;  %v2425_v60 = vor.u32 %v2424_v31, %v2423_v48  ;;  %v1461_v39 = vand.u32 2139095040, %v6043_v55 }
 0x3b8   : > { %v2378_v27 = vsel %vm6019_vm2, %v5775_v46, %v2375_v24  ;;  %v1420_v26 = vsub.s32 0, %v6048_v54  ;;  %vm2426_vm3 = vcmp.lt.s32.totalorder %v2407_v3, 1  ;;  %vm2429_vm4 = vcmp.lt.s32.totalorder %v2407_v3, 4 }
 0x3b9   : > { %4587 = vcosq.f32 %v2378_v27  ;;  %v2410_v51 = vshrl.u32 %v4736_v28, %v2409_v29  ;;  %v2431_v1 = vsel %vm2429_vm4, %v2419_v6, 2102212464  ;;  %v2435_v8 = vsel %vm2429_vm4, %v2422_v19, 920167782 }
 0x3ba   : > { %4589 = vsinq.f32 %v2378_v27  ;;  %v4226_v4 = vmin.u32 %v1420_v26, %v6048_v54  ;;  %vm2428_vm6 = vcmp.lt.s32.totalorder %v2407_v3, 3  ;;  %v2434_v41 = vsel %vm2426_vm3, %v2413_v63, %v2416_v14 }
 0x3bb   : > { %v2383_v17 = vadd.s32 3, %v2379_v58  ;;  %v2436_v33 = vsel %vm2428_vm6, %v2419_v6, %v2435_v8  ;;  %v2438_v2 = vsel %vm2426_vm3, %v2416_v14, %v2419_v6  ;;  %v2439_v7 = vsel %vm2429_vm4, %v2425_v60, 1326507024 }
 0x3bc   : > { %v1422_v42 = vclz %v4226_v4  ;;  %vm2427_vm5 = vcmp.lt.s32.totalorder %v2407_v3, 2  ;;  %v2430_v16 = vsel %vm2426_vm3, %v2410_v51, %v2413_v63  ;;  %v2432_v11 = vsel %vm2428_vm6, %v2416_v14, %v2431_v1 }
 0x3bd   : > { %v2437_v5 = vsel %vm2427_vm5, %v2434_v41, %v2436_v33  ;;  %v2440_v29 = vsel %vm2428_vm6, %v2422_v19, %v2439_v7  ;;  %v1458_v49 = vand.u32 2147483647, %v6043_v55  ;;  %v1462_v0 = vshrl.u32 %v1461_v39, 23 }
 0x3be   : > { %v4227_v52 = vadd.s32 4294967294, %v1422_v42  ;;  %v2441_v47 = vsel %vm2427_vm5, %v2438_v2, %v2440_v29  ;;  %v6066_v23 = vmul.u32.u64.low %v6026_v21, %v2437_v5  ;;  %v6067_v15 = vmul.u32.u64.high %v6026_v21, %v2437_v5, %v6066_v23  ;;  %v6106_v42 = vpop.f32.mrf.mxu1 }
 0x3bf   : > { %v2433_v22 = vsel %vm2427_vm5, %v2430_v16, %v2432_v11  ;;  %v6071_v9 = vmul.u32.u64.low %v6026_v21, %v2441_v47  ;;  %v6072_v35 = vmul.u32.u64.high %v6026_v21, %v2441_v47, %v6071_v9  ;;  %v4229_v3 = vadd.s32 4294967169, %v1462_v0 }
 0x3c0   : > { %v2384_v25 = vand.u32 3, %v2383_v17  ;;  %vm1356_vm7 = vcmp.lt.s32.totalorder %v5870_v13, 0  ;;  %vm4228_vm8 = vcmp.lt.s32.totalorder %v4227_v52, 0  ;;  %v1410_v56 = vadd.s32 %v5997_v59, %v6004_v57 }
 0x3c1   : > { %v1425_v18 = vsel %vm4228_vm8, 0, %v4227_v52  ;;  %v1440_v10 = vsub.s32 4, %v6031_v38  ;;  %v1468_v37 = vadd.s32 1, %v4229_v3  ;;  %v2449_v44 = vmul.u32 %v6026_v21, %v2433_v22 }
 0x3c2   : > { %v1426_v12 = vsub.s32 32, %v1425_v18  ;;  %v1430_v62 = vsub.s32 4294967266, %v1425_v18  ;;  %v2452_v20 = vadd.s32 1, %v6067_v15  ;;  %vm2382_vm9 = vweird.f32 %v5775_v46 }
 0x3c3   : > { %v1427_v53 = vshll.u32 %v6048_v54, %v1425_v18  ;;  %vm2451_vm10 = vc.u32 %v6072_v35, %v6066_v23  ;;  %v1465_v59 = vand.u32 8388607, %v1458_v49  ;;  %vm1469_vm11 = vcmp.gt.s32.totalorder %v1468_v37, 0 }
 0x3c4   : > { %v1428_v57 = vshrl.u32 %v1410_v56, %v1426_v12  ;;  %v1431_v43 = vadd.s32 127, %v1430_v62  ;;  %v2453_v6 = vsel %vm2451_vm10, %v2452_v20, %v6067_v15  ;;  %v1470_v48 = vsel %vm1469_vm11, %v1468_v37, 0 }
 0x3c5   : > { %vm6089_vm12 = vcmp.le.f32.partialorder %v1354_v50, 0.7853982  ;;  %v6096_v31 = vsel %vm1356_vm7, %v1440_v10, %v6031_v38  ;;  %v2454_v54 = vadd.s32 %v2453_v6, %v2449_v44  ;;  %v1472_v63 = vand.u32 31, %v1470_v48 }
 0x3c6   : > { %v4588_v14 = vpop.eup %4587  ;;  %vm2385_vm14 = vcmp.lt.s32.totalorder %v2384_v25, 2  ;;  %vm2386_vm13 = vcmp.eq.s32.totalorder %v2384_v25, 0  ;;  %v1429_v19 = vor.u32 %v1428_v57, %v1427_v53  ;;  %v1432_v24 = vshll.u32 %v1431_v43, 23 }
 0x3c7   : > { %v4590_v58 = vpop.eup %4589  ;;  %vm2389_vm15 = vcmp.eq.s32.totalorder %v2384_v25, 2  ;;  %v2390_v60 = vxor.u32 2147483648, %v4588_v14  ;;  %v2455_v39 = vadd.s32 536870912, %v2454_v54  ;;  %v1473_v50 = vsub.s32 32, %v1472_v63 }
 0x3c8   : > { %v2387_v27 = vxor.u32 2147483648, %v4590_v58  ;;  %v1433_v26 = vor.u32 4788187, %v1432_v24  ;;  %v1443_v51 = vsel %vm6089_vm12, 0, %v6096_v31  ;;  %v1466_v38 = vor.u32 8388608, %v1465_v59 }
 0x3c9   : > { %v2391_v1 = vsel %vm2389_vm15, %v2390_v60, %v4590_v58  ;;  %v6101_v8 = vshrl.u32 %v2455_v39, 30  ;;  %v1471_v4 = vshrl.u32 %v1470_v48, 5  ;;  %v1475_v41 = vshll.u32 %v4736_v28, %v1472_v63 }
 0x3ca   : > { %v2388_v17 = vsel %vm2386_vm13, %v4588_v14, %v2387_v27  ;;  %v1434_v33 = vand.u32 2147483647, %v1433_v26  ;;  %v1436_v2 = vcvt.s32.f32 %v1429_v19  ;;  %v1478_v7 = vshll.u32 %v4737_v30, %v1472_v63 }
 0x3cb   : > { %v2392_v16 = vsel %vm2385_vm14, %v2388_v17, %v2391_v1  ;;  %v2457_v11 = vshll.u32 %v6101_v8, 30  ;;  %v1476_v5 = vshrl.u32 %v4737_v30, %v1473_v50  ;;  %v1479_v29 = vshrl.u32 %v4738_v32, %v1473_v50 }
 0x3cc   : > { %v2393_v0 = vsel %vm2382_vm9, nan, %v2392_v16  ;;  %v1437_v52 = vmul.f32 %v1436_v2, %v1434_v33  ;;  %v1481_v47 = vshll.u32 %v4738_v32, %v1472_v63  ;;  %v1482_v15 = vshrl.u32 %v4739_v34, %v1473_v50 }
 0x3cd   : > { %4073 = vst [vmem:[%s5293_s20 + $0x78] sm:$0xff] %v2393_v0  ;;  %v6117_v22 = vsub.s32 %v2454_v54, %v2457_v11  ;;  %v1484_v9 = vshll.u32 %v4739_v34, %v1472_v63  ;;  %v1485_v3 = vshrl.u32 %v4740_v36, %v1473_v50  ;;  %v2501_v25 = vand.u32 2139095040, %v6106_v42 }
 0x3ce   : > { %v1438_v56 = vxor.u32 2147483648, %v1437_v52  ;;  %v1474_v18 = vshrl.u32 %v4736_v28, %v1473_v50  ;;  %v1487_v46 = vshll.u32 %v4740_v36, %v1472_v63  ;;  %v6124_v10 = vshll.u32 %v1466_v38, 8 }
 0x3cf   : > { %v2460_v37 = vsub.s32 0, %v6117_v22  ;;  %v1477_v12 = vor.u32 %v1476_v5, %v1475_v41  ;;  %v1480_v62 = vor.u32 %v1479_v29, %v1478_v7  ;;  %v1488_v44 = vshrl.u32 %v4741_v45, %v1473_v50 }
 0x3d0   : > { %v1439_v20 = vsel %vm1356_vm7, %v1438_v56, %v1437_v52  ;;  %v1483_v53 = vor.u32 %v1482_v15, %v1481_v47  ;;  %v1486_v59 = vor.u32 %v1485_v3, %v1484_v9  ;;  %vm1490_vm0 = vcmp.lt.s32.totalorder %v1471_v4, 1 }
 0x3d1   : > { %v1442_v57 = vsel %vm6089_vm12, %v5870_v13, %v1439_v20  ;;  %v4266_v43 = vmin.u32 %v2460_v37, %v6117_v22  ;;  %v1489_v6 = vor.u32 %v1488_v44, %v1487_v46  ;;  %v2502_v48 = vshrl.u32 %v2501_v25, 23 }
 0x3d2   : > { %4591 = vcosq.f32 %v1442_v57  ;;  %vm1491_vm1 = vcmp.lt.s32.totalorder %v1471_v4, 2  ;;  %vm1492_vm2 = vcmp.lt.s32.totalorder %v1471_v4, 3  ;;  %vm1493_vm3 = vcmp.lt.s32.totalorder %v1471_v4, 4 }
 0x3d3   : > { %4593 = vsinq.f32 %v1442_v57  ;;  %v2462_v31 = vclz %v4266_v43  ;;  %v1494_v54 = vsel %vm1490_vm0, %v1474_v18, %v1477_v12  ;;  %v1498_v63 = vsel %vm1490_vm0, %v1477_v12, %v1480_v62 }
 0x3d4   : > { %v1447_v14 = vadd.s32 3, %v1443_v51  ;;  %v1495_v19 = vsel %vm1493_vm3, %v1483_v53, 2102212464  ;;  %v1499_v24 = vsel %vm1493_vm3, %v1486_v59, 920167782  ;;  %v1502_v21 = vsel %vm1490_vm0, %v1480_v62, %v1483_v53 }
 0x3d5   : > { %v4267_v58 = vadd.s32 4294967294, %v2462_v31  ;;  %v1496_v60 = vsel %vm1492_vm2, %v1480_v62, %v1495_v19  ;;  %v1500_v39 = vsel %vm1492_vm2, %v1483_v53, %v1499_v24  ;;  %v1503_v50 = vsel %vm1493_vm3, %v1489_v6, 1326507024 }
 0x3d6   : > { %v1497_v27 = vsel %vm1491_vm1, %v1494_v54, %v1496_v60  ;;  %v1501_v26 = vsel %vm1491_vm1, %v1498_v63, %v1500_v39  ;;  %v1504_v38 = vsel %vm1492_vm2, %v1486_v59, %v1503_v50  ;;  %v4269_v1 = vadd.s32 4294967169, %v2502_v48 }
 0x3d7   : > { %vm4268_vm4 = vcmp.lt.s32.totalorder %v4267_v58, 0  ;;  %v1505_v51 = vsel %vm1491_vm1, %v1502_v21, %v1504_v38  ;;  %v6144_v41 = vmul.u32.u64.low %v6124_v10, %v1501_v26  ;;  %v6145_v17 = vmul.u32.u64.high %v6124_v10, %v1501_v26, %v6144_v41 }
 0x3d8   : > { %v2465_v33 = vsel %vm4268_vm4, 0, %v4267_v58  ;;  %v2480_v2 = vsub.s32 4, %v6101_v8  ;;  %v6150_v7 = vmul.u32.u64.low %v6124_v10, %v1505_v51  ;;  %v6151_v16 = vmul.u32.u64.high %v6124_v10, %v1505_v51, %v6150_v7 }
 0x3d9   : > { %vm2396_vm6 = vcmp.lt.s32.totalorder %v5950_v40, 0  ;;  %v2450_v11 = vadd.s32 %v6066_v23, %v6072_v35  ;;  %v2466_v5 = vsub.s32 32, %v2465_v33  ;;  %v2470_v4 = vsub.s32 4294967266, %v2465_v33 }
 0x3da   : > { %v1448_v29 = vand.u32 3, %v1447_v14  ;;  %v1513_v0 = vmul.u32 %v6124_v10, %v1497_v27  ;;  %v2498_v52 = vand.u32 2147483647, %v6106_v42  ;;  %v2508_v47 = vadd.s32 1, %v4269_v1 }
 0x3db   : > { %v2467_v15 = vshll.u32 %v6117_v22, %v2465_v33  ;;  %v2468_v9 = vshrl.u32 %v2450_v11, %v2466_v5  ;;  %v2471_v3 = vadd.s32 127, %v2470_v4  ;;  %v1516_v25 = vadd.s32 1, %v6145_v17 }
 0x3dc   : > { %v2481_v56 = vsel %vm2396_vm6, %v2480_v2, %v6101_v8  ;;  %vm1515_vm5 = vc.u32 %v6151_v16, %v6144_v41  ;;  %vm2509_vm7 = vcmp.gt.s32.totalorder %v2508_v47, 0  ;;  %vm1446_vm8 = vweird.f32 %v5870_v13 }
 0x3dd   : > { %v2469_v23 = vor.u32 %v2468_v9, %v2467_v15  ;;  %v2472_v35 = vshll.u32 %v2471_v3, 23  ;;  %v1517_v18 = vsel %vm1515_vm5, %v1516_v25, %v6145_v17  ;;  %v2510_v46 = vsel %vm2509_vm7, %v2508_v47, 0  ;;  %v6202_v15 = vpop.f32.mrf.mxu0 }
 0x3de   : > { %vm6169_vm9 = vcmp.le.f32.partialorder %v2394_v61, 0.7853982  ;;  %v1518_v10 = vadd.s32 %v1517_v18, %v1513_v0  ;;  %v2512_v37 = vand.u32 31, %v2510_v46  ;;  %vm1449_vm10 = vcmp.lt.s32.totalorder %v1448_v29, 2 }
 0x3df   : > { %v4592_v8 = vpop.eup %4591  ;;  %v2473_v12 = vor.u32 4788187, %v2472_v35  ;;  %v2483_v62 = vsel %vm6169_vm9, 0, %v2481_v56  ;;  %v2505_v44 = vand.u32 8388607, %v2498_v52  ;;  %vm1450_vm11 = vcmp.eq.s32.totalorder %v1448_v29, 0 }
 0x3e0   : > { %v4594_v20 = vpop.eup %4593  ;;  %v1454_v53 = vxor.u32 2147483648, %v4592_v8  ;;  %v1519_v59 = vadd.s32 536870912, %v1518_v10  ;;  %v2513_v57 = vsub.s32 32, %v2512_v37  ;;  %vm1453_vm12 = vcmp.eq.s32.totalorder %v1448_v29, 2 }
 0x3e1   : > { %v1451_v61 = vxor.u32 2147483648, %v4594_v20  ;;  %v2474_v43 = vand.u32 2147483647, %v2473_v12  ;;  %v2476_v6 = vcvt.s32.f32 %v2469_v23  ;;  %v2487_v31 = vadd.s32 3, %v2483_v62 }
 0x3e2   : > { %v1455_v48 = vsel %vm1453_vm12, %v1454_v53, %v4594_v20  ;;  %v6177_v54 = vshrl.u32 %v1519_v59, 30  ;;  %v2516_v63 = vshrl.u32 %v4737_v30, %v2513_v57  ;;  %v2506_v24 = vor.u32 8388608, %v2505_v44 }
 0x3e3   : > { %v1452_v14 = vsel %vm1450_vm11, %v4592_v8, %v1451_v61  ;;  %v2477_v19 = vmul.f32 %v2476_v6, %v2474_v43  ;;  %v2515_v21 = vshll.u32 %v4736_v28, %v2512_v37  ;;  %v2519_v39 = vshrl.u32 %v4738_v32, %v2513_v57 }
 0x3e4   : > { %v1456_v58 = vsel %vm1449_vm10, %v1452_v14, %v1455_v48  ;;  %v1521_v60 = vshll.u32 %v6177_v54, 30  ;;  %v2522_v50 = vshrl.u32 %v4739_v34, %v2513_v57  ;;  %v2511_v38 = vshrl.u32 %v2510_v46, 5 }
 0x3e5   : > { %v1457_v27 = vsel %vm1446_vm8, nan, %v1456_v58  ;;  %v2478_v26 = vxor.u32 2147483648, %v2477_v19  ;;  %v2518_v1 = vshll.u32 %v4737_v30, %v2512_v37  ;;  %v2517_v17 = vor.u32 %v2516_v63, %v2515_v21 }
 0x3e6   : > { %4064 = vst [vmem:[%s5293_s20 + $0x30] sm:$0xff] %v1457_v27  ;;  %v6189_v51 = vsub.s32 %v1518_v10, %v1521_v60  ;;  %v2521_v33 = vshll.u32 %v4738_v32, %v2512_v37  ;;  %v2525_v2 = vshrl.u32 %v4740_v36, %v2513_v57  ;;  %v2524_v11 = vshll.u32 %v4739_v34, %v2512_v37 }
 0x3e7   : > { %v2479_v7 = vsel %vm2396_vm6, %v2478_v26, %v2477_v19  ;;  %v2527_v13 = vshll.u32 %v4740_v36, %v2512_v37  ;;  %v2528_v5 = vshrl.u32 %v4741_v45, %v2513_v57  ;;  %v2520_v0 = vor.u32 %v2519_v39, %v2518_v1 }
 0x3e8   : > { %v2482_v4 = vsel %vm6169_vm9, %v5950_v40, %v2479_v7  ;;  %v1524_v29 = vsub.s32 0, %v6189_v51  ;;  %v2523_v47 = vor.u32 %v2522_v50, %v2521_v33  ;;  %v6204_v9 = vand.u32 3, %v2487_v31 }
 0x3e9   : > { %4595 = vcosq.f32 %v2482_v4  ;;  %v2526_v3 = vor.u32 %v2525_v2, %v2524_v11  ;;  %v2529_v25 = vor.u32 %v2528_v5, %v2527_v13  ;;  %vm1460_vm14 = vcmp.lt.s32.totalorder %v6043_v55, 0  ;;  %v6251_v13 = vpop.f32.mrf.mxu1 }
 0x3ea   : > { %4597 = vsinq.f32 %v2482_v4  ;;  %v4230_v56 = vmin.u32 %v1524_v29, %v6189_v51  ;;  %v2546_v23 = vshll.u32 %v2506_v24, 8  ;;  %v1562_v35 = vand.u32 2147483647, %v6202_v15 }
 0x3eb   : > { %v1544_v18 = vsub.s32 4, %v6177_v54  ;;  %vm2530_vm13 = vcmp.lt.s32.totalorder %v2511_v38, 1  ;;  %vm2532_vm15 = vcmp.lt.s32.totalorder %v2511_v38, 3  ;;  %v1565_v46 = vand.u32 2139095040, %v6202_v15 }
 0x3ec   : > { %v1526_v22 = vclz %v4230_v56  ;;  %vm2533_vm0 = vcmp.lt.s32.totalorder %v2511_v38, 4  ;;  %v2538_v10 = vsel %vm2530_vm13, %v2517_v17, %v2520_v0  ;;  %v2542_v37 = vsel %vm2530_vm13, %v2520_v0, %v2523_v47 }
 0x3ed   : > { %v2514_v8 = vshrl.u32 %v4736_v28, %v2513_v57  ;;  %v2535_v12 = vsel %vm2533_vm0, %v2523_v47, 2102212464  ;;  %v2539_v62 = vsel %vm2533_vm0, %v2526_v3, 920167782  ;;  %v2543_v44 = vsel %vm2533_vm0, %v2529_v25, 1326507024 }
 0x3ee   : > { %vm6216_vm1 = vcmp.le.f32.partialorder %v1458_v49, 0.7853982  ;;  %v4231_v53 = vadd.s32 4294967294, %v1526_v22  ;;  %vm2531_vm2 = vcmp.lt.s32.totalorder %v2511_v38, 2  ;;  %v2540_v59 = vsel %vm2532_vm15, %v2523_v47, %v2539_v62 }
 0x3ef   : > { %v2544_v61 = vsel %vm2532_vm15, %v2526_v3, %v2543_v44  ;;  %v2534_v43 = vsel %vm2530_vm13, %v2514_v8, %v2517_v17  ;;  %v2541_v6 = vsel %vm2531_vm2, %v2538_v10, %v2540_v59  ;;  %v1566_v48 = vshrl.u32 %v1565_v46, 23 }
 0x3f0   : > { %v2545_v57 = vsel %vm2531_vm2, %v2542_v37, %v2544_v61  ;;  %vm4232_vm3 = vcmp.lt.s32.totalorder %v4231_v53, 0  ;;  %v2536_v31 = vsel %vm2532_vm15, %v2520_v0, %v2535_v12  ;;  %vm2489_vm4 = vcmp.lt.s32.totalorder %v6204_v9, 2 }
 0x3f1   : > { %v6226_v49 = vmul.u32.u64.low %v2546_v23, %v2545_v57  ;;  %v6227_v63 = vmul.u32.u64.high %v2546_v23, %v2545_v57, %v6226_v49  ;;  %v1529_v14 = vsel %vm4232_vm3, 0, %v4231_v53  ;;  %v4233_v21 = vadd.s32 4294967169, %v1566_v48 }
 0x3f2   : > { %v6229_v19 = vmul.u32.u64.low %v2546_v23, %v2541_v6  ;;  %v6230_v24 = vmul.u32.u64.high %v2546_v23, %v2541_v6, %v6229_v19  ;;  %v1514_v58 = vadd.s32 %v6144_v41, %v6151_v16  ;;  %v1530_v60 = vsub.s32 32, %v1529_v14 }
 0x3f3   : > { %v1534_v39 = vsub.s32 4294967266, %v1529_v14  ;;  %vm2486_vm6 = vweird.f32 %v5950_v40  ;;  %v6240_v50 = vsel %vm1460_vm14, %v1544_v18, %v6177_v54  ;;  %v2537_v27 = vsel %vm2531_vm2, %v2534_v43, %v2536_v31 }
 0x3f4   : > { %v1569_v26 = vand.u32 8388607, %v1562_v35  ;;  %v1572_v1 = vadd.s32 1, %v4233_v21  ;;  %v1531_v17 = vshll.u32 %v6189_v51, %v1529_v14  ;;  %v1532_v33 = vshrl.u32 %v1514_v58, %v1530_v60 }
 0x3f5   : > { %v1535_v2 = vadd.s32 127, %v1534_v39  ;;  %vm2555_vm5 = vc.u32 %v6227_v63, %v6229_v19  ;;  %vm2490_vm7 = vcmp.eq.s32.totalorder %v6204_v9, 0  ;;  %vm2493_vm8 = vcmp.eq.s32.totalorder %v6204_v9, 2 }
 0x3f6   : > { %v2556_v41 = vadd.s32 1, %v6230_v24  ;;  %vm1573_vm9 = vcmp.gt.s32.totalorder %v1572_v1, 0  ;;  %v4596_v16 = vpop.eup %4595  ;;  %v1533_v54 = vor.u32 %v1532_v33, %v1531_v17  ;;  %v2553_v7 = vmul.u32 %v2546_v23, %v2537_v27 }
 0x3f7   : > { %v1536_v38 = vshll.u32 %v1535_v2, 23  ;;  %v1574_v11 = vsel %vm1573_vm9, %v1572_v1, 0  ;;  %v4598_v51 = vpop.eup %4597  ;;  %v2494_v5 = vxor.u32 2147483648, %v4596_v16  ;;  %v1547_v4 = vsel %vm6216_vm1, 0, %v6240_v50 }
 0x3f8   : > { %v2557_v29 = vsel %vm2555_vm5, %v2556_v41, %v6230_v24  ;;  %v1576_v0 = vand.u32 31, %v1574_v11  ;;  %v2491_v47 = vxor.u32 2147483648, %v4598_v51  ;;  %v1570_v56 = vor.u32 8388608, %v1569_v26 }
 0x3f9   : > { %v1537_v3 = vor.u32 4788187, %v1536_v38  ;;  %v2558_v25 = vadd.s32 %v2557_v29, %v2553_v7  ;;  %v2495_v18 = vsel %vm2493_vm8, %v2494_v5, %v4598_v51  ;;  %v1575_v23 = vshrl.u32 %v1574_v11, 5 }
 0x3fa   : > { %v1577_v46 = vsub.s32 32, %v1576_v0  ;;  %v2605_v22 = vand.u32 2139095040, %v6251_v13  ;;  %v2492_v10 = vsel %vm2490_vm7, %v4596_v16, %v2491_v47  ;;  %v1540_v8 = vcvt.s32.f32 %v1533_v54 }
 0x3fb   : > { %v1538_v37 = vand.u32 2147483647, %v1537_v3  ;;  %v2559_v12 = vadd.s32 536870912, %v2558_v25  ;;  %v2496_v62 = vsel %vm2489_vm4, %v2492_v10, %v2495_v18  ;;  %v1579_v44 = vshll.u32 %v4736_v28, %v1576_v0 }
 0x3fc   : > { %v1580_v53 = vshrl.u32 %v4737_v30, %v1577_v46  ;;  %v1582_v59 = vshll.u32 %v4737_v30, %v1576_v0  ;;  %v2497_v61 = vsel %vm2486_vm6, nan, %v2496_v62  ;;  %v1583_v57 = vshrl.u32 %v4738_v32, %v1577_v46 }
 0x3fd   : > { %v1541_v43 = vmul.f32 %v1540_v8, %v1538_v37  ;;  %v6269_v6 = vshrl.u32 %v2559_v12, 30  ;;  %4074 = vst [vmem:[%s5293_s20 + $0x80] sm:$0xff] %v2497_v61  ;;  %v1585_v48 = vshll.u32 %v4738_v32, %v1576_v0  ;;  %v1586_v9 = vshrl.u32 %v4739_v34, %v1577_v46 }
 0x3fe   : > { %v1588_v31 = vshll.u32 %v4739_v34, %v1576_v0  ;;  %v1589_v49 = vshrl.u32 %v4740_v36, %v1577_v46  ;;  %v6278_v21 = vshll.u32 %v1570_v56, 8  ;;  %v2606_v40 = vshrl.u32 %v2605_v22, 23 }
 0x3ff   : > { %v1542_v14 = vxor.u32 2147483648, %v1541_v43  ;;  %v2561_v24 = vshll.u32 %v6269_v6, 30  ;;  %v1578_v58 = vshrl.u32 %v4736_v28, %v1577_v46  ;;  %v1581_v60 = vor.u32 %v1580_v53, %v1579_v44 }
 0x400   : > { %v1591_v39 = vshll.u32 %v4740_v36, %v1576_v0  ;;  %v1592_v50 = vshrl.u32 %v4741_v45, %v1577_v46  ;;  %v1584_v1 = vor.u32 %v1583_v57, %v1582_v59  ;;  %v1590_v17 = vor.u32 %v1589_v49, %v1588_v31 }
 0x401   : > { %v1543_v27 = vsel %vm1460_vm14, %v1542_v14, %v1541_v43  ;;  %v6285_v26 = vsub.s32 %v2558_v25, %v2561_v24  ;;  %v1587_v2 = vor.u32 %v1586_v9, %v1585_v48  ;;  %vm1594_vm10 = vcmp.lt.s32.totalorder %v1575_v23, 1 }
 0x402   : > { %v1546_v33 = vsel %vm6216_vm1, %v6043_v55, %v1543_v27  ;;  %v1593_v41 = vor.u32 %v1592_v50, %v1591_v39  ;;  %vm1596_vm11 = vcmp.lt.s32.totalorder %v1575_v23, 3  ;;  %vm1597_vm12 = vcmp.lt.s32.totalorder %v1575_v23, 4 }
 0x403   : > { %4599 = vcosq.f32 %v1546_v33  ;;  %v2564_v16 = vsub.s32 0, %v6285_v26  ;;  %vm1595_vm13 = vcmp.lt.s32.totalorder %v1575_v23, 2  ;;  %v1598_v54 = vsel %vm1594_vm10, %v1578_v58, %v1581_v60 }
 0x404   : > { %4601 = vsinq.f32 %v1546_v33  ;;  %v1599_v38 = vsel %vm1597_vm12, %v1587_v2, 2102212464  ;;  %v1602_v51 = vsel %vm1594_vm10, %v1581_v60, %v1584_v1  ;;  %v1603_v5 = vsel %vm1597_vm12, %v1590_v17, 920167782 }
 0x405   : > { %v4270_v7 = vmin.u32 %v2564_v16, %v6285_v26  ;;  %v1600_v11 = vsel %vm1596_vm11, %v1584_v1, %v1599_v38  ;;  %v1604_v20 = vsel %vm1596_vm11, %v1587_v2, %v1603_v5  ;;  %v1606_v29 = vsel %vm1594_vm10, %v1584_v1, %v1587_v2  ;;  %v6330_v1 = vpop.f32.mrf.mxu0 }
 0x406   : > { %v1607_v0 = vsel %vm1597_vm12, %v1593_v41, 1326507024  ;;  %v1551_v47 = vadd.s32 3, %v1547_v4  ;;  %v2584_v25 = vsub.s32 4, %v6269_v6  ;;  %v1601_v56 = vsel %vm1595_vm13, %v1598_v54, %v1600_v11 }
 0x407   : > { %v2566_v3 = vclz %v4270_v7  ;;  %v1605_v18 = vsel %vm1595_vm13, %v1602_v51, %v1604_v20  ;;  %v1608_v46 = vsel %vm1596_vm11, %v1590_v17, %v1607_v0  ;;  %v4273_v22 = vadd.s32 4294967169, %v2606_v40 }
 0x408   : > { %v1609_v37 = vsel %vm1595_vm13, %v1606_v29, %v1608_v46  ;;  %v6300_v8 = vmul.u32.u64.low %v6278_v21, %v1605_v18  ;;  %v6301_v12 = vmul.u32.u64.high %v6278_v21, %v1605_v18, %v6300_v8  ;;  %v1552_v53 = vand.u32 3, %v1551_v47 }
 0x409   : > { %v4271_v10 = vadd.s32 4294967294, %v2566_v3  ;;  %v6305_v4 = vmul.u32.u64.low %v6278_v21, %v1609_v37  ;;  %v6306_v62 = vmul.u32.u64.high %v6278_v21, %v1609_v37, %v6305_v4  ;;  %v2612_v44 = vadd.s32 1, %v4273_v22 }
 0x40a   : > { %vm2500_vm14 = vcmp.lt.s32.totalorder %v6106_v42, 0  ;;  %v2554_v59 = vadd.s32 %v6229_v19, %v6227_v63  ;;  %v1617_v23 = vmul.u32 %v6278_v21, %v1601_v56  ;;  %vm1550_vm1 = vweird.f32 %v6043_v55 }
 0x40b   : > { %vm4272_vm15 = vcmp.lt.s32.totalorder %v4271_v10, 0  ;;  %vm2613_vm0 = vcmp.gt.s32.totalorder %v2612_v44, 0  ;;  %v2585_v48 = vsel %vm2500_vm14, %v2584_v25, %v6269_v6  ;;  %v1620_v9 = vadd.s32 1, %v6301_v12 }
 0x40c   : > { %v2569_v61 = vsel %vm4272_vm15, 0, %v4271_v10  ;;  %vm6319_vm2 = vcmp.le.f32.partialorder %v2498_v52, 0.7853982  ;;  %vm1619_vm3 = vc.u32 %v6306_v62, %v6300_v8  ;;  %v2602_v63 = vand.u32 2147483647, %v6251_v13 }
 0x40d   : > { %v2570_v43 = vsub.s32 32, %v2569_v61  ;;  %v2574_v57 = vsub.s32 4294967266, %v2569_v61  ;;  %v2614_v19 = vsel %vm2613_vm0, %v2612_v44, 0  ;;  %v2571_v49 = vshll.u32 %v6285_v26, %v2569_v61 }
 0x40e   : > { %v1621_v6 = vsel %vm1619_vm3, %v1620_v9, %v6301_v12  ;;  %vm1553_vm4 = vcmp.lt.s32.totalorder %v1552_v53, 2  ;;  %v2587_v52 = vsel %vm6319_vm2, 0, %v2585_v48  ;;  %v2616_v58 = vand.u32 31, %v2614_v19 }
 0x40f   : > { %v2572_v14 = vshrl.u32 %v2554_v59, %v2570_v43  ;;  %v2575_v24 = vadd.s32 127, %v2574_v57  ;;  %v1622_v40 = vadd.s32 %v1621_v6, %v1617_v23  ;;  %vm1557_vm6 = vcmp.eq.s32.totalorder %v1552_v53, 2 }
 0x410   : > { %v4600_v21 = vpop.eup %4599  ;;  %v2609_v33 = vand.u32 8388607, %v2602_v63  ;;  %v2617_v2 = vsub.s32 32, %v2616_v58  ;;  %vm1554_vm5 = vcmp.eq.s32.totalorder %v1552_v53, 0  ;;  %v6334_v54 = vadd.s32 3, %v2587_v52 }
 0x411   : > { %v4602_v60 = vpop.eup %4601  ;;  %v1558_v39 = vxor.u32 2147483648, %v4600_v21  ;;  %v2573_v50 = vor.u32 %v2572_v14, %v2571_v49  ;;  %v2576_v27 = vshll.u32 %v2575_v24, 23  ;;  %v1623_v26 = vadd.s32 536870912, %v1622_v40 }
 0x412   : > { %v1555_v17 = vxor.u32 2147483648, %v4602_v60  ;;  %v1669_v51 = vand.u32 2139095040, %v6330_v1  ;;  %v2620_v29 = vshrl.u32 %v4737_v30, %v2617_v2  ;;  %v2623_v0 = vshrl.u32 %v4738_v32, %v2617_v2 }
 0x413   : > { %v1559_v41 = vsel %vm1557_vm6, %v1558_v39, %v4602_v60  ;;  %v2577_v16 = vor.u32 4788187, %v2576_v27  ;;  %v2580_v7 = vcvt.s32.f32 %v2573_v50  ;;  %v1624_v11 = vshrl.u32 %v1623_v26, 30 }
 0x414   : > { %v1556_v38 = vsel %vm1554_vm5, %v4600_v21, %v1555_v17  ;;  %v2610_v25 = vor.u32 8388608, %v2609_v33  ;;  %v2615_v56 = vshrl.u32 %v2614_v19, 5  ;;  %v2619_v46 = vshll.u32 %v4736_v28, %v2616_v58 }
 0x415   : > { %v1560_v5 = vsel %vm1553_vm4, %v1556_v38, %v1559_v41  ;;  %v2578_v20 = vand.u32 2147483647, %v2577_v16  ;;  %v1625_v3 = vshll.u32 %v1624_v11, 30  ;;  %v2622_v22 = vshll.u32 %v4737_v30, %v2616_v58 }
 0x416   : > { %v1561_v47 = vsel %vm1550_vm1, nan, %v1560_v5  ;;  %v2626_v10 = vshrl.u32 %v4739_v34, %v2617_v2  ;;  %v2625_v12 = vshll.u32 %v4738_v32, %v2616_v58  ;;  %v2628_v4 = vshll.u32 %v4739_v34, %v2616_v58 }
 0x417   : > { %4065 = vst [vmem:[%s5293_s20 + $0x38] sm:$0xff] %v1561_v47  ;;  %v2581_v18 = vmul.f32 %v2580_v7, %v2578_v20  ;;  %v6346_v37 = vsub.s32 %v1622_v40, %v1625_v3  ;;  %v2629_v55 = vshrl.u32 %v4740_v36, %v2617_v2  ;;  %v2621_v53 = vor.u32 %v2620_v29, %v2619_v46 }
 0x418   : > { %v2624_v59 = vor.u32 %v2623_v0, %v2622_v22  ;;  %v2632_v61 = vshrl.u32 %v4741_v45, %v2617_v2  ;;  %vm1564_vm7 = vcmp.lt.s32.totalorder %v6202_v15, 0  ;;  %v2627_v43 = vor.u32 %v2626_v10, %v2625_v12 }
 0x419   : > { %v2582_v44 = vxor.u32 2147483648, %v2581_v18  ;;  %v1628_v23 = vsub.s32 0, %v6346_v37  ;;  %v2630_v57 = vor.u32 %v2629_v55, %v2628_v4  ;;  %v2631_v48 = vshll.u32 %v4740_v36, %v2616_v58 }
 0x41a   : > { %vm2634_vm8 = vcmp.lt.s32.totalorder %v2615_v56, 1  ;;  %v2650_v19 = vshll.u32 %v2610_v25, 8  ;;  %v1670_v49 = vshrl.u32 %v1669_v51, 23  ;;  %vm2637_vm9 = vcmp.lt.s32.totalorder %v2615_v56, 4 }
 0x41b   : > { %v2583_v9 = vsel %vm2500_vm14, %v2582_v44, %v2581_v18  ;;  %v4234_v24 = vmin.u32 %v1628_v23, %v6346_v37  ;;  %v2633_v6 = vor.u32 %v2632_v61, %v2631_v48  ;;  %v2618_v21 = vshrl.u32 %v4736_v28, %v2617_v2 }
 0x41c   : > { %v2586_v14 = vsel %vm6319_vm2, %v6106_v42, %v2583_v9  ;;  %v2642_v52 = vsel %vm2634_vm8, %v2621_v53, %v2624_v59  ;;  %v2643_v40 = vsel %vm2637_vm9, %v2630_v57, 920167782  ;;  %vm2636_vm10 = vcmp.lt.s32.totalorder %v2615_v56, 3 }
 0x41d   : > { %4603 = vcosq.f32 %v2586_v14  ;;  %v1630_v58 = vclz %v4234_v24  ;;  %v2639_v60 = vsel %vm2637_vm9, %v2627_v43, 2102212464  ;;  %v1648_v39 = vsub.s32 4, %v1624_v11 }
 0x41e   : > { %4605 = vsinq.f32 %v2586_v14  ;;  %vm2635_vm11 = vcmp.lt.s32.totalorder %v2615_v56, 2  ;;  %v2644_v31 = vsel %vm2636_vm10, %v2627_v43, %v2643_v40  ;;  %v2646_v50 = vsel %vm2634_vm8, %v2624_v59, %v2627_v43 }
 0x41f   : > { %v4235_v27 = vadd.s32 4294967294, %v1630_v58  ;;  %v2638_v17 = vsel %vm2634_vm8, %v2618_v21, %v2621_v53  ;;  %v2645_v26 = vsel %vm2635_vm11, %v2642_v52, %v2644_v31  ;;  %v2647_v33 = vsel %vm2637_vm9, %v2633_v6, 1326507024 }
 0x420   : > { %v2640_v2 = vsel %vm2636_vm10, %v2624_v59, %v2639_v60  ;;  %v2648_v41 = vsel %vm2636_vm10, %v2630_v57, %v2647_v33  ;;  %v6369_v16 = vmul.u32.u64.low %v2650_v19, %v2645_v26  ;;  %v6370_v38 = vmul.u32.u64.high %v2650_v19, %v2645_v26, %v6369_v16 }
 0x421   : > { %vm4236_vm12 = vcmp.lt.s32.totalorder %v4235_v27, 0  ;;  %v2649_v7 = vsel %vm2635_vm11, %v2646_v50, %v2648_v41  ;;  %v1666_v51 = vand.u32 2147483647, %v6330_v1  ;;  %v4237_v5 = vadd.s32 4294967169, %v1670_v49 }
 0x422   : > { %v1633_v20 = vsel %vm4236_vm12, 0, %v4235_v27  ;;  %v1649_v29 = vsel %vm1564_vm7, %v1648_v39, %v1624_v11  ;;  %v6377_v0 = vmul.u32.u64.low %v2650_v19, %v2649_v7  ;;  %v6378_v47 = vmul.u32.u64.high %v2650_v19, %v2649_v7, %v6377_v0  ;;  %v6404_v39 = vpop.f32.mrf.mxu1 }
 0x423   : > { %v1618_v3 = vadd.s32 %v6300_v8, %v6306_v62  ;;  %v1634_v25 = vsub.s32 32, %v1633_v20  ;;  %v1638_v18 = vsub.s32 4294967266, %v1633_v20  ;;  %v2641_v46 = vsel %vm2635_vm11, %v2638_v17, %v2640_v2 }
 0x424   : > { %v2592_v22 = vand.u32 3, %v6334_v54  ;;  %vm6386_vm13 = vcmp.le.f32.partialorder %v1562_v35, 0.7853982  ;;  %v2660_v11 = vadd.s32 1, %v6370_v38  ;;  %v1676_v12 = vadd.s32 1, %v4237_v5 }
 0x425   : > { %v1635_v4 = vshll.u32 %v6346_v37, %v1633_v20  ;;  %v1636_v55 = vshrl.u32 %v1618_v3, %v1634_v25  ;;  %v1639_v44 = vadd.s32 127, %v1638_v18  ;;  %v1651_v8 = vsel %vm6386_vm13, 0, %v1649_v29 }
 0x426   : > { %v2657_v62 = vmul.u32 %v2650_v19, %v2641_v46  ;;  %vm2659_vm14 = vc.u32 %v6378_v47, %v6369_v16  ;;  %v1673_v35 = vand.u32 8388607, %v1666_v51  ;;  %vm1677_vm15 = vcmp.gt.s32.totalorder %v1676_v12, 0 }
 0x427   : > { %v1637_v54 = vor.u32 %v1636_v55, %v1635_v4  ;;  %v1640_v56 = vshll.u32 %v1639_v44, 23  ;;  %v2661_v53 = vsel %vm2659_vm14, %v2660_v11, %v6370_v38  ;;  %v1678_v59 = vsel %vm1677_vm15, %v1676_v12, 0 }
 0x428   : > { %vm2590_vm0 = vweird.f32 %v6106_v42  ;;  %v2662_v37 = vadd.s32 %v2661_v53, %v2657_v62  ;;  %v1680_v61 = vand.u32 31, %v1678_v59  ;;  %vm2593_vm1 = vcmp.lt.s32.totalorder %v2592_v22, 2 }
 0x429   : > { %vm2594_vm2 = vcmp.eq.s32.totalorder %v2592_v22, 0  ;;  %vm2597_vm3 = vcmp.eq.s32.totalorder %v2592_v22, 2  ;;  %v1641_v43 = vor.u32 4788187, %v1640_v56  ;;  %v1655_v9 = vadd.s32 3, %v1651_v8 }
 0x42a   : > { %v4604_v23 = vpop.eup %4603  ;;  %v2663_v19 = vadd.s32 536870912, %v2662_v37  ;;  %v1681_v49 = vsub.s32 32, %v1680_v61  ;;  %v1644_v6 = vcvt.s32.f32 %v1637_v54  ;;  %v1674_v21 = vor.u32 8388608, %v1673_v35 }
 0x42b   : > { %v4606_v57 = vpop.eup %4605  ;;  %v2598_v48 = vxor.u32 2147483648, %v4604_v23  ;;  %v1642_v24 = vand.u32 2147483647, %v1641_v43  ;;  %v1683_v58 = vshll.u32 %v4736_v28, %v1680_v61  ;;  %v1686_v60 = vshll.u32 %v4737_v30, %v1680_v61 }
 0x42c   : > { %v2595_v14 = vxor.u32 2147483648, %v4606_v57  ;;  %v6400_v40 = vshrl.u32 %v2663_v19, 30  ;;  %v1684_v27 = vshrl.u32 %v4737_v30, %v1681_v49  ;;  %v1689_v17 = vshll.u32 %v4738_v32, %v1680_v61 }
 0x42d   : > { %v2599_v52 = vsel %vm2597_vm3, %v2598_v48, %v4606_v57  ;;  %v1645_v50 = vmul.f32 %v1644_v6, %v1642_v24  ;;  %v1687_v2 = vshrl.u32 %v4738_v32, %v1681_v49  ;;  %v1690_v41 = vshrl.u32 %v4739_v34, %v1681_v49 }
 0x42e   : > { %v2596_v31 = vsel %vm2594_vm2, %v4604_v23, %v2595_v14  ;;  %v2665_v33 = vshll.u32 %v6400_v40, 30  ;;  %v1679_v5 = vshrl.u32 %v1678_v59, 5  ;;  %v2709_v20 = vand.u32 2139095040, %v6404_v39 }
 0x42f   : > { %v2600_v26 = vsel %vm2593_vm1, %v2596_v31, %v2599_v52  ;;  %v1646_v7 = vxor.u32 2147483648, %v1645_v50  ;;  %v1682_v0 = vshrl.u32 %v4736_v28, %v1681_v49  ;;  %v1692_v3 = vshll.u32 %v4739_v34, %v1680_v61 }
 0x430   : > { %v2601_v38 = vsel %vm2590_vm0, nan, %v2600_v26  ;;  %v6417_v29 = vsub.s32 %v2662_v37, %v2665_v33  ;;  %v1693_v25 = vshrl.u32 %v4740_v36, %v1681_v49  ;;  %v1685_v46 = vor.u32 %v1684_v27, %v1683_v58 }
 0x431   : > { %4075 = vst [vmem:[%s5293_s20 + $0x88] sm:$0xff] %v2601_v38  ;;  %v1647_v18 = vsel %vm1564_vm7, %v1646_v7, %v1645_v50  ;;  %v1695_v42 = vshll.u32 %v4740_v36, %v1680_v61  ;;  %v1696_v22 = vshrl.u32 %v4741_v45, %v1681_v49  ;;  %v1688_v4 = vor.u32 %v1687_v2, %v1686_v60 }
 0x432   : > { %v1650_v11 = vsel %vm6386_vm13, %v6202_v15, %v1647_v18  ;;  %v2668_v12 = vsub.s32 0, %v6417_v29  ;;  %v1691_v55 = vor.u32 %v1690_v41, %v1689_v17  ;;  %v1694_v44 = vor.u32 %v1693_v25, %v1692_v3 }
 0x433   : > { %4607 = vcosq.f32 %v1650_v11  ;;  %v1697_v8 = vor.u32 %v1696_v22, %v1695_v42  ;;  %vm1698_vm4 = vcmp.lt.s32.totalorder %v1679_v5, 1  ;;  %v6430_v62 = vand.u32 3, %v1655_v9 }
 0x434   : > { %4609 = vsinq.f32 %v1650_v11  ;;  %v4274_v35 = vmin.u32 %v2668_v12, %v6417_v29  ;;  %vm1700_vm6 = vcmp.lt.s32.totalorder %v1679_v5, 3  ;;  %vm1701_vm5 = vcmp.lt.s32.totalorder %v1679_v5, 4 }
 0x435   : > { %v1714_v54 = vshll.u32 %v1674_v21, 8  ;;  %v2710_v56 = vshrl.u32 %v2709_v20, 23  ;;  %vm1699_vm7 = vcmp.lt.s32.totalorder %v1679_v5, 2  ;;  %v1706_v10 = vsel %vm1698_vm4, %v1685_v46, %v1688_v4 }
 0x436   : > { %v2670_v53 = vclz %v4274_v35  ;;  %v1710_v59 = vsel %vm1698_vm4, %v1688_v4, %v1691_v55  ;;  %v1702_v37 = vsel %vm1698_vm4, %v1682_v0, %v1685_v46  ;;  %v1703_v61 = vsel %vm1701_vm5, %v1691_v55, 2102212464 }
 0x437   : > { %v1707_v23 = vsel %vm1701_vm5, %v1694_v44, 920167782  ;;  %v1711_v43 = vsel %vm1701_vm5, %v1697_v8, 1326507024  ;;  %v1704_v48 = vsel %vm1700_vm6, %v1688_v4, %v1703_v61  ;;  %v2706_v24 = vand.u32 2147483647, %v6404_v39 }
 0x438   : > { %v4275_v57 = vadd.s32 4294967294, %v2670_v53  ;;  %v1708_v19 = vsel %vm1700_vm6, %v1691_v55, %v1707_v23  ;;  %v1712_v49 = vsel %vm1700_vm6, %v1694_v44, %v1711_v43  ;;  %v4277_v6 = vadd.s32 4294967169, %v2710_v56 }
 0x439   : > { %v1709_v9 = vsel %vm1699_vm7, %v1706_v10, %v1708_v19  ;;  %v1713_v14 = vsel %vm1699_vm7, %v1710_v59, %v1712_v49  ;;  %v1705_v21 = vsel %vm1699_vm7, %v1702_v37, %v1704_v48  ;;  %v2658_v17 = vadd.s32 %v6369_v16, %v6378_v47  ;;  %v6458_v47 = vpop.f32.mrf.mxu1 }
 0x43a   : > { %vm4276_vm8 = vcmp.lt.s32.totalorder %v4275_v57, 0  ;;  %v6437_v52 = vmul.u32.u64.low %v1714_v54, %v1713_v14  ;;  %v6438_v58 = vmul.u32.u64.high %v1714_v54, %v1713_v14, %v6437_v52  ;;  %v2716_v27 = vadd.s32 1, %v4277_v6 }
 0x43b   : > { %v2673_v60 = vsel %vm4276_vm8, 0, %v4275_v57  ;;  %v6440_v31 = vmul.u32.u64.low %v1714_v54, %v1709_v9  ;;  %v6441_v50 = vmul.u32.u64.high %v1714_v54, %v1709_v9, %v6440_v31  ;;  %v2688_v2 = vsub.s32 4, %v6400_v40 }
 0x43c   : > { %v2674_v26 = vsub.s32 32, %v2673_v60  ;;  %v2678_v33 = vsub.s32 4294967266, %v2673_v60  ;;  %vm1654_vm9 = vweird.f32 %v6202_v15  ;;  %vm6450_vm10 = vcmp.le.f32.partialorder %v2602_v63, 0.7853982 }
 0x43d   : > { %vm2604_vm11 = vcmp.lt.s32.totalorder %v6251_v13, 0  ;;  %v1721_v38 = vmul.u32 %v1714_v54, %v1705_v21  ;;  %vm2717_vm12 = vcmp.gt.s32.totalorder %v2716_v27, 0  ;;  %v2675_v7 = vshll.u32 %v6417_v29, %v2673_v60 }
 0x43e   : > { %v2676_v5 = vshrl.u32 %v2658_v17, %v2674_v26  ;;  %v2679_v16 = vadd.s32 127, %v2678_v33  ;;  %vm1723_vm13 = vc.u32 %v6438_v58, %v6440_v31  ;;  %vm1657_vm14 = vcmp.lt.s32.totalorder %v6430_v62, 2 }
 0x43f   : > { %v1724_v63 = vadd.s32 1, %v6441_v50  ;;  %v2713_v20 = vand.u32 8388607, %v2706_v24  ;;  %v2718_v0 = vsel %vm2717_vm12, %v2716_v27, 0  ;;  %v2689_v29 = vsel %vm2604_vm11, %v2688_v2, %v6400_v40 }
 0x440   : > { %v4608_v3 = vpop.eup %4607  ;;  %v2677_v25 = vor.u32 %v2676_v5, %v2675_v7  ;;  %v2680_v18 = vshll.u32 %v2679_v16, 23  ;;  %v2720_v46 = vand.u32 31, %v2718_v0  ;;  %vm1658_vm15 = vcmp.eq.s32.totalorder %v6430_v62, 0 }
 0x441   : > { %v4610_v42 = vpop.eup %4609  ;;  %v1662_v22 = vxor.u32 2147483648, %v4608_v3  ;;  %v1725_v11 = vsel %vm1723_vm13, %v1724_v63, %v6441_v50  ;;  %v2813_v12 = vand.u32 2139095040, %v6458_v47  ;;  %vm1661_vm0 = vcmp.eq.s32.totalorder %v6430_v62, 2 }
 0x442   : > { %v1659_v4 = vxor.u32 2147483648, %v4610_v42  ;;  %v2681_v55 = vor.u32 4788187, %v2680_v18  ;;  %v1726_v44 = vadd.s32 %v1725_v11, %v1721_v38  ;;  %v2691_v35 = vsel %vm6450_vm10, 0, %v2689_v29 }
 0x443   : > { %v1663_v8 = vsel %vm1661_vm0, %v1662_v22, %v4610_v42  ;;  %v2714_v40 = vor.u32 8388608, %v2713_v20  ;;  %v2721_v54 = vsub.s32 32, %v2720_v46  ;;  %v2684_v10 = vcvt.s32.f32 %v2677_v25 }
 0x444   : > { %v1660_v56 = vsel %vm1658_vm15, %v4608_v3, %v1659_v4  ;;  %v2682_v53 = vand.u32 2147483647, %v2681_v55  ;;  %v1727_v59 = vadd.s32 536870912, %v1726_v44  ;;  %v2814_v43 = vshrl.u32 %v2813_v12, 23 }
 0x445   : > { %v1664_v37 = vsel %vm1657_vm14, %v1660_v56, %v1663_v8  ;;  %v2724_v61 = vshrl.u32 %v4737_v30, %v2721_v54  ;;  %v2727_v23 = vshrl.u32 %v4738_v32, %v2721_v54  ;;  %v2730_v49 = vshrl.u32 %v4739_v34, %v2721_v54 }
 0x446   : > { %v1665_v57 = vsel %vm1654_vm9, nan, %v1664_v37  ;;  %v2685_v48 = vmul.f32 %v2684_v10, %v2682_v53  ;;  %v6479_v19 = vshrl.u32 %v1727_v59, 30  ;;  %v2719_v9 = vshrl.u32 %v2718_v0, 5 }
 0x447   : > { %4066 = vst [vmem:[%s5293_s20 + $0x40] sm:$0xff] %v1665_v57  ;;  %v2723_v14 = vshll.u32 %v4736_v28, %v2720_v46  ;;  %v2726_v62 = vshll.u32 %v4737_v30, %v2720_v46  ;;  %v2733_v6 = vshrl.u32 %v4740_v36, %v2721_v54  ;;  %v2729_v60 = vshll.u32 %v4738_v32, %v2720_v46 }
 0x448   : > { %v2686_v21 = vxor.u32 2147483648, %v2685_v48  ;;  %v1729_v52 = vshll.u32 %v6479_v19, 30  ;;  %v2732_v15 = vshll.u32 %v4739_v34, %v2720_v46  ;;  %v2735_v17 = vshll.u32 %v4740_v36, %v2720_v46 }
 0x449   : > { %v2725_v50 = vor.u32 %v2724_v61, %v2723_v14  ;;  %v2728_v27 = vor.u32 %v2727_v23, %v2726_v62  ;;  %v2736_v26 = vshrl.u32 %v4741_v45, %v2721_v54  ;;  %v2731_v38 = vor.u32 %v2730_v49, %v2729_v60 }
 0x44a   : > { %v2687_v33 = vsel %vm2604_vm11, %v2686_v21, %v2685_v48  ;;  %v6493_v2 = vsub.s32 %v1726_v44, %v1729_v52  ;;  %v2734_v7 = vor.u32 %v2733_v6, %v2732_v15  ;;  %v2695_v16 = vadd.s32 3, %v2691_v35 }
 0x44b   : > { %v2690_v5 = vsel %vm6450_vm10, %v6251_v13, %v2687_v33  ;;  %v2737_v63 = vor.u32 %v2736_v26, %v2735_v17  ;;  %v2754_v0 = vshll.u32 %v2714_v40, 8  ;;  %v4281_v3 = vadd.s32 4294967169, %v2814_v43 }
 0x44c   : > { %4611 = vcosq.f32 %v2690_v5  ;;  %v1732_v20 = vsub.s32 0, %v6493_v2  ;;  %vm2738_vm1 = vcmp.lt.s32.totalorder %v2719_v9, 1  ;;  %vm2740_vm2 = vcmp.lt.s32.totalorder %v2719_v9, 3 }
 0x44d   : > { %4613 = vsinq.f32 %v2690_v5  ;;  %vm2741_vm3 = vcmp.lt.s32.totalorder %v2719_v9, 4  ;;  %v2746_v29 = vsel %vm2738_vm1, %v2725_v50, %v2728_v27  ;;  %v2722_v42 = vshrl.u32 %v4736_v28, %v2721_v54 }
 0x44e   : > { %v4238_v25 = vmin.u32 %v1732_v20, %v6493_v2  ;;  %v2743_v18 = vsel %vm2741_vm3, %v2731_v38, 2102212464  ;;  %v2747_v46 = vsel %vm2741_vm3, %v2734_v7, 920167782  ;;  %v2750_v22 = vsel %vm2738_vm1, %v2728_v27, %v2731_v38 }
 0x44f   : > { %v2748_v41 = vsel %vm2740_vm2, %v2731_v38, %v2747_v46  ;;  %v2751_v11 = vsel %vm2741_vm3, %v2737_v63, 1326507024  ;;  %v1752_v4 = vsub.s32 4, %v6479_v19  ;;  %vm2739_vm4 = vcmp.lt.s32.totalorder %v2719_v9, 2 }
 0x450   : > { %v1734_v12 = vclz %v4238_v25  ;;  %v2810_v55 = vand.u32 2147483647, %v6458_v47  ;;  %v2742_v44 = vsel %vm2738_vm1, %v2722_v42, %v2725_v50  ;;  %v2744_v8 = vsel %vm2740_vm2, %v2728_v27, %v2743_v18  ;;  %v6537_v25 = vpop.f32.mrf.mxu1 }
 0x451   : > { %v2749_v35 = vsel %vm2739_vm4, %v2746_v29, %v2748_v41  ;;  %v2752_v40 = vsel %vm2740_vm2, %v2734_v7, %v2751_v11  ;;  %v2820_v61 = vadd.s32 1, %v4281_v3  ;;  %v2696_v23 = vand.u32 3, %v2695_v16 }
 0x452   : > { %v4239_v56 = vadd.s32 4294967294, %v1734_v12  ;;  %v2753_v53 = vsel %vm2739_vm4, %v2750_v22, %v2752_v40  ;;  %v6506_v10 = vmul.u32.u64.low %v2754_v0, %v2749_v35  ;;  %v6507_v54 = vmul.u32.u64.high %v2754_v0, %v2749_v35, %v6506_v10 }
 0x453   : > { %v6510_v59 = vmul.u32.u64.low %v2754_v0, %v2753_v53  ;;  %v6511_v37 = vmul.u32.u64.high %v2754_v0, %v2753_v53, %v6510_v59  ;;  %vm1668_vm6 = vcmp.lt.s32.totalorder %v6330_v1, 0  ;;  %v2745_v43 = vsel %vm2739_vm4, %v2742_v44, %v2744_v8 }
 0x454   : > { %vm4240_vm5 = vcmp.lt.s32.totalorder %v4239_v56, 0  ;;  %v1722_v57 = vadd.s32 %v6440_v31, %v6438_v58  ;;  %v2817_v49 = vand.u32 8388607, %v2810_v55  ;;  %vm2821_vm7 = vcmp.gt.s32.totalorder %v2820_v61, 0 }
 0x455   : > { %v1737_v48 = vsel %vm4240_vm5, 0, %v4239_v56  ;;  %vm2694_vm8 = vweird.f32 %v6251_v13  ;;  %v1753_v62 = vsel %vm1668_vm6, %v1752_v4, %v6479_v19  ;;  %v2764_v6 = vadd.s32 1, %v6507_v54 }
 0x456   : > { %v1738_v9 = vsub.s32 32, %v1737_v48  ;;  %v1742_v14 = vsub.s32 4294967266, %v1737_v48  ;;  %vm6525_vm9 = vcmp.le.f32.partialorder %v1666_v51, 0.7853982  ;;  %v2761_v58 = vmul.u32 %v2754_v0, %v2745_v43 }
 0x457   : > { %vm2763_vm10 = vc.u32 %v6511_v37, %v6506_v10  ;;  %v2822_v31 = vsel %vm2821_vm7, %v2820_v61, 0  ;;  %v1739_v52 = vshll.u32 %v6493_v2, %v1737_v48  ;;  %v1755_v27 = vsel %vm6525_vm9, 0, %v1753_v62 }
 0x458   : > { %v1740_v60 = vshrl.u32 %v1722_v57, %v1738_v9  ;;  %v1743_v15 = vadd.s32 127, %v1742_v14  ;;  %v2765_v50 = vsel %vm2763_vm10, %v2764_v6, %v6507_v54  ;;  %v2818_v51 = vor.u32 8388608, %v2817_v49 }
 0x459   : > { %v4612_v19 = vpop.eup %4611  ;;  %v2766_v17 = vadd.s32 %v2765_v50, %v2761_v58  ;;  %v2824_v26 = vand.u32 31, %v2822_v31  ;;  %vm2697_vm11 = vcmp.lt.s32.totalorder %v2696_v23, 2  ;;  %vm2701_vm12 = vcmp.eq.s32.totalorder %v2696_v23, 2 }
 0x45a   : > { %v4614_v33 = vpop.eup %4613  ;;  %v2702_v38 = vxor.u32 2147483648, %v4612_v19  ;;  %v1741_v7 = vor.u32 %v1740_v60, %v1739_v52  ;;  %v1744_v5 = vshll.u32 %v1743_v15, 23  ;;  %vm2698_vm13 = vcmp.eq.s32.totalorder %v2696_v23, 0 }
 0x45b   : > { %v2699_v16 = vxor.u32 2147483648, %v4614_v33  ;;  %v2767_v63 = vadd.s32 536870912, %v2766_v17  ;;  %v2825_v2 = vsub.s32 32, %v2824_v26  ;;  %v6535_v3 = vadd.s32 3, %v1755_v27 }
 0x45c   : > { %v2703_v20 = vsel %vm2701_vm12, %v2702_v38, %v4614_v33  ;;  %v1745_v0 = vor.u32 4788187, %v1744_v5  ;;  %v1748_v29 = vcvt.s32.f32 %v1741_v7  ;;  %v6539_v42 = vshll.u32 %v2818_v51, 8 }
 0x45d   : > { %v2700_v18 = vsel %vm2698_vm13, %v4612_v19, %v2699_v16  ;;  %v2768_v46 = vshrl.u32 %v2767_v63, 30  ;;  %v2828_v11 = vshrl.u32 %v4737_v30, %v2825_v2  ;;  %v2831_v12 = vshrl.u32 %v4738_v32, %v2825_v2 }
 0x45e   : > { %v2704_v41 = vsel %vm2697_vm11, %v2700_v18, %v2703_v20  ;;  %v1746_v22 = vand.u32 2147483647, %v1745_v0  ;;  %v2823_v8 = vshrl.u32 %v2822_v31, 5  ;;  %v2917_v35 = vand.u32 2139095040, %v6537_v25 }
 0x45f   : > { %v2705_v4 = vsel %vm2694_vm8, nan, %v2704_v41  ;;  %v2769_v44 = vshll.u32 %v2768_v46, 30  ;;  %v2827_v56 = vshll.u32 %v4736_v28, %v2824_v26  ;;  %v2830_v53 = vshll.u32 %v4737_v30, %v2824_v26 }
 0x460   : > { %4076 = vst [vmem:[%s5293_s20 + $0x90] sm:$0xff] %v2705_v4  ;;  %v1749_v40 = vmul.f32 %v1748_v29, %v1746_v22  ;;  %v2834_v54 = vshrl.u32 %v4739_v34, %v2825_v2  ;;  %v2833_v61 = vshll.u32 %v4738_v32, %v2824_v26  ;;  %v2836_v23 = vshll.u32 %v4739_v34, %v2824_v26 }
 0x461   : > { %v6551_v59 = vsub.s32 %v2766_v17, %v2769_v44  ;;  %v2837_v13 = vshrl.u32 %v4740_v36, %v2825_v2  ;;  %v2829_v57 = vor.u32 %v2828_v11, %v2827_v56  ;;  %v2832_v48 = vor.u32 %v2831_v12, %v2830_v53 }
 0x462   : > { %v1750_v43 = vxor.u32 2147483648, %v1749_v40  ;;  %v2840_v49 = vshrl.u32 %v4741_v45, %v2825_v2  ;;  %vm2708_vm14 = vcmp.lt.s32.totalorder %v6404_v39, 0  ;;  %v2835_v14 = vor.u32 %v2834_v54, %v2833_v61  ;;  %v6600_v61 = vpop.f32.mrf.mxu1 }
 0x463   : > { %v2772_v9 = vsub.s32 0, %v6551_v59  ;;  %v2838_v62 = vor.u32 %v2837_v13, %v2836_v23  ;;  %v2839_v6 = vshll.u32 %v4740_v36, %v2824_v26  ;;  %vm2842_vm15 = vcmp.lt.s32.totalorder %v2823_v8, 1 }
 0x464   : > { %v1751_v58 = vsel %vm1668_vm6, %v1750_v43, %v1749_v40  ;;  %v2914_v31 = vand.u32 2147483647, %v6537_v25  ;;  %v2918_v52 = vshrl.u32 %v2917_v35, 23  ;;  %vm2845_vm0 = vcmp.lt.s32.totalorder %v2823_v8, 4 }
 0x465   : > { %v1754_v60 = vsel %vm6525_vm9, %v6330_v1, %v1751_v58  ;;  %v4278_v15 = vmin.u32 %v2772_v9, %v6551_v59  ;;  %v2841_v50 = vor.u32 %v2840_v49, %v2839_v6  ;;  %v2826_v19 = vshrl.u32 %v4736_v28, %v2825_v2 }
 0x466   : > { %4615 = vcosq.f32 %v1754_v60  ;;  %v2850_v27 = vsel %vm2842_vm15, %v2829_v57, %v2832_v48  ;;  %v2851_v17 = vsel %vm2845_vm0, %v2838_v62, 920167782  ;;  %vm2844_vm1 = vcmp.lt.s32.totalorder %v2823_v8, 3 }
 0x467   : > { %4617 = vsinq.f32 %v1754_v60  ;;  %v2774_v51 = vclz %v4278_v15  ;;  %v2847_v26 = vsel %vm2845_vm0, %v2835_v14, 2102212464  ;;  %v2792_v33 = vsub.s32 4, %v2768_v46 }
 0x468   : > { %vm2843_vm2 = vcmp.lt.s32.totalorder %v2823_v8, 2  ;;  %v2852_v21 = vsel %vm2844_vm1, %v2835_v14, %v2851_v17  ;;  %v2854_v38 = vsel %vm2842_vm15, %v2832_v48, %v2835_v14  ;;  %v2846_v5 = vsel %vm2842_vm15, %v2826_v19, %v2829_v57 }
 0x469   : > { %v4279_v7 = vadd.s32 4294967294, %v2774_v51  ;;  %v2853_v16 = vsel %vm2843_vm2, %v2850_v27, %v2852_v21  ;;  %v2855_v63 = vsel %vm2845_vm0, %v2841_v50, 1326507024  ;;  %v2848_v2 = vsel %vm2844_vm1, %v2832_v48, %v2847_v26 }
 0x46a   : > { %v2856_v20 = vsel %vm2844_vm1, %v2838_v62, %v2855_v63  ;;  %v6576_v0 = vmul.u32.u64.low %v6539_v42, %v2853_v16  ;;  %v6577_v18 = vmul.u32.u64.high %v6539_v42, %v2853_v16, %v6576_v0  ;;  %v2762_v29 = vadd.s32 %v6506_v10, %v6511_v37 }
 0x46b   : > { %vm4280_vm3 = vcmp.lt.s32.totalorder %v4279_v7, 0  ;;  %v2857_v41 = vsel %vm2843_vm2, %v2854_v38, %v2856_v20  ;;  %v4285_v22 = vadd.s32 4294967169, %v2918_v52  ;;  %v2793_v12 = vsel %vm2708_vm14, %v2792_v33, %v2768_v46 }
 0x46c   : > { %v2777_v11 = vsel %vm4280_vm3, 0, %v4279_v7  ;;  %v6586_v4 = vmul.u32.u64.low %v6539_v42, %v2857_v41  ;;  %v6587_v44 = vmul.u32.u64.high %v6539_v42, %v2857_v41, %v6586_v4  ;;  %v2849_v56 = vsel %vm2843_vm2, %v2846_v5, %v2848_v2 }
 0x46d   : > { %v2778_v35 = vsub.s32 32, %v2777_v11  ;;  %v2782_v40 = vsub.s32 4294967266, %v2777_v11  ;;  %v2924_v53 = vadd.s32 1, %v4285_v22  ;;  %v1760_v54 = vand.u32 3, %v6535_v3 }
 0x46e   : > { %vm6593_vm4 = vcmp.le.f32.partialorder %v2706_v24, 0.7853982  ;;  %v2868_v37 = vadd.s32 1, %v6577_v18  ;;  %v2921_v46 = vand.u32 8388607, %v2914_v31  ;;  %v2779_v23 = vshll.u32 %v6551_v59, %v2777_v11 }
 0x46f   : > { %v2780_v8 = vshrl.u32 %v2762_v29, %v2778_v35  ;;  %v2783_v13 = vadd.s32 127, %v2782_v40  ;;  %vm2925_vm6 = vcmp.gt.s32.totalorder %v2924_v53, 0  ;;  %v2795_v3 = vsel %vm6593_vm4, 0, %v2793_v12 }
 0x470   : > { %v2865_v24 = vmul.u32 %v6539_v42, %v2849_v56  ;;  %vm2867_vm5 = vc.u32 %v6587_v44, %v6576_v0  ;;  %v2926_v43 = vsel %vm2925_vm6, %v2924_v53, 0  ;;  %v3021_v9 = vand.u32 2139095040, %v6600_v61 }
 0x471   : > { %v2781_v57 = vor.u32 %v2780_v8, %v2779_v23  ;;  %v2784_v48 = vshll.u32 %v2783_v13, 23  ;;  %v2869_v49 = vsel %vm2867_vm5, %v2868_v37, %v6577_v18  ;;  %vm1758_vm7 = vweird.f32 %v6330_v1 }
 0x472   : > { %vm1761_vm8 = vcmp.lt.s32.totalorder %v1760_v54, 2  ;;  %v2870_v59 = vadd.s32 %v2869_v49, %v2865_v24  ;;  %v2928_v14 = vand.u32 31, %v2926_v43  ;;  %vm1762_vm9 = vcmp.eq.s32.totalorder %v1760_v54, 0 }
 0x473   : > { %v4616_v62 = vpop.eup %4615  ;;  %vm1765_vm10 = vcmp.eq.s32.totalorder %v1760_v54, 2  ;;  %v2785_v6 = vor.u32 4788187, %v2784_v48  ;;  %v6611_v42 = vadd.s32 3, %v2795_v3  ;;  %v2922_v15 = vor.u32 8388608, %v2921_v46 }
 0x474   : > { %v4618_v58 = vpop.eup %4617  ;;  %v1766_v52 = vxor.u32 2147483648, %v4616_v62  ;;  %v2871_v60 = vadd.s32 536870912, %v2870_v59  ;;  %v2929_v50 = vsub.s32 32, %v2928_v14  ;;  %v2788_v17 = vcvt.s32.f32 %v2781_v57 }
 0x475   : > { %v1763_v19 = vxor.u32 2147483648, %v4618_v58  ;;  %v2786_v27 = vand.u32 2147483647, %v2785_v6  ;;  %v3022_v51 = vshrl.u32 %v3021_v9, 23  ;;  %v2931_v21 = vshll.u32 %v4736_v28, %v2928_v14 }
 0x476   : > { %v1767_v26 = vsel %vm1765_vm10, %v1766_v52, %v4618_v58  ;;  %v6613_v33 = vshrl.u32 %v2871_v60, 30  ;;  %v2932_v38 = vshrl.u32 %v4737_v30, %v2929_v50  ;;  %v2935_v16 = vshrl.u32 %v4738_v32, %v2929_v50 }
 0x477   : > { %v1764_v7 = vsel %vm1762_vm9, %v4616_v62, %v1763_v19  ;;  %v2789_v5 = vmul.f32 %v2788_v17, %v2786_v27  ;;  %v2938_v63 = vshrl.u32 %v4739_v34, %v2929_v50  ;;  %v2927_v18 = vshrl.u32 %v2926_v43, 5 }
 0x478   : > { %v1768_v2 = vsel %vm1761_vm8, %v1764_v7, %v1767_v26  ;;  %v2873_v20 = vshll.u32 %v6613_v33, 30  ;;  %v2934_v29 = vshll.u32 %v4737_v30, %v2928_v14  ;;  %v2933_v11 = vor.u32 %v2932_v38, %v2931_v21 }
 0x479   : > { %v1769_v41 = vsel %vm1758_vm7, nan, %v1768_v2  ;;  %v2790_v22 = vxor.u32 2147483648, %v2789_v5  ;;  %v2937_v12 = vshll.u32 %v4738_v32, %v2928_v14  ;;  %v2940_v40 = vshll.u32 %v4739_v34, %v2928_v14 }
 0x47a   : > { %4067 = vst [vmem:[%s5293_s20 + $0x48] sm:$0xff] %v1769_v41  ;;  %v6627_v4 = vsub.s32 %v2870_v59, %v2873_v20  ;;  %v2936_v35 = vor.u32 %v2935_v16, %v2934_v29  ;;  %v2941_v56 = vshrl.u32 %v4740_v36, %v2929_v50  ;;  %v2943_v37 = vshll.u32 %v4740_v36, %v2928_v14 }
 0x47b   : > { %v2791_v53 = vsel %vm2708_vm14, %v2790_v22, %v2789_v5  ;;  %v2939_v54 = vor.u32 %v2938_v63, %v2937_v12  ;;  %v2944_v1 = vshrl.u32 %v4741_v45, %v2929_v50  ;;  %v2962_v13 = vshll.u32 %v2922_v15, 8 }
 0x47c   : > { %v2794_v46 = vsel %vm6593_vm4, %v6404_v39, %v2791_v53  ;;  %v2876_v23 = vsub.s32 0, %v6627_v4  ;;  %v2942_v8 = vor.u32 %v2941_v56, %v2940_v40  ;;  %vm2946_vm11 = vcmp.lt.s32.totalorder %v2927_v18, 1 }
 0x47d   : > { %4619 = vcosq.f32 %v2794_v46  ;;  %v2945_v3 = vor.u32 %v2944_v1, %v2943_v37  ;;  %v4289_v24 = vadd.s32 4294967169, %v3022_v51  ;;  %vm2812_vm12 = vcmp.lt.s32.totalorder %v6458_v47, 0 }
 0x47e   : > { %4621 = vsinq.f32 %v2794_v46  ;;  %v4282_v43 = vmin.u32 %v2876_v23, %v6627_v4  ;;  %v2930_v57 = vshrl.u32 %v4736_v28, %v2929_v50  ;;  %vm2949_vm13 = vcmp.lt.s32.totalorder %v2927_v18, 4 }
 0x47f   : > { %vm2947_vm14 = vcmp.lt.s32.totalorder %v2927_v18, 2  ;;  %v2951_v48 = vsel %vm2949_vm13, %v2939_v54, 2102212464  ;;  %v2954_v10 = vsel %vm2946_vm11, %v2933_v11, %v2936_v35  ;;  %v2955_v49 = vsel %vm2949_vm13, %v2942_v8, 920167782 }
 0x480   : > { %v2878_v9 = vclz %v4282_v43  ;;  %vm2948_vm15 = vcmp.lt.s32.totalorder %v2927_v18, 3  ;;  %v2950_v59 = vsel %vm2946_vm11, %v2930_v57, %v2933_v11  ;;  %v2958_v14 = vsel %vm2946_vm11, %v2936_v35, %v2939_v54 }
 0x481   : > { %v2952_v62 = vsel %vm2948_vm15, %v2936_v35, %v2951_v48  ;;  %v2956_v6 = vsel %vm2948_vm15, %v2939_v54, %v2955_v49  ;;  %v2959_v58 = vsel %vm2949_vm13, %v2945_v3, 1326507024  ;;  %v3028_v52 = vadd.s32 1, %v4289_v24 }
 0x482   : > { %v4283_v60 = vadd.s32 4294967294, %v2878_v9  ;;  %v2896_v15 = vsub.s32 4, %v6613_v33  ;;  %v2957_v19 = vsel %vm2947_vm14, %v2954_v10, %v2956_v6  ;;  %v2960_v27 = vsel %vm2948_vm15, %v2942_v8, %v2959_v58 }
 0x483   : > { %v2953_v50 = vsel %vm2947_vm14, %v2950_v59, %v2952_v62  ;;  %v2961_v17 = vsel %vm2947_vm14, %v2958_v14, %v2960_v27  ;;  %v6646_v51 = vmul.u32.u64.low %v2962_v13, %v2957_v19  ;;  %v6647_v26 = vmul.u32.u64.high %v2962_v13, %v2957_v19, %v6646_v51 }
 0x484   : > { %vm4284_vm0 = vcmp.lt.s32.totalorder %v4283_v60, 0  ;;  %v6650_v21 = vmul.u32.u64.low %v2962_v13, %v2961_v17  ;;  %v6651_v38 = vmul.u32.u64.high %v2962_v13, %v2961_v17, %v6650_v21  ;;  %vm3029_vm1 = vcmp.gt.s32.totalorder %v3028_v52, 0 }
 0x485   : > { %v2800_v7 = vand.u32 3, %v6611_v42  ;;  %vm6656_vm2 = vcmp.le.f32.partialorder %v2810_v55, 0.7853982  ;;  %v2881_v16 = vsel %vm4284_vm0, 0, %v4283_v60  ;;  %v3030_v63 = vsel %vm3029_vm1, %v3028_v52, 0 }
 0x486   : > { %v2866_v2 = vadd.s32 %v6576_v0, %v6587_v44  ;;  %v2882_v20 = vsub.s32 32, %v2881_v16  ;;  %v2886_v18 = vsub.s32 4294967266, %v2881_v16  ;;  %v3018_v29 = vand.u32 2147483647, %v6600_v61 }
 0x487   : > { %vm2798_vm3 = vweird.f32 %v6404_v39  ;;  %v2897_v42 = vsel %vm2812_vm12, %v2896_v15, %v6613_v33  ;;  %v2969_v41 = vmul.u32 %v2962_v13, %v2953_v50  ;;  %v2972_v55 = vadd.s32 1, %v6647_v26 }
 0x488   : > { %v3032_v22 = vand.u32 31, %v3030_v63  ;;  %v2883_v11 = vshll.u32 %v6627_v4, %v2881_v16  ;;  %v2884_v12 = vshrl.u32 %v2866_v2, %v2882_v20  ;;  %v2887_v35 = vadd.s32 127, %v2886_v18 }
 0x489   : > { %vm2971_vm4 = vc.u32 %v6651_v38, %v6646_v51  ;;  %vm2801_vm6 = vcmp.lt.s32.totalorder %v2800_v7, 2  ;;  %vm2802_vm5 = vcmp.eq.s32.totalorder %v2800_v7, 0  ;;  %vm2805_vm7 = vcmp.eq.s32.totalorder %v2800_v7, 2 }
 0x48a   : > { %v2973_v0 = vsel %vm2971_vm4, %v2972_v55, %v6647_v26  ;;  %v3033_v44 = vsub.s32 32, %v3032_v22  ;;  %v4620_v40 = vpop.eup %4619  ;;  %v2885_v56 = vor.u32 %v2884_v12, %v2883_v11  ;;  %v2888_v33 = vshll.u32 %v2887_v35, 23 }
 0x48b   : > { %v2974_v53 = vadd.s32 %v2973_v0, %v2969_v41  ;;  %v4622_v54 = vpop.eup %4621  ;;  %v2806_v37 = vxor.u32 2147483648, %v4620_v40  ;;  %v2899_v4 = vsel %vm6656_vm2, 0, %v2897_v42  ;;  %v3025_v1 = vand.u32 8388607, %v3018_v29 }
 0x48c   : > { %v6676_v46 = vshrl.u32 %v3030_v63, 5  ;;  %v2803_v23 = vxor.u32 2147483648, %v4622_v54  ;;  %v2889_v8 = vor.u32 4788187, %v2888_v33  ;;  %v3035_v3 = vshll.u32 %v4736_v28, %v3032_v22 }
 0x48d   : > { %v2975_v13 = vadd.s32 536870912, %v2974_v53  ;;  %v2807_v24 = vsel %vm2805_vm7, %v2806_v37, %v4622_v54  ;;  %v2892_v43 = vcvt.s32.f32 %v2885_v56  ;;  %v3036_v57 = vshrl.u32 %v4737_v30, %v3033_v44 }
 0x48e   : > { %v3039_v48 = vshrl.u32 %v4738_v32, %v3033_v44  ;;  %v2804_v10 = vsel %vm2802_vm5, %v4620_v40, %v2803_v23  ;;  %v2890_v49 = vand.u32 2147483647, %v2889_v8  ;;  %v3042_v59 = vshrl.u32 %v4739_v34, %v3033_v44 }
 0x48f   : > { %v2976_v9 = vshrl.u32 %v2975_v13, 30  ;;  %v2808_v14 = vsel %vm2801_vm6, %v2804_v10, %v2807_v24  ;;  %v3038_v62 = vshll.u32 %v4737_v30, %v3032_v22  ;;  %v3044_v6 = vshll.u32 %v4739_v34, %v3032_v22 }
 0x490   : > { %v3045_v58 = vshrl.u32 %v4740_v36, %v3033_v44  ;;  %v2809_v52 = vsel %vm2798_vm3, nan, %v2808_v14  ;;  %v2893_v60 = vmul.f32 %v2892_v43, %v2890_v49  ;;  %v3041_v19 = vshll.u32 %v4738_v32, %v3032_v22 }
 0x491   : > { %v2977_v15 = vshll.u32 %v2976_v9, 30  ;;  %4077 = vst [vmem:[%s5293_s20 + $0x98] sm:$0xff] %v2809_v52  ;;  %v3037_v27 = vor.u32 %v3036_v57, %v3035_v3  ;;  %v3047_v17 = vshll.u32 %v4740_v36, %v3032_v22  ;;  %v3048_v26 = vshrl.u32 %v4741_v45, %v3033_v44 }
 0x492   : > { %v3046_v50 = vor.u32 %v3045_v58, %v3044_v6  ;;  %v2894_v21 = vxor.u32 2147483648, %v2893_v60  ;;  %v3040_v16 = vor.u32 %v3039_v48, %v3038_v62  ;;  %v3043_v63 = vor.u32 %v3042_v59, %v3041_v19 }
 0x493   : > { %v6693_v7 = vsub.s32 %v2974_v53, %v2977_v15  ;;  %v2903_v2 = vadd.s32 3, %v2899_v4  ;;  %v3026_v20 = vor.u32 8388608, %v3025_v1  ;;  %v3049_v39 = vor.u32 %v3048_v26, %v3047_v17  ;;  %v6713_v53 = vpop.f32.mrf.mxu1 }
 0x494   : > { %v2895_v18 = vsel %vm2812_vm12, %v2894_v21, %v2893_v60  ;;  %v3034_v41 = vshrl.u32 %v4736_v28, %v3033_v44  ;;  %vm3053_vm8 = vcmp.lt.s32.totalorder %v6676_v46, 4  ;;  %vm3050_vm9 = vcmp.lt.s32.totalorder %v6676_v46, 1 }
 0x495   : > { %v2980_v42 = vsub.s32 0, %v6693_v7  ;;  %v2898_v55 = vsel %vm6656_vm2, %v6458_v47, %v2895_v18  ;;  %vm3052_vm10 = vcmp.lt.s32.totalorder %v6676_v46, 3  ;;  %v3059_v22 = vsel %vm3053_vm8, %v3046_v50, 920167782  ;;  %v6752_v26 = vpop.f32.mrf.mxu1 }
 0x496   : > { %4623 = vcosq.f32 %v2898_v55  ;;  %v3055_v12 = vsel %vm3053_vm8, %v3043_v63, 2102212464  ;;  %v3058_v35 = vsel %vm3050_vm9, %v3037_v27, %v3040_v16  ;;  %v3060_v0 = vsel %vm3052_vm10, %v3043_v63, %v3059_v22 }
 0x497   : > { %v4286_v11 = vmin.u32 %v2980_v42, %v6693_v7  ;;  %4625 = vsinq.f32 %v2898_v55  ;;  %v3062_v5 = vsel %vm3050_vm9, %v3040_v16, %v3043_v63  ;;  %v3063_v44 = vsel %vm3053_vm8, %v3049_v39, 1326507024 }
 0x498   : > { %v3000_v56 = vsub.s32 4, %v2976_v9  ;;  %vm3051_vm11 = vcmp.lt.s32.totalorder %v6676_v46, 2  ;;  %v3066_v33 = vshll.u32 %v3026_v20, 8  ;;  %v3054_v54 = vsel %vm3050_vm9, %v3034_v41, %v3037_v27 }
 0x499   : > { %v2982_v40 = vclz %v4286_v11  ;;  %v3056_v37 = vsel %vm3052_vm10, %v3040_v16, %v3055_v12  ;;  %v3061_v4 = vsel %vm3051_vm11, %v3058_v35, %v3060_v0  ;;  %v3064_v1 = vsel %vm3052_vm10, %v3046_v50, %v3063_v44 }
 0x49a   : > { %v3065_v8 = vsel %vm3051_vm11, %v3062_v5, %v3064_v1  ;;  %v6725_v13 = vmul.u32.u64.low %v3066_v33, %v3061_v4  ;;  %v6726_v3 = vmul.u32.u64.high %v3066_v33, %v3061_v4, %v6725_v13  ;;  %vm2916_vm12 = vcmp.lt.s32.totalorder %v6537_v25, 0 }
 0x49b   : > { %v4287_v23 = vadd.s32 4294967294, %v2982_v40  ;;  %v6729_v24 = vmul.u32.u64.low %v3066_v33, %v3065_v8  ;;  %v6730_v43 = vmul.u32.u64.high %v3066_v33, %v3065_v8, %v6729_v24  ;;  %v3125_v57 = vand.u32 2139095040, %v6713_v53 }
 0x49c   : > { %vm6735_vm13 = vcmp.le.f32.partialorder %v2914_v31, 0.7853982  ;;  %v3001_v10 = vsel %vm2916_vm12, %v3000_v56, %v2976_v9  ;;  %v3057_v49 = vsel %vm3051_vm11, %v3054_v54, %v3056_v37  ;;  %v2904_v59 = vand.u32 3, %v2903_v2 }
 0x49d   : > { %vm4288_vm14 = vcmp.lt.s32.totalorder %v4287_v23, 0  ;;  %v3122_v62 = vand.u32 2147483647, %v6713_v53  ;;  %v3126_v6 = vshrl.u32 %v3125_v57, 23  ;;  %v2970_v58 = vadd.s32 %v6646_v51, %v6651_v38 }
 0x49e   : > { %v2985_v14 = vsel %vm4288_vm14, 0, %v4287_v23  ;;  %v3076_v60 = vadd.s32 1, %v6726_v3  ;;  %v3003_v15 = vsel %vm6735_vm13, 0, %v3001_v10  ;;  %v3073_v19 = vmul.u32 %v3066_v33, %v3057_v49 }
 0x49f   : > { %v2986_v52 = vsub.s32 32, %v2985_v14  ;;  %v2990_v31 = vsub.s32 4294967266, %v2985_v14  ;;  %vm3075_vm15 = vc.u32 %v6730_v43, %v6725_v13  ;;  %v4293_v46 = vadd.s32 4294967169, %v3126_v6 }
 0x4a0   : > { %v2987_v9 = vshll.u32 %v6693_v7, %v2985_v14  ;;  %v3077_v17 = vsel %vm3075_vm15, %v3076_v60, %v6726_v3  ;;  %vm2902_vm0 = vweird.f32 %v6458_v47  ;;  %vm2905_vm1 = vcmp.lt.s32.totalorder %v2904_v59, 2 }
 0x4a1   : > { %v2988_v27 = vshrl.u32 %v2970_v58, %v2986_v52  ;;  %v2991_v50 = vadd.s32 127, %v2990_v31  ;;  %v3078_v51 = vadd.s32 %v3077_v17, %v3073_v19  ;;  %v3132_v38 = vadd.s32 1, %v4293_v46 }
 0x4a2   : > { %v3007_v63 = vadd.s32 3, %v3003_v15  ;;  %vm2906_vm2 = vcmp.eq.s32.totalorder %v2904_v59, 0  ;;  %v3229_v7 = vand.u32 2139095040, %v6752_v26  ;;  %v3129_v41 = vand.u32 8388607, %v3122_v62 }
 0x4a3   : > { %v2989_v21 = vor.u32 %v2988_v27, %v2987_v9  ;;  %v2992_v16 = vshll.u32 %v2991_v50, 23  ;;  %v4624_v2 = vpop.eup %4623  ;;  %v3079_v20 = vadd.s32 536870912, %v3078_v51  ;;  %vm3133_vm3 = vcmp.gt.s32.totalorder %v3132_v38, 0 }
 0x4a4   : > { %v4626_v39 = vpop.eup %4625  ;;  %v2910_v18 = vxor.u32 2147483648, %v4624_v2  ;;  %v3134_v55 = vsel %vm3133_vm3, %v3132_v38, 0  ;;  %vm2909_vm4 = vcmp.eq.s32.totalorder %v2904_v59, 2  ;;  %v6760_v44 = vand.u32 3, %v3007_v63 }
 0x4a5   : > { %v2993_v42 = vor.u32 4788187, %v2992_v16  ;;  %v2907_v22 = vxor.u32 2147483648, %v4626_v39  ;;  %v6758_v11 = vshrl.u32 %v3079_v20, 30  ;;  %v3136_v12 = vand.u32 31, %v3134_v55 }
 0x4a6   : > { %v2911_v35 = vsel %vm2909_vm4, %v2910_v18, %v4626_v39  ;;  %v2996_v5 = vcvt.s32.f32 %v2989_v21  ;;  %v3230_v54 = vshrl.u32 %v3229_v7, 23  ;;  %v3130_v1 = vor.u32 8388608, %v3129_v41 }
 0x4a7   : > { %v2994_v0 = vand.u32 2147483647, %v2993_v42  ;;  %v2908_v40 = vsel %vm2906_vm2, %v4624_v2, %v2907_v22  ;;  %v3081_v56 = vshll.u32 %v6758_v11, 30  ;;  %v3137_v33 = vsub.s32 32, %v3136_v12 }
 0x4a8   : > { %v2912_v37 = vsel %vm2905_vm1, %v2908_v40, %v2911_v35  ;;  %v3226_v23 = vand.u32 2147483647, %v6752_v26  ;;  %v3074_v3 = vadd.s32 %v6725_v13, %v6730_v43  ;;  %v3139_v57 = vshll.u32 %v4736_v28, %v3136_v12 }
 0x4a9   : > { %v2997_v4 = vmul.f32 %v2996_v5, %v2994_v0  ;;  %v2913_v8 = vsel %vm2902_vm0, nan, %v2912_v37  ;;  %v6769_v24 = vsub.s32 %v3078_v51, %v3081_v56  ;;  %v3140_v49 = vshrl.u32 %v4737_v30, %v3137_v33 }
 0x4aa   : > { %4078 = vst [vmem:[%s5293_s20 + $0xa0] sm:$0xff] %v2913_v8  ;;  %v3142_v59 = vshll.u32 %v4737_v30, %v3136_v12  ;;  %v3143_v14 = vshrl.u32 %v4738_v32, %v3137_v33  ;;  %v3145_v58 = vshll.u32 %v4738_v32, %v3136_v12  ;;  %v3146_v47 = vshrl.u32 %v4739_v34, %v3137_v33 }
 0x4ab   : > { %v2998_v10 = vxor.u32 2147483648, %v2997_v4  ;;  %v3084_v6 = vsub.s32 0, %v6769_v24  ;;  %v4297_v52 = vadd.s32 4294967169, %v3230_v54  ;;  %v3135_v43 = vshrl.u32 %v3134_v55, 5 }
 0x4ac   : > { %v3141_v31 = vor.u32 %v3140_v49, %v3139_v57  ;;  %v3144_v60 = vor.u32 %v3143_v14, %v3142_v59  ;;  %v3147_v46 = vor.u32 %v3146_v47, %v3145_v58  ;;  %v3148_v9 = vshll.u32 %v4739_v34, %v3136_v12 }
 0x4ad   : > { %v2999_v13 = vsel %vm2916_vm12, %v2998_v10, %v2997_v4  ;;  %v4290_v19 = vmin.u32 %v3084_v6, %v6769_v24  ;;  %v3149_v27 = vshrl.u32 %v4740_v36, %v3137_v33  ;;  %v3151_v50 = vshll.u32 %v4740_v36, %v3136_v12 }
 0x4ae   : > { %v3002_v15 = vsel %vm6735_vm13, %v6537_v25, %v2999_v13  ;;  %v3152_v17 = vshrl.u32 %v4741_v45, %v3137_v33  ;;  %v6789_v38 = vshll.u32 %v3130_v1, 8  ;;  %v6793_v48 = vand.u32 8388607, %v3226_v23 }
 0x4af   : > { %4627 = vcosq.f32 %v3002_v15  ;;  %v3086_v51 = vclz %v4290_v19  ;;  %v3104_v21 = vsub.s32 4, %v6758_v11  ;;  %v3150_v16 = vor.u32 %v3149_v27, %v3148_v9 }
 0x4b0   : > { %4629 = vsinq.f32 %v3002_v15  ;;  %v3153_v63 = vor.u32 %v3152_v17, %v3151_v50  ;;  %v3236_v2 = vadd.s32 1, %v4297_v52  ;;  %v3138_v7 = vshrl.u32 %v4736_v28, %v3137_v33 }
 0x4b1   : > { %v4291_v20 = vadd.s32 4294967294, %v3086_v51  ;;  %vm3154_vm6 = vcmp.lt.s32.totalorder %v3135_v43, 1  ;;  %vm3157_vm5 = vcmp.lt.s32.totalorder %v3135_v43, 4  ;;  %vm3156_vm7 = vcmp.lt.s32.totalorder %v3135_v43, 3 }
 0x4b2   : > { %v3159_v39 = vsel %vm3157_vm5, %v3147_v46, 2102212464  ;;  %v3162_v18 = vsel %vm3154_vm6, %v3141_v31, %v3144_v60  ;;  %v3163_v42 = vsel %vm3157_vm5, %v3150_v16, 920167782  ;;  %vm6799_vm8 = vcmp.le.f32.partialorder %v3018_v29, 0.7853982 }
 0x4b3   : > { %vm4292_vm9 = vcmp.lt.s32.totalorder %v4291_v20, 0  ;;  %vm3155_vm10 = vcmp.lt.s32.totalorder %v3135_v43, 2  ;;  %v3164_v55 = vsel %vm3156_vm7, %v3147_v46, %v3163_v42  ;;  %v3166_v22 = vsel %vm3154_vm6, %v3144_v60, %v3147_v46 }
 0x4b4   : > { %v3089_v12 = vsel %vm4292_vm9, 0, %v4291_v20  ;;  %v3158_v35 = vsel %vm3154_vm6, %v3138_v7, %v3141_v31  ;;  %v3165_v0 = vsel %vm3155_vm10, %v3162_v18, %v3164_v55  ;;  %v3167_v5 = vsel %vm3157_vm5, %v3153_v63, 1326507024 }
 0x4b5   : > { %v3090_v40 = vsub.s32 32, %v3089_v12  ;;  %v3094_v56 = vsub.s32 4294967266, %v3089_v12  ;;  %v3160_v33 = vsel %vm3156_vm7, %v3144_v60, %v3159_v39  ;;  %v3168_v54 = vsel %vm3156_vm7, %v3150_v16, %v3167_v5  ;;  %v6832_v60 = vpop.f32.mrf.mxu1 }
 0x4b6   : > { %v3091_v29 = vshll.u32 %v6769_v24, %v3089_v12  ;;  %v3169_v37 = vsel %vm3155_vm10, %v3166_v22, %v3168_v54  ;;  %v6810_v4 = vmul.u32.u64.low %v6789_v38, %v3165_v0  ;;  %v6811_v1 = vmul.u32.u64.high %v6789_v38, %v3165_v0, %v6810_v4 }
 0x4b7   : > { %v3092_v8 = vshrl.u32 %v3074_v3, %v3090_v40  ;;  %v3095_v57 = vadd.s32 127, %v3094_v56  ;;  %v6815_v10 = vmul.u32.u64.low %v6789_v38, %v3169_v37  ;;  %v6816_v49 = vmul.u32.u64.high %v6789_v38, %v3169_v37, %v6815_v10 }
 0x4b8   : > { %vm3006_vm11 = vweird.f32 %v6537_v25  ;;  %vm3009_vm12 = vcmp.lt.s32.totalorder %v6760_v44, 2  ;;  %vm3020_vm13 = vcmp.lt.s32.totalorder %v6600_v61, 0  ;;  %v3161_v24 = vsel %vm3155_vm10, %v3158_v35, %v3160_v33 }
 0x4b9   : > { %vm3237_vm14 = vcmp.gt.s32.totalorder %v3236_v2, 0  ;;  %v3093_v59 = vor.u32 %v3092_v8, %v3091_v29  ;;  %v3096_v14 = vshll.u32 %v3095_v57, 23  ;;  %v3105_v3 = vsel %vm3020_vm13, %v3104_v21, %v6758_v11 }
 0x4ba   : > { %v3238_v6 = vsel %vm3237_vm14, %v3236_v2, 0  ;;  %vm3010_vm15 = vcmp.eq.s32.totalorder %v6760_v44, 0  ;;  %vm3013_vm0 = vcmp.eq.s32.totalorder %v6760_v44, 2  ;;  %v3180_v58 = vadd.s32 1, %v6811_v1 }
 0x4bb   : > { %v3240_v47 = vand.u32 31, %v3238_v6  ;;  %v3097_v13 = vor.u32 4788187, %v3096_v14  ;;  %v3177_v43 = vmul.u32 %v6789_v38, %v3161_v24  ;;  %vm3179_vm1 = vc.u32 %v6816_v49, %v6810_v4 }
 0x4bc   : > { %v4628_v52 = vpop.eup %4627  ;;  %v3234_v31 = vor.u32 8388608, %v6793_v48  ;;  %v3107_v19 = vsel %vm6799_vm8, 0, %v3105_v3  ;;  %v3181_v46 = vsel %vm3179_vm1, %v3180_v58, %v6811_v1  ;;  %v3100_v17 = vcvt.s32.f32 %v3093_v59 }
 0x4bd   : > { %v4630_v11 = vpop.eup %4629  ;;  %v3014_v15 = vxor.u32 2147483648, %v4628_v52  ;;  %v3241_v9 = vsub.s32 32, %v3240_v47  ;;  %v3098_v50 = vand.u32 2147483647, %v3097_v13  ;;  %v3182_v51 = vadd.s32 %v3181_v46, %v3177_v43 }
 0x4be   : > { %v3011_v27 = vxor.u32 2147483648, %v4630_v11  ;;  %v6839_v21 = vshrl.u32 %v3238_v6, 5  ;;  %v3333_v16 = vand.u32 2139095040, %v6832_v60  ;;  %v3243_v18 = vshll.u32 %v4736_v28, %v3240_v47 }
 0x4bf   : > { %v3015_v38 = vsel %vm3013_vm0, %v3014_v15, %v4630_v11  ;;  %v3244_v48 = vshrl.u32 %v4737_v30, %v3241_v9  ;;  %v3101_v2 = vmul.f32 %v3100_v17, %v3098_v50  ;;  %v3183_v20 = vadd.s32 536870912, %v3182_v51 }
 0x4c0   : > { %v3012_v63 = vsel %vm3010_vm15, %v4628_v52, %v3011_v27  ;;  %v3247_v7 = vshrl.u32 %v4738_v32, %v3241_v9  ;;  %v3246_v42 = vshll.u32 %v4737_v30, %v3240_v47  ;;  %v3249_v55 = vshll.u32 %v4738_v32, %v3240_v47 }
 0x4c1   : > { %v3016_v39 = vsel %vm3009_vm12, %v3012_v63, %v3015_v38  ;;  %v3102_v12 = vxor.u32 2147483648, %v3101_v2  ;;  %v6853_v35 = vshrl.u32 %v3183_v20, 30  ;;  %v3250_v0 = vshrl.u32 %v4739_v34, %v3241_v9 }
 0x4c2   : > { %v3017_v22 = vsel %vm3006_vm11, nan, %v3016_v39  ;;  %v3252_v5 = vshll.u32 %v4739_v34, %v3240_v47  ;;  %v3253_v44 = vshrl.u32 %v4740_v36, %v3241_v9  ;;  %v3255_v40 = vshll.u32 %v4740_v36, %v3240_v47 }
 0x4c3   : > { %4079 = vst [vmem:[%s5293_s20 + $0xa8] sm:$0xff] %v3017_v22  ;;  %v3256_v56 = vshrl.u32 %v4741_v45, %v3241_v9  ;;  %v3103_v33 = vsel %vm3020_vm13, %v3102_v12, %v3101_v2  ;;  %v3185_v25 = vshll.u32 %v6853_v35, 30  ;;  %v3245_v54 = vor.u32 %v3244_v48, %v3243_v18 }
 0x4c4   : > { %v3248_v29 = vor.u32 %v3247_v7, %v3246_v42  ;;  %v3106_v37 = vsel %vm6799_vm8, %v6600_v61, %v3103_v33  ;;  %v3254_v1 = vor.u32 %v3253_v44, %v3252_v5  ;;  %v3251_v10 = vor.u32 %v3250_v0, %v3249_v55 }
 0x4c5   : > { %v3257_v8 = vor.u32 %v3256_v56, %v3255_v40  ;;  %4631 = vcosq.f32 %v3106_v37  ;;  %v6867_v57 = vsub.s32 %v3182_v51, %v3185_v25  ;;  %v6869_v24 = vshll.u32 %v3234_v31, 8 }
 0x4c6   : > { %4633 = vsinq.f32 %v3106_v37  ;;  %v3111_v59 = vadd.s32 3, %v3107_v19  ;;  %vm3258_vm2 = vcmp.lt.s32.totalorder %v6839_v21, 1  ;;  %v3334_v14 = vshrl.u32 %v3333_v16, 23 }
 0x4c7   : > { %v3188_v3 = vsub.s32 0, %v6867_v57  ;;  %v3242_v6 = vshrl.u32 %v4736_v28, %v3241_v9  ;;  %vm3261_vm3 = vcmp.lt.s32.totalorder %v6839_v21, 4  ;;  %v3266_v41 = vsel %vm3258_vm2, %v3245_v54, %v3248_v29 }
 0x4c8   : > { %vm3259_vm4 = vcmp.lt.s32.totalorder %v6839_v21, 2  ;;  %vm3260_vm6 = vcmp.lt.s32.totalorder %v6839_v21, 3  ;;  %v3267_v58 = vsel %vm3261_vm3, %v3254_v1, 920167782  ;;  %v3271_v47 = vsel %vm3261_vm3, %v3257_v8, 1326507024 }
 0x4c9   : > { %v4294_v52 = vmin.u32 %v3188_v3, %v6867_v57  ;;  %v3263_v13 = vsel %vm3261_vm3, %v3251_v10, 2102212464  ;;  %v3268_v43 = vsel %vm3260_vm6, %v3251_v10, %v3267_v58  ;;  %v3270_v31 = vsel %vm3258_vm2, %v3248_v29, %v3251_v10 }
 0x4ca   : > { %v3112_v11 = vand.u32 3, %v3111_v59  ;;  %v3269_v15 = vsel %vm3259_vm4, %v3266_v41, %v3268_v43  ;;  %v3272_v19 = vsel %vm3260_vm6, %v3254_v1, %v3271_v47  ;;  %v4301_v46 = vadd.s32 4294967169, %v3334_v14 }
 0x4cb   : > { %v3190_v9 = vclz %v4294_v52  ;;  %v3208_v27 = vsub.s32 4, %v6853_v35  ;;  %v3262_v50 = vsel %vm3258_vm2, %v3242_v6, %v3245_v54  ;;  %v3330_v17 = vand.u32 2147483647, %v6832_v60 }
 0x4cc   : > { %v3264_v51 = vsel %vm3260_vm6, %v3248_v29, %v3263_v13  ;;  %v3273_v38 = vsel %vm3259_vm4, %v3270_v31, %v3272_v19  ;;  %v6891_v48 = vmul.u32.u64.low %v6869_v24, %v3269_v15  ;;  %v6892_v16 = vmul.u32.u64.high %v6869_v24, %v3269_v15, %v6891_v48 }
 0x4cd   : > { %v4295_v63 = vadd.s32 4294967294, %v3190_v9  ;;  %v6896_v2 = vmul.u32.u64.low %v6869_v24, %v3273_v38  ;;  %v6897_v20 = vmul.u32.u64.high %v6869_v24, %v3273_v38, %v6896_v2  ;;  %v3340_v7 = vadd.s32 1, %v4301_v46 }
 0x4ce   : > { %vm3113_vm5 = vcmp.lt.s32.totalorder %v3112_v11, 2  ;;  %vm6901_vm7 = vcmp.le.f32.partialorder %v3122_v62, 0.7853982  ;;  %vm3124_vm8 = vcmp.lt.s32.totalorder %v6713_v53, 0  ;;  %vm3110_vm9 = vweird.f32 %v6600_v61 }
 0x4cf   : > { %vm3114_vm10 = vcmp.eq.s32.totalorder %v3112_v11, 0  ;;  %vm4296_vm11 = vcmp.lt.s32.totalorder %v4295_v63, 0  ;;  %v3265_v18 = vsel %vm3259_vm4, %v3262_v50, %v3264_v51  ;;  %vm3341_vm12 = vcmp.gt.s32.totalorder %v3340_v7, 0 }
 0x4d0   : > { %v3193_v42 = vsel %vm4296_vm11, 0, %v4295_v63  ;;  %v3284_v55 = vadd.s32 1, %v6892_v16  ;;  %v3337_v22 = vand.u32 8388607, %v3330_v17  ;;  %v3342_v62 = vsel %vm3341_vm12, %v3340_v7, 0 }
 0x4d1   : > { %v3178_v12 = vadd.s32 %v6810_v4, %v6816_v49  ;;  %v3194_v0 = vsub.s32 32, %v3193_v42  ;;  %v3198_v5 = vsub.s32 4294967266, %v3193_v42  ;;  %v3209_v44 = vsel %vm3124_vm8, %v3208_v27, %v6853_v35  ;;  %v6922_v49 = vpop.f32.mrf.mxu1 }
 0x4d2   : > { %v4632_v40 = vpop.eup %4631  ;;  %v3195_v21 = vshll.u32 %v6867_v57, %v3193_v42  ;;  %v3281_v56 = vmul.u32 %v6869_v24, %v3265_v18  ;;  %vm3283_vm13 = vc.u32 %v6897_v20, %v6891_v48  ;;  %v3344_v33 = vand.u32 31, %v3342_v62 }
 0x4d3   : > { %v4634_v25 = vpop.eup %4633  ;;  %v3118_v54 = vxor.u32 2147483648, %v4632_v40  ;;  %v3196_v29 = vshrl.u32 %v3178_v12, %v3194_v0  ;;  %v3199_v37 = vadd.s32 127, %v3198_v5  ;;  %v3285_v4 = vsel %vm3283_vm13, %v3284_v55, %v6892_v16 }
 0x4d4   : > { %v3115_v1 = vxor.u32 2147483648, %v4634_v25  ;;  %vm3117_vm14 = vcmp.eq.s32.totalorder %v3112_v11, 2  ;;  %v3286_v35 = vadd.s32 %v3285_v4, %v3281_v56  ;;  %v3345_v8 = vsub.s32 32, %v3344_v33 }
 0x4d5   : > { %v3119_v10 = vsel %vm3117_vm14, %v3118_v54, %v4634_v25  ;;  %v3197_v57 = vor.u32 %v3196_v29, %v3195_v21  ;;  %v3200_v24 = vshll.u32 %v3199_v37, 23  ;;  %v3211_v59 = vsel %vm6901_vm7, 0, %v3209_v44 }
 0x4d6   : > { %v3116_v14 = vsel %vm3114_vm10, %v4632_v40, %v3115_v1  ;;  %v3287_v3 = vadd.s32 536870912, %v3286_v35  ;;  %v3338_v6 = vor.u32 8388608, %v3337_v22  ;;  %v3437_v41 = vand.u32 2139095040, %v6922_v49 }
 0x4d7   : > { %v3120_v58 = vsel %vm3113_vm5, %v3116_v14, %v3119_v10  ;;  %v3201_v47 = vor.u32 4788187, %v3200_v24  ;;  %v3343_v52 = vshrl.u32 %v3342_v62, 5  ;;  %v3348_v13 = vshrl.u32 %v4737_v30, %v3345_v8 }
 0x4d8   : > { %v3121_v43 = vsel %vm3110_vm9, nan, %v3120_v58  ;;  %v3288_v31 = vshrl.u32 %v3287_v3, 30  ;;  %v3347_v15 = vshll.u32 %v4736_v28, %v3344_v33  ;;  %v3351_v19 = vshrl.u32 %v4738_v32, %v3345_v8 }
 0x4d9   : > { %4080 = vst [vmem:[%s5293_s20 + $0xb0] sm:$0xff] %v3121_v43  ;;  %v3202_v46 = vand.u32 2147483647, %v3201_v47  ;;  %v3204_v9 = vcvt.s32.f32 %v3197_v57  ;;  %v3350_v27 = vshll.u32 %v4737_v30, %v3344_v33  ;;  %v3354_v11 = vshrl.u32 %v4739_v34, %v3345_v8 }
 0x4da   : > { %v3289_v50 = vshll.u32 %v3288_v31, 30  ;;  %v3353_v51 = vshll.u32 %v4738_v32, %v3344_v33  ;;  %v3356_v38 = vshll.u32 %v4739_v34, %v3344_v33  ;;  %v3357_v61 = vshrl.u32 %v4740_v36, %v3345_v8 }
 0x4db   : > { %v3205_v16 = vmul.f32 %v3204_v9, %v3202_v46  ;;  %v3349_v63 = vor.u32 %v3348_v13, %v3347_v15  ;;  %v3360_v2 = vshrl.u32 %v4741_v45, %v3345_v8  ;;  %vm3228_vm15 = vcmp.lt.s32.totalorder %v6752_v26, 0 }
 0x4dc   : > { %v6942_v7 = vsub.s32 %v3286_v35, %v3289_v50  ;;  %v3352_v18 = vor.u32 %v3351_v19, %v3350_v27  ;;  %v3355_v42 = vor.u32 %v3354_v11, %v3353_v51  ;;  %v3358_v55 = vor.u32 %v3357_v61, %v3356_v38 }
 0x4dd   : > { %v3206_v22 = vxor.u32 2147483648, %v3205_v16  ;;  %v3215_v62 = vadd.s32 3, %v3211_v59  ;;  %v3359_v12 = vshll.u32 %v4740_v36, %v3344_v33  ;;  %v3378_v0 = vshll.u32 %v3338_v6, 8 }
 0x4de   : > { %v3292_v5 = vsub.s32 0, %v6942_v7  ;;  %vm3362_vm0 = vcmp.lt.s32.totalorder %v3343_v52, 1  ;;  %vm3365_vm1 = vcmp.lt.s32.totalorder %v3343_v52, 4  ;;  %v3438_v44 = vshrl.u32 %v3437_v41, 23 }
 0x4df   : > { %v3207_v40 = vsel %vm3124_vm8, %v3206_v22, %v3205_v16  ;;  %v3361_v21 = vor.u32 %v3360_v2, %v3359_v12  ;;  %vm3364_vm2 = vcmp.lt.s32.totalorder %v3343_v52, 3  ;;  %v3371_v56 = vsel %vm3365_vm1, %v3358_v55, 920167782 }
 0x4e0   : > { %v3210_v25 = vsel %vm6901_vm7, %v6713_v53, %v3207_v40  ;;  %v4298_v54 = vmin.u32 %v3292_v5, %v6942_v7  ;;  %v3367_v33 = vsel %vm3365_vm1, %v3355_v42, 2102212464  ;;  %v3370_v29 = vsel %vm3362_vm0, %v3349_v63, %v3352_v18 }
 0x4e1   : > { %4635 = vcosq.f32 %v3210_v25  ;;  %v3312_v37 = vsub.s32 4, %v3288_v31  ;;  %v3346_v4 = vshrl.u32 %v4736_v28, %v3345_v8  ;;  %v3372_v1 = vsel %vm3364_vm2, %v3355_v42, %v3371_v56 }
 0x4e2   : > { %4637 = vsinq.f32 %v3210_v25  ;;  %v3294_v35 = vclz %v4298_v54  ;;  %vm3363_vm3 = vcmp.lt.s32.totalorder %v3343_v52, 2  ;;  %v3374_v10 = vsel %vm3362_vm0, %v3352_v18, %v3355_v42 }
 0x4e3   : > { %v3366_v39 = vsel %vm3362_vm0, %v3346_v4, %v3349_v63  ;;  %v3368_v57 = vsel %vm3364_vm2, %v3352_v18, %v3367_v33  ;;  %v3373_v24 = vsel %vm3363_vm3, %v3370_v29, %v3372_v1  ;;  %v3375_v59 = vsel %vm3365_vm1, %v3361_v21, 1326507024 }
 0x4e4   : > { %v4299_v14 = vadd.s32 4294967294, %v3294_v35  ;;  %v3376_v3 = vsel %vm3364_vm2, %v3358_v55, %v3375_v59  ;;  %v6962_v6 = vmul.u32.u64.low %v3378_v0, %v3373_v24  ;;  %v6963_v41 = vmul.u32.u64.high %v3378_v0, %v3373_v24, %v6962_v6 }
 0x4e5   : > { %v3313_v8 = vsel %vm3228_vm15, %v3312_v37, %v3288_v31  ;;  %v3377_v58 = vsel %vm3363_vm3, %v3374_v10, %v3376_v3  ;;  %v3434_v47 = vand.u32 2147483647, %v6922_v49  ;;  %v4305_v13 = vadd.s32 4294967169, %v3438_v44 }
 0x4e6   : > { %vm4300_vm4 = vcmp.lt.s32.totalorder %v4299_v14, 0  ;;  %v3369_v43 = vsel %vm3363_vm3, %v3366_v39, %v3368_v57  ;;  %v6969_v15 = vmul.u32.u64.low %v3378_v0, %v3377_v58  ;;  %v6970_v19 = vmul.u32.u64.high %v3378_v0, %v3377_v58, %v6969_v15 }
 0x4e7   : > { %vm6974_vm6 = vcmp.le.f32.partialorder %v3226_v23, 0.7853982  ;;  %v3282_v46 = vadd.s32 %v6891_v48, %v6897_v20  ;;  %v3297_v9 = vsel %vm4300_vm4, 0, %v4299_v14  ;;  %v3444_v31 = vadd.s32 1, %v4305_v13  ;;  %v6988_v48 = vpop.f32.mrf.mxu1 }
 0x4e8   : > { %v3298_v27 = vsub.s32 32, %v3297_v9  ;;  %v3302_v11 = vsub.s32 4294967266, %v3297_v9  ;;  %v3315_v50 = vsel %vm6974_vm6, 0, %v3313_v8  ;;  %v3388_v51 = vadd.s32 1, %v6963_v41 }
 0x4e9   : > { %v3216_v38 = vand.u32 3, %v3215_v62  ;;  %v3385_v61 = vmul.u32 %v3378_v0, %v3369_v43  ;;  %v3441_v23 = vand.u32 8388607, %v3434_v47  ;;  %vm3445_vm5 = vcmp.gt.s32.totalorder %v3444_v31, 0 }
 0x4ea   : > { %v3299_v16 = vshll.u32 %v6942_v7, %v3297_v9  ;;  %v3300_v63 = vshrl.u32 %v3282_v46, %v3298_v27  ;;  %v3303_v2 = vadd.s32 127, %v3302_v11  ;;  %vm3387_vm7 = vc.u32 %v6970_v19, %v6962_v6 }
 0x4eb   : > { %v3319_v20 = vadd.s32 3, %v3315_v50  ;;  %v3389_v18 = vsel %vm3387_vm7, %v3388_v51, %v6963_v41  ;;  %v3446_v42 = vsel %vm3445_vm5, %v3444_v31, 0  ;;  %vm3214_vm8 = vweird.f32 %v6713_v53 }
 0x4ec   : > { %v3301_v55 = vor.u32 %v3300_v63, %v3299_v16  ;;  %v3304_v22 = vshll.u32 %v3303_v2, 23  ;;  %v3390_v62 = vadd.s32 %v3389_v18, %v3385_v61  ;;  %vm3217_vm9 = vcmp.lt.s32.totalorder %v3216_v38, 2 }
 0x4ed   : > { %v3442_v12 = vor.u32 8388608, %v3441_v23  ;;  %v3448_v0 = vand.u32 31, %v3446_v42  ;;  %v3541_v7 = vand.u32 2139095040, %v6988_v48  ;;  %vm3218_vm10 = vcmp.eq.s32.totalorder %v3216_v38, 0 }
 0x4ee   : > { %v4636_v5 = vpop.eup %4635  ;;  %vm3221_vm11 = vcmp.eq.s32.totalorder %v3216_v38, 2  ;;  %v3305_v44 = vor.u32 4788187, %v3304_v22  ;;  %v3391_v40 = vadd.s32 536870912, %v3390_v62  ;;  %v6993_v25 = vand.u32 3, %v3319_v20 }
 0x4ef   : > { %v4638_v21 = vpop.eup %4637  ;;  %v3222_v56 = vxor.u32 2147483648, %v4636_v5  ;;  %v3449_v54 = vsub.s32 32, %v3448_v0  ;;  %v3538_v33 = vand.u32 2147483647, %v6988_v48  ;;  %v3308_v4 = vcvt.s32.f32 %v3301_v55 }
 0x4f0   : > { %v3219_v29 = vxor.u32 2147483648, %v4638_v21  ;;  %v3306_v37 = vand.u32 2147483647, %v3305_v44  ;;  %v6996_v1 = vshrl.u32 %v3391_v40, 30  ;;  %v6999_v39 = vshll.u32 %v3442_v12, 8 }
 0x4f1   : > { %v3223_v35 = vsel %vm3221_vm11, %v3222_v56, %v4638_v21  ;;  %v3452_v10 = vshrl.u32 %v4737_v30, %v3449_v54  ;;  %v3542_v57 = vshrl.u32 %v3541_v7, 23  ;;  %v3455_v3 = vshrl.u32 %v4738_v32, %v3449_v54 }
 0x4f2   : > { %v3220_v24 = vsel %vm3218_vm10, %v4636_v5, %v3219_v29  ;;  %v3309_v59 = vmul.f32 %v3308_v4, %v3306_v37  ;;  %v3393_v14 = vshll.u32 %v6996_v1, 30  ;;  %v3451_v8 = vshll.u32 %v4736_v28, %v3448_v0 }
 0x4f3   : > { %v3224_v41 = vsel %vm3217_vm9, %v3220_v24, %v3223_v35  ;;  %v3454_v58 = vshll.u32 %v4737_v30, %v3448_v0  ;;  %v3458_v13 = vshrl.u32 %v4739_v34, %v3449_v54  ;;  %v3457_v9 = vshll.u32 %v4738_v32, %v3448_v0 }
 0x4f4   : > { %v3225_v43 = vsel %vm3214_vm8, nan, %v3224_v41  ;;  %v3310_v15 = vxor.u32 2147483648, %v3309_v59  ;;  %v7010_v46 = vsub.s32 %v3390_v62, %v3393_v14  ;;  %v3447_v31 = vshrl.u32 %v3446_v42, 5 }
 0x4f5   : > { %4081 = vst [vmem:[%s5293_s20 + $0xb8] sm:$0xff] %v3225_v43  ;;  %v3453_v27 = vor.u32 %v3452_v10, %v3451_v8  ;;  %v3460_v11 = vshll.u32 %v4739_v34, %v3448_v0  ;;  %v3461_v50 = vshrl.u32 %v4740_v36, %v3449_v54  ;;  %v3456_v61 = vor.u32 %v3455_v3, %v3454_v58 }
 0x4f6   : > { %v3311_v51 = vsel %vm3228_vm15, %v3310_v15, %v3309_v59  ;;  %v3396_v38 = vsub.s32 0, %v7010_v46  ;;  %v3459_v53 = vor.u32 %v3458_v13, %v3457_v9  ;;  %v3463_v63 = vshll.u32 %v4740_v36, %v3448_v0 }
 0x4f7   : > { %v3314_v23 = vsel %vm6974_vm6, %v6752_v26, %v3311_v51  ;;  %v3462_v16 = vor.u32 %v3461_v50, %v3460_v11  ;;  %v3464_v2 = vshrl.u32 %v4741_v45, %v3449_v54  ;;  %v4309_v18 = vadd.s32 4294967169, %v3542_v57 }
 0x4f8   : > { %4639 = vcosq.f32 %v3314_v23  ;;  %v4302_v20 = vmin.u32 %v3396_v38, %v7010_v46  ;;  %v3545_v42 = vand.u32 8388607, %v3538_v33  ;;  %v3450_v55 = vshrl.u32 %v4736_v28, %v3449_v54 }
 0x4f9   : > { %4641 = vsinq.f32 %v3314_v23  ;;  %v3465_v22 = vor.u32 %v3464_v2, %v3463_v63  ;;  %vm3466_vm12 = vcmp.lt.s32.totalorder %v3447_v31, 1  ;;  %vm3467_vm13 = vcmp.lt.s32.totalorder %v3447_v31, 2 }
 0x4fa   : > { %v3398_v62 = vclz %v4302_v20  ;;  %vm3468_vm14 = vcmp.lt.s32.totalorder %v3447_v31, 3  ;;  %vm3469_vm15 = vcmp.lt.s32.totalorder %v3447_v31, 4  ;;  %v3474_v12 = vsel %vm3466_vm12, %v3453_v27, %v3456_v61 }
 0x4fb   : > { %v3471_v52 = vsel %vm3469_vm15, %v3459_v53, 2102212464  ;;  %v3475_v0 = vsel %vm3469_vm15, %v3462_v16, 920167782  ;;  %v3478_v7 = vsel %vm3466_vm12, %v3456_v61, %v3459_v53  ;;  %v3470_v44 = vsel %vm3466_vm12, %v3450_v55, %v3453_v27 }
 0x4fc   : > { %v4303_v5 = vadd.s32 4294967294, %v3398_v62  ;;  %v3476_v40 = vsel %vm3468_vm14, %v3459_v53, %v3475_v0  ;;  %v3479_v21 = vsel %vm3469_vm15, %v3465_v22, 1326507024  ;;  %v3472_v56 = vsel %vm3468_vm14, %v3456_v61, %v3471_v52 }
 0x4fd   : > { %v3477_v29 = vsel %vm3467_vm13, %v3474_v12, %v3476_v40  ;;  %v3480_v37 = vsel %vm3468_vm14, %v3462_v16, %v3479_v21  ;;  %v3548_v4 = vadd.s32 1, %v4309_v18  ;;  %v3386_v57 = vadd.s32 %v6962_v6, %v6970_v19 }
 0x4fe   : > { %vm4304_vm0 = vcmp.lt.s32.totalorder %v4303_v5, 0  ;;  %v3481_v54 = vsel %vm3467_vm13, %v3478_v7, %v3480_v37  ;;  %v7031_v35 = vmul.u32.u64.low %v6999_v39, %v3477_v29  ;;  %v7032_v10 = vmul.u32.u64.high %v6999_v39, %v3477_v29, %v7031_v35 }
 0x4ff   : > { %v3401_v24 = vsel %vm4304_vm0, 0, %v4303_v5  ;;  %v7038_v59 = vmul.u32.u64.low %v6999_v39, %v3481_v54  ;;  %v7039_v14 = vmul.u32.u64.high %v6999_v39, %v3481_v54, %v7038_v59  ;;  %v3473_v8 = vsel %vm3467_vm13, %v3470_v44, %v3472_v56  ;;  %v7084_v54 = vpop.f32.mrf.mxu1 }
 0x500   : > { %v3402_v3 = vsub.s32 32, %v3401_v24  ;;  %v3406_v41 = vsub.s32 4294967266, %v3401_v24  ;;  %vm3549_vm1 = vcmp.gt.s32.totalorder %v3548_v4, 0  ;;  %v3416_v58 = vsub.s32 4, %v6996_v1 }
 0x501   : > { %v3546_v13 = vor.u32 8388608, %v3545_v42  ;;  %v3550_v43 = vsel %vm3549_vm1, %v3548_v4, 0  ;;  %vm3318_vm2 = vweird.f32 %v6752_v26  ;;  %v3403_v15 = vshll.u32 %v7010_v46, %v3401_v24 }
 0x502   : > { %v3404_v9 = vshrl.u32 %v3386_v57, %v3402_v3  ;;  %v3407_v6 = vadd.s32 127, %v3406_v41  ;;  %v3492_v19 = vadd.s32 1, %v7032_v10  ;;  %vm3332_vm3 = vcmp.lt.s32.totalorder %v6832_v60, 0 }
 0x503   : > { %v3489_v27 = vmul.u32 %v6999_v39, %v3473_v8  ;;  %vm3491_vm4 = vc.u32 %v7039_v14, %v7031_v35  ;;  %v3552_v31 = vand.u32 31, %v3550_v43  ;;  %vm3321_vm6 = vcmp.lt.s32.totalorder %v6993_v25, 2 }
 0x504   : > { %v3405_v11 = vor.u32 %v3404_v9, %v3403_v15  ;;  %v3408_v50 = vshll.u32 %v3407_v6, 23  ;;  %v3493_v51 = vsel %vm3491_vm4, %v3492_v19, %v7032_v10  ;;  %vm3322_vm5 = vcmp.eq.s32.totalorder %v6993_v25, 0 }
 0x505   : > { %v4640_v38 = vpop.eup %4639  ;;  %vm3325_vm7 = vcmp.eq.s32.totalorder %v6993_v25, 2  ;;  %vm7056_vm8 = vcmp.le.f32.partialorder %v3330_v17, 0.7853982  ;;  %v3494_v39 = vadd.s32 %v3493_v51, %v3489_v27  ;;  %v3553_v61 = vsub.s32 32, %v3552_v31 }
 0x506   : > { %v4642_v53 = vpop.eup %4641  ;;  %v3326_v23 = vxor.u32 2147483648, %v4640_v38  ;;  %v3409_v16 = vor.u32 4788187, %v3408_v50  ;;  %v3417_v63 = vsel %vm3332_vm3, %v3416_v58, %v6996_v1  ;;  %v7063_v2 = vshll.u32 %v3546_v13, 8 }
 0x507   : > { %v3323_v20 = vxor.u32 2147483648, %v4642_v53  ;;  %v3495_v18 = vadd.s32 536870912, %v3494_v39  ;;  %v7065_v42 = vshrl.u32 %v3550_v43, 5  ;;  %v3555_v17 = vshll.u32 %v4736_v28, %v3552_v31 }
 0x508   : > { %v3327_v55 = vsel %vm3325_vm7, %v3326_v23, %v4642_v53  ;;  %v3410_v22 = vand.u32 2147483647, %v3409_v16  ;;  %v3412_v62 = vcvt.s32.f32 %v3405_v11  ;;  %v3556_v52 = vshrl.u32 %v4737_v30, %v3553_v61 }
 0x509   : > { %v3324_v12 = vsel %vm3322_vm5, %v4640_v38, %v3323_v20  ;;  %v7071_v0 = vshrl.u32 %v3495_v18, 30  ;;  %v3559_v1 = vshrl.u32 %v4738_v32, %v3553_v61  ;;  %v3562_v7 = vshrl.u32 %v4739_v34, %v3553_v61 }
 0x50a   : > { %v3328_v5 = vsel %vm3321_vm6, %v3324_v12, %v3327_v55  ;;  %v3413_v44 = vmul.f32 %v3412_v62, %v3410_v22  ;;  %v3558_v40 = vshll.u32 %v4737_v30, %v3552_v31  ;;  %v3561_v21 = vshll.u32 %v4738_v32, %v3552_v31 }
 0x50b   : > { %v3329_v56 = vsel %vm3318_vm2, nan, %v3328_v5  ;;  %v3497_v29 = vshll.u32 %v7071_v0, 30  ;;  %v3564_v37 = vshll.u32 %v4739_v34, %v3552_v31  ;;  %v3565_v4 = vshrl.u32 %v4740_v36, %v3553_v61 }
 0x50c   : > { %4082 = vst [vmem:[%s5293_s20 + $0xc0] sm:$0xff] %v3329_v56  ;;  %v3414_v10 = vxor.u32 2147483648, %v3413_v44  ;;  %v3557_v25 = vor.u32 %v3556_v52, %v3555_v17  ;;  %v3567_v57 = vshll.u32 %v4740_v36, %v3552_v31  ;;  %v3568_v24 = vshrl.u32 %v4741_v45, %v3553_v61 }
 0x50d   : > { %v7089_v59 = vsub.s32 %v3494_v39, %v3497_v29  ;;  %v3560_v3 = vor.u32 %v3559_v1, %v3558_v40  ;;  %v3563_v26 = vor.u32 %v3562_v7, %v3561_v21  ;;  %v3566_v41 = vor.u32 %v3565_v4, %v3564_v37 }
 0x50e   : > { %v3415_v8 = vsel %vm3332_vm3, %v3414_v10, %v3413_v44  ;;  %v3419_v58 = vsel %vm7056_vm8, 0, %v3417_v63  ;;  %v3569_v13 = vor.u32 %v3568_v24, %v3567_v57  ;;  %v3645_v43 = vand.u32 2139095040, %v7084_v54 }
 0x50f   : > { %v3418_v15 = vsel %vm7056_vm8, %v6832_v60, %v3415_v8  ;;  %v3500_v9 = vsub.s32 0, %v7089_v59  ;;  %vm3570_vm9 = vcmp.lt.s32.totalorder %v7065_v42, 1  ;;  %vm3573_vm10 = vcmp.lt.s32.totalorder %v7065_v42, 4 }
 0x510   : > { %4643 = vcosq.f32 %v3418_v15  ;;  %v3554_v6 = vshrl.u32 %v4736_v28, %v3553_v61  ;;  %vm3572_vm11 = vcmp.lt.s32.totalorder %v7065_v42, 3  ;;  %v3579_v19 = vsel %vm3573_vm10, %v3566_v41, 920167782 }
 0x511   : > { %4645 = vsinq.f32 %v3418_v15  ;;  %v4306_v27 = vmin.u32 %v3500_v9, %v7089_v59  ;;  %v3575_v31 = vsel %vm3573_vm10, %v3563_v26, 2102212464  ;;  %v3578_v11 = vsel %vm3570_vm9, %v3557_v25, %v3560_v3 }
 0x512   : > { %v3423_v50 = vadd.s32 3, %v3419_v58  ;;  %v3580_v51 = vsel %vm3572_vm11, %v3563_v26, %v3579_v19  ;;  %v3582_v38 = vsel %vm3570_vm9, %v3560_v3, %v3563_v26  ;;  %v3583_v46 = vsel %vm3573_vm10, %v3569_v13, 1326507024 }
 0x513   : > { %v3502_v39 = vclz %v4306_v27  ;;  %v3520_v61 = vsub.s32 4, %v7071_v0  ;;  %vm3571_vm12 = vcmp.lt.s32.totalorder %v7065_v42, 2  ;;  %v3574_v53 = vsel %vm3570_vm9, %v3554_v6, %v3557_v25  ;;  %v7152_v6 = vpop.f32.mrf.mxu1 }
 0x514   : > { %v3576_v23 = vsel %vm3572_vm11, %v3560_v3, %v3575_v31  ;;  %v3581_v16 = vsel %vm3571_vm12, %v3578_v11, %v3580_v51  ;;  %v3584_v63 = vsel %vm3572_vm11, %v3566_v41, %v3583_v46  ;;  %v3646_v20 = vshrl.u32 %v3645_v43, 23 }
 0x515   : > { %v4307_v18 = vadd.s32 4294967294, %v3502_v39  ;;  %v3585_v17 = vsel %vm3571_vm12, %v3582_v38, %v3584_v63  ;;  %v7120_v55 = vmul.u32.u64.low %v7063_v2, %v3581_v16  ;;  %v7121_v22 = vmul.u32.u64.high %v7063_v2, %v3581_v16, %v7120_v55 }
 0x516   : > { %v7125_v62 = vmul.u32.u64.low %v7063_v2, %v3585_v17  ;;  %v7126_v52 = vmul.u32.u64.high %v7063_v2, %v3585_v17, %v7125_v62  ;;  %v4313_v12 = vadd.s32 4294967169, %v3646_v20  ;;  %v3424_v1 = vand.u32 3, %v3423_v50 }
 0x517   : > { %vm3436_vm13 = vcmp.lt.s32.totalorder %v6922_v49, 0  ;;  %vm4308_vm14 = vcmp.lt.s32.totalorder %v4307_v18, 0  ;;  %v3577_v7 = vsel %vm3571_vm12, %v3574_v53, %v3576_v23  ;;  %v3490_v42 = vadd.s32 %v7031_v35, %v7039_v14 }
 0x518   : > { %v3505_v5 = vsel %vm4308_vm14, 0, %v4307_v18  ;;  %v3642_v44 = vand.u32 2147483647, %v7084_v54  ;;  %v3652_v40 = vadd.s32 1, %v4313_v12  ;;  %v3521_v29 = vsel %vm3436_vm13, %v3520_v61, %v7071_v0 }
 0x519   : > { %v3506_v21 = vsub.s32 32, %v3505_v5  ;;  %v3510_v56 = vsub.s32 4294967266, %v3505_v5  ;;  %v3596_v37 = vadd.s32 1, %v7121_v22  ;;  %v3507_v4 = vshll.u32 %v7089_v59, %v3505_v5 }
 0x51a   : > { %v3593_v10 = vmul.u32 %v7063_v2, %v3577_v7  ;;  %vm3595_vm15 = vc.u32 %v7126_v52, %v7120_v55  ;;  %vm3653_vm0 = vcmp.gt.s32.totalorder %v3652_v40, 0  ;;  %vm7143_vm1 = vcmp.le.f32.partialorder %v3434_v47, 0.7853982 }
 0x51b   : > { %v3508_v35 = vshrl.u32 %v3490_v42, %v3506_v21  ;;  %v3511_v14 = vadd.s32 127, %v3510_v56  ;;  %v3597_v25 = vsel %vm3595_vm15, %v3596_v37, %v7121_v22  ;;  %v3654_v57 = vsel %vm3653_vm0, %v3652_v40, 0 }
 0x51c   : > { %v3598_v0 = vadd.s32 %v3597_v25, %v3593_v10  ;;  %v3649_v59 = vand.u32 8388607, %v3642_v44  ;;  %v3656_v2 = vand.u32 31, %v3654_v57  ;;  %vm3422_vm2 = vweird.f32 %v6832_v60 }
 0x51d   : > { %v4644_v3 = vpop.eup %4643  ;;  %v3509_v26 = vor.u32 %v3508_v35, %v3507_v4  ;;  %v3512_v41 = vshll.u32 %v3511_v14, 23  ;;  %v3523_v8 = vsel %vm7143_vm1, 0, %v3521_v29  ;;  %vm3425_vm3 = vcmp.lt.s32.totalorder %v3424_v1, 2 }
 0x51e   : > { %v4646_v58 = vpop.eup %4645  ;;  %v3430_v13 = vxor.u32 2147483648, %v4644_v3  ;;  %v3599_v47 = vadd.s32 536870912, %v3598_v0  ;;  %v3657_v43 = vsub.s32 32, %v3656_v2  ;;  %vm3426_vm4 = vcmp.eq.s32.totalorder %v3424_v1, 0 }
 0x51f   : > { %v3427_v15 = vxor.u32 2147483648, %v4646_v58  ;;  %vm3429_vm6 = vcmp.eq.s32.totalorder %v3424_v1, 2  ;;  %v3513_v9 = vor.u32 4788187, %v3512_v41  ;;  %v7154_v27 = vadd.s32 3, %v3523_v8 }
 0x520   : > { %v3431_v19 = vsel %vm3429_vm6, %v3430_v13, %v4646_v58  ;;  %v7156_v31 = vshrl.u32 %v3599_v47, 30  ;;  %v3650_v11 = vor.u32 8388608, %v3649_v59  ;;  %v3516_v38 = vcvt.s32.f32 %v3509_v26 }
 0x521   : > { %v3428_v50 = vsel %vm3426_vm4, %v4644_v3, %v3427_v15  ;;  %v3514_v51 = vand.u32 2147483647, %v3513_v9  ;;  %v3660_v46 = vshrl.u32 %v4737_v30, %v3657_v43  ;;  %v3663_v53 = vshrl.u32 %v4738_v32, %v3657_v43 }
 0x522   : > { %v3432_v39 = vsel %vm3425_vm3, %v3428_v50, %v3431_v19  ;;  %v3601_v61 = vshll.u32 %v7156_v31, 30  ;;  %v3749_v23 = vand.u32 2139095040, %v7152_v6  ;;  %v3659_v20 = vshll.u32 %v4736_v28, %v3656_v2 }
 0x523   : > { %v3433_v16 = vsel %vm3422_vm2, nan, %v3432_v39  ;;  %v3517_v63 = vmul.f32 %v3516_v38, %v3514_v51  ;;  %v3666_v18 = vshrl.u32 %v4739_v34, %v3657_v43  ;;  %v3655_v22 = vshrl.u32 %v3654_v57, 5 }
 0x524   : > { %4083 = vst [vmem:[%s5293_s20 + $0xc8] sm:$0xff] %v3433_v16  ;;  %v7168_v17 = vsub.s32 %v3598_v0, %v3601_v61  ;;  %v3662_v62 = vshll.u32 %v4737_v30, %v3656_v2  ;;  %v3669_v12 = vshrl.u32 %v4740_v36, %v3657_v43  ;;  %v3661_v7 = vor.u32 %v3660_v46, %v3659_v20 }
 0x525   : > { %v3518_v1 = vxor.u32 2147483648, %v3517_v63  ;;  %v3665_v42 = vshll.u32 %v4738_v32, %v3656_v2  ;;  %v3668_v60 = vshll.u32 %v4739_v34, %v3656_v2  ;;  %v3671_v21 = vshll.u32 %v4740_v36, %v3656_v2 }
 0x526   : > { %v3604_v5 = vsub.s32 0, %v7168_v17  ;;  %v3664_v40 = vor.u32 %v3663_v53, %v3662_v62  ;;  %v3672_v56 = vshrl.u32 %v4741_v45, %v3657_v43  ;;  %v3690_v10 = vshll.u32 %v3650_v11, 8 }
 0x527   : > { %v3519_v29 = vsel %vm3436_vm13, %v3518_v1, %v3517_v63  ;;  %v3667_v37 = vor.u32 %v3666_v18, %v3665_v42  ;;  %v3670_v4 = vor.u32 %v3669_v12, %v3668_v60  ;;  %v3750_v57 = vshrl.u32 %v3749_v23, 23 }
 0x528   : > { %v3522_v35 = vsel %vm7143_vm1, %v6922_v49, %v3519_v29  ;;  %v4310_v14 = vmin.u32 %v3604_v5, %v7168_v17  ;;  %v3673_v25 = vor.u32 %v3672_v56, %v3671_v21  ;;  %v3658_v0 = vshrl.u32 %v4736_v28, %v3657_v43 }
 0x529   : > { %4647 = vcosq.f32 %v3522_v35  ;;  %vm3674_vm5 = vcmp.lt.s32.totalorder %v3655_v22, 1  ;;  %vm3675_vm7 = vcmp.lt.s32.totalorder %v3655_v22, 2  ;;  %vm3677_vm8 = vcmp.lt.s32.totalorder %v3655_v22, 4 }
 0x52a   : > { %4649 = vsinq.f32 %v3522_v35  ;;  %v3606_v59 = vclz %v4310_v14  ;;  %v3682_v2 = vsel %vm3674_vm5, %v3661_v7, %v3664_v40  ;;  %vm3676_vm9 = vcmp.lt.s32.totalorder %v3655_v22, 3 }
 0x52b   : > { %v3679_v3 = vsel %vm3677_vm8, %v3667_v37, 2102212464  ;;  %v3683_v26 = vsel %vm3677_vm8, %v3670_v4, 920167782  ;;  %v3686_v41 = vsel %vm3674_vm5, %v3664_v40, %v3667_v37  ;;  %v3678_v24 = vsel %vm3674_vm5, %v3658_v0, %v3661_v7 }
 0x52c   : > { %v4311_v8 = vadd.s32 4294967294, %v3606_v59  ;;  %v3684_v58 = vsel %vm3676_vm9, %v3667_v37, %v3683_v26  ;;  %v3687_v13 = vsel %vm3677_vm8, %v3673_v25, 1326507024  ;;  %v3680_v47 = vsel %vm3676_vm9, %v3664_v40, %v3679_v3 }
 0x52d   : > { %v3685_v15 = vsel %vm3675_vm7, %v3682_v2, %v3684_v58  ;;  %v3688_v9 = vsel %vm3676_vm9, %v3670_v4, %v3687_v13  ;;  %v4317_v19 = vadd.s32 4294967169, %v3750_v57  ;;  %v3624_v38 = vsub.s32 4, %v7156_v31 }
 0x52e   : > { %vm4312_vm10 = vcmp.lt.s32.totalorder %v4311_v8, 0  ;;  %v3689_v43 = vsel %vm3675_vm7, %v3686_v41, %v3688_v9  ;;  %v7186_v11 = vmul.u32.u64.low %v3690_v10, %v3685_v15  ;;  %v7187_v50 = vmul.u32.u64.high %v3690_v10, %v3685_v15, %v7186_v11 }
 0x52f   : > { %v3609_v51 = vsel %vm4312_vm10, 0, %v4311_v8  ;;  %v7191_v46 = vmul.u32.u64.low %v3690_v10, %v3689_v43  ;;  %v7192_v39 = vmul.u32.u64.high %v3690_v10, %v3689_v43, %v7191_v46  ;;  %v3594_v61 = vadd.s32 %v7120_v55, %v7126_v52 }
 0x530   : > { %v3610_v53 = vsub.s32 32, %v3609_v51  ;;  %v3614_v23 = vsub.s32 4294967266, %v3609_v51  ;;  %v3681_v16 = vsel %vm3675_vm7, %v3678_v24, %v3680_v47  ;;  %v3528_v63 = vand.u32 3, %v7154_v27 }
 0x531   : > { %vm3540_vm11 = vcmp.lt.s32.totalorder %v6988_v48, 0  ;;  %v3746_v20 = vand.u32 2147483647, %v7152_v6  ;;  %v3756_v18 = vadd.s32 1, %v4317_v19  ;;  %v3611_v62 = vshll.u32 %v7168_v17, %v3609_v51 }
 0x532   : > { %v3612_v12 = vshrl.u32 %v3594_v61, %v3610_v53  ;;  %v3615_v1 = vadd.s32 127, %v3614_v23  ;;  %v3700_v7 = vadd.s32 1, %v7187_v50  ;;  %v3625_v55 = vsel %vm3540_vm11, %v3624_v38, %v7156_v31 }
 0x533   : > { %v3697_v52 = vmul.u32 %v3690_v10, %v3681_v16  ;;  %vm3699_vm12 = vc.u32 %v7192_v39, %v7186_v11  ;;  %vm3757_vm13 = vcmp.gt.s32.totalorder %v3756_v18, 0  ;;  %vm3526_vm14 = vweird.f32 %v6922_v49 }
 0x534   : > { %v3613_v27 = vor.u32 %v3612_v12, %v3611_v62  ;;  %v3616_v22 = vshll.u32 %v3615_v1, 23  ;;  %v3701_v42 = vsel %vm3699_vm12, %v3700_v7, %v7187_v50  ;;  %v3758_v60 = vsel %vm3757_vm13, %v3756_v18, 0  ;;  %v7244_v12 = vpop.f32.mrf.mxu1 }
 0x535   : > { %vm7211_vm15 = vcmp.le.f32.partialorder %v3538_v33, 0.7853982  ;;  %v3702_v5 = vadd.s32 %v3701_v42, %v3697_v52  ;;  %v3760_v31 = vand.u32 31, %v3758_v60  ;;  %vm3529_vm0 = vcmp.lt.s32.totalorder %v3528_v63, 2 }
 0x536   : > { %v4648_v40 = vpop.eup %4647  ;;  %v3617_v21 = vor.u32 4788187, %v3616_v22  ;;  %v3627_v56 = vsel %vm7211_vm15, 0, %v3625_v55  ;;  %v3753_v29 = vand.u32 8388607, %v3746_v20  ;;  %vm3530_vm1 = vcmp.eq.s32.totalorder %v3528_v63, 0 }
 0x537   : > { %v4650_v37 = vpop.eup %4649  ;;  %v3534_v4 = vxor.u32 2147483648, %v4648_v40  ;;  %v3703_v10 = vadd.s32 536870912, %v3702_v5  ;;  %v3761_v35 = vsub.s32 32, %v3760_v31  ;;  %vm3533_vm2 = vcmp.eq.s32.totalorder %v3528_v63, 2 }
 0x538   : > { %v3531_v33 = vxor.u32 2147483648, %v4650_v37  ;;  %v3618_v14 = vand.u32 2147483647, %v3617_v21  ;;  %v3620_v25 = vcvt.s32.f32 %v3613_v27  ;;  %v3631_v0 = vadd.s32 3, %v3627_v56 }
 0x539   : > { %v3535_v57 = vsel %vm3533_vm2, %v3534_v4, %v4650_v37  ;;  %v7219_v59 = vshrl.u32 %v3703_v10, 30  ;;  %v3764_v2 = vshrl.u32 %v4737_v30, %v3761_v35  ;;  %v3754_v41 = vor.u32 8388608, %v3753_v29 }
 0x53a   : > { %v3532_v3 = vsel %vm3530_vm1, %v4648_v40, %v3531_v33  ;;  %v3621_v26 = vmul.f32 %v3620_v25, %v3618_v14  ;;  %v3763_v8 = vshll.u32 %v4736_v28, %v3760_v31  ;;  %v3767_v13 = vshrl.u32 %v4738_v32, %v3761_v35 }
 0x53b   : > { %v3536_v24 = vsel %vm3529_vm0, %v3532_v3, %v3535_v57  ;;  %v3705_v58 = vshll.u32 %v7219_v59, 30  ;;  %v3770_v47 = vshrl.u32 %v4739_v34, %v3761_v35  ;;  %v3759_v19 = vshrl.u32 %v3758_v60, 5 }
 0x53c   : > { %v3537_v15 = vsel %vm3526_vm14, nan, %v3536_v24  ;;  %v3622_v9 = vxor.u32 2147483648, %v3621_v26  ;;  %v3766_v43 = vshll.u32 %v4737_v30, %v3760_v31  ;;  %v3765_v51 = vor.u32 %v3764_v2, %v3763_v8 }
 0x53d   : > { %4084 = vst [vmem:[%s5293_s20 + $0xd0] sm:$0xff] %v3537_v15  ;;  %v7231_v50 = vsub.s32 %v3702_v5, %v3705_v58  ;;  %v3769_v38 = vshll.u32 %v4738_v32, %v3760_v31  ;;  %v3773_v46 = vshrl.u32 %v4740_v36, %v3761_v35  ;;  %v3772_v53 = vshll.u32 %v4739_v34, %v3760_v31 }
 0x53e   : > { %v3623_v61 = vsel %vm3540_vm11, %v3622_v9, %v3621_v26  ;;  %v3775_v49 = vshll.u32 %v4740_v36, %v3760_v31  ;;  %v3776_v23 = vshrl.u32 %v4741_v45, %v3761_v35  ;;  %v3768_v18 = vor.u32 %v3767_v13, %v3766_v43 }
 0x53f   : > { %v3626_v16 = vsel %vm7211_vm15, %v6988_v48, %v3623_v61  ;;  %v3708_v63 = vsub.s32 0, %v7231_v50  ;;  %v3771_v62 = vor.u32 %v3770_v47, %v3769_v38  ;;  %v3774_v1 = vor.u32 %v3773_v46, %v3772_v53 }
 0x540   : > { %4651 = vcosq.f32 %v3626_v16  ;;  %v3777_v7 = vor.u32 %v3776_v23, %v3775_v49  ;;  %v7246_v55 = vand.u32 3, %v3631_v0  ;;  %vm3778_vm3 = vcmp.lt.s32.totalorder %v3759_v19, 1 }
 0x541   : > { %4653 = vsinq.f32 %v3626_v16  ;;  %v4314_v52 = vmin.u32 %v3708_v63, %v7231_v50  ;;  %vm3780_vm4 = vcmp.lt.s32.totalorder %v3759_v19, 3  ;;  %v3794_v27 = vshll.u32 %v3754_v41, 8 }
 0x542   : > { %v3853_v22 = vand.u32 2139095040, %v7244_v12  ;;  %vm3781_vm6 = vcmp.lt.s32.totalorder %v3759_v19, 4  ;;  %v3786_v60 = vsel %vm3778_vm3, %v3765_v51, %v3768_v18  ;;  %v3790_v17 = vsel %vm3778_vm3, %v3768_v18, %v3771_v62 }
 0x543   : > { %v3710_v42 = vclz %v4314_v52  ;;  %v3762_v5 = vshrl.u32 %v4736_v28, %v3761_v35  ;;  %v3783_v31 = vsel %vm3781_vm6, %v3771_v62, 2102212464  ;;  %v3787_v40 = vsel %vm3781_vm6, %v3774_v1, 920167782 }
 0x544   : > { %v3791_v21 = vsel %vm3781_vm6, %v3777_v7, 1326507024  ;;  %vm3779_vm5 = vcmp.lt.s32.totalorder %v3759_v19, 2  ;;  %v3788_v29 = vsel %vm3780_vm4, %v3771_v62, %v3787_v40  ;;  %v3854_v14 = vshrl.u32 %v3853_v22, 23 }
 0x545   : > { %v4315_v56 = vadd.s32 4294967294, %v3710_v42  ;;  %v3792_v37 = vsel %vm3780_vm4, %v3774_v1, %v3791_v21  ;;  %v3782_v4 = vsel %vm3778_vm3, %v3762_v5, %v3765_v51  ;;  %v3789_v10 = vsel %vm3779_vm5, %v3786_v60, %v3788_v29  ;;  %v7287_v1 = vpop.f32.mrf.mxu1 }
 0x546   : > { %v3793_v33 = vsel %vm3779_vm5, %v3790_v17, %v3792_v37  ;;  %v3784_v25 = vsel %vm3780_vm4, %v3768_v18, %v3783_v31  ;;  %v7262_v2 = vmul.u32.u64.low %v3794_v27, %v3789_v10  ;;  %v7263_v3 = vmul.u32.u64.high %v3794_v27, %v3789_v10, %v7262_v2 }
 0x547   : > { %vm4316_vm7 = vcmp.lt.s32.totalorder %v4315_v56, 0  ;;  %v7259_v35 = vmul.u32.u64.low %v3794_v27, %v3793_v33  ;;  %v7260_v57 = vmul.u32.u64.high %v3794_v27, %v3793_v33, %v7259_v35  ;;  %v4321_v26 = vadd.s32 4294967169, %v3854_v14 }
 0x548   : > { %v3713_v0 = vsel %vm4316_vm7, 0, %v4315_v56  ;;  %v3698_v41 = vadd.s32 %v7186_v11, %v7192_v39  ;;  %vm3630_vm8 = vweird.f32 %v6988_v48  ;;  %vm3633_vm9 = vcmp.lt.s32.totalorder %v7246_v55, 2 }
 0x549   : > { %v3714_v8 = vsub.s32 32, %v3713_v0  ;;  %v3718_v24 = vsub.s32 4294967266, %v3713_v0  ;;  %vm3644_vm10 = vcmp.lt.s32.totalorder %v7084_v54, 0  ;;  %v3785_v58 = vsel %vm3779_vm5, %v3782_v4, %v3784_v25 }
 0x54a   : > { %v3860_v13 = vadd.s32 1, %v4321_v26  ;;  %v3715_v47 = vshll.u32 %v7231_v50, %v3713_v0  ;;  %vm3803_vm11 = vc.u32 %v7260_v57, %v7262_v2  ;;  %v3728_v11 = vsub.s32 4, %v7219_v59 }
 0x54b   : > { %v3716_v15 = vshrl.u32 %v3698_v41, %v3714_v8  ;;  %v3719_v9 = vadd.s32 127, %v3718_v24  ;;  %v3804_v39 = vadd.s32 1, %v7263_v3  ;;  %v3850_v43 = vand.u32 2147483647, %v7244_v12 }
 0x54c   : > { %vm3861_vm12 = vcmp.gt.s32.totalorder %v3860_v13, 0  ;;  %v3801_v19 = vmul.u32 %v3794_v27, %v3785_v58  ;;  %vm3634_vm13 = vcmp.eq.s32.totalorder %v7246_v55, 0  ;;  %vm3637_vm14 = vcmp.eq.s32.totalorder %v7246_v55, 2 }
 0x54d   : > { %v4652_v51 = vpop.eup %4651  ;;  %v3717_v38 = vor.u32 %v3716_v15, %v3715_v47  ;;  %v3720_v46 = vshll.u32 %v3719_v9, 23  ;;  %v3862_v61 = vsel %vm3861_vm12, %v3860_v13, 0  ;;  %v3805_v49 = vsel %vm3803_vm11, %v3804_v39, %v7263_v3 }
 0x54e   : > { %v4654_v53 = vpop.eup %4653  ;;  %v3638_v50 = vxor.u32 2147483648, %v4652_v51  ;;  %v3864_v23 = vand.u32 31, %v3862_v61  ;;  %vm7283_vm15 = vcmp.le.f32.partialorder %v3642_v44, 0.7853982  ;;  %v3806_v62 = vadd.s32 %v3805_v49, %v3801_v19 }
 0x54f   : > { %v3635_v16 = vxor.u32 2147483648, %v4654_v53  ;;  %v3721_v18 = vor.u32 4788187, %v3720_v46  ;;  %v3729_v52 = vsel %vm3644_vm10, %v3728_v11, %v7219_v59  ;;  %v3857_v27 = vand.u32 8388607, %v3850_v43 }
 0x550   : > { %v3639_v7 = vsel %vm3637_vm14, %v3638_v50, %v4654_v53  ;;  %v3865_v22 = vsub.s32 32, %v3864_v23  ;;  %v3724_v44 = vcvt.s32.f32 %v3717_v38  ;;  %v3807_v17 = vadd.s32 536870912, %v3806_v62 }
 0x551   : > { %v3636_v42 = vsel %vm3634_vm13, %v4652_v51, %v3635_v16  ;;  %v3722_v60 = vand.u32 2147483647, %v3721_v18  ;;  %v3957_v21 = vand.u32 2139095040, %v7287_v1  ;;  %v3863_v4 = vshrl.u32 %v3862_v61, 5 }
 0x552   : > { %v3640_v5 = vsel %vm3633_vm9, %v3636_v42, %v3639_v7  ;;  %v3868_v31 = vshrl.u32 %v4737_v30, %v3865_v22  ;;  %v3871_v40 = vshrl.u32 %v4738_v32, %v3865_v22  ;;  %v7301_v29 = vshrl.u32 %v3807_v17, 30 }
 0x553   : > { %v3641_v59 = vsel %vm3630_vm8, nan, %v3640_v5  ;;  %v3725_v56 = vmul.f32 %v3724_v44, %v3722_v60  ;;  %v3874_v37 = vshrl.u32 %v4739_v34, %v3865_v22  ;;  %v3867_v10 = vshll.u32 %v4736_v28, %v3864_v23 }
 0x554   : > { %4085 = vst [vmem:[%s5293_s20 + $0xd8] sm:$0xff] %v3641_v59  ;;  %v3870_v55 = vshll.u32 %v4737_v30, %v3864_v23  ;;  %v3877_v33 = vshrl.u32 %v4740_v36, %v3865_v22  ;;  %v3809_v25 = vshll.u32 %v7301_v29, 30  ;;  %v3873_v35 = vshll.u32 %v4738_v32, %v3864_v23 }
 0x555   : > { %v3726_v14 = vxor.u32 2147483648, %v3725_v56  ;;  %v3876_v48 = vshll.u32 %v4739_v34, %v3864_v23  ;;  %v3869_v0 = vor.u32 %v3868_v31, %v3867_v10  ;;  %v3879_v26 = vshll.u32 %v4740_v36, %v3864_v23 }
 0x556   : > { %v3872_v3 = vor.u32 %v3871_v40, %v3870_v55  ;;  %v3880_v41 = vshrl.u32 %v4741_v45, %v3865_v22  ;;  %v7315_v24 = vsub.s32 %v3806_v62, %v3809_v25  ;;  %v3875_v58 = vor.u32 %v3874_v37, %v3873_v35 }
 0x557   : > { %v3727_v8 = vsel %vm3644_vm10, %v3726_v14, %v3725_v56  ;;  %v3878_v13 = vor.u32 %v3877_v33, %v3876_v48  ;;  %v3731_v15 = vsel %vm7283_vm15, 0, %v3729_v52  ;;  %v3858_v9 = vor.u32 8388608, %v3857_v27 }
 0x558   : > { %v3730_v47 = vsel %vm7283_vm15, %v7084_v54, %v3727_v8  ;;  %v3881_v11 = vor.u32 %v3880_v41, %v3879_v26  ;;  %v3812_v39 = vsub.s32 0, %v7315_v24  ;;  %v3866_v51 = vshrl.u32 %v4736_v28, %v3865_v22 }
 0x559   : > { %4655 = vcosq.f32 %v3730_v47  ;;  %v3958_v38 = vshrl.u32 %v3957_v21, 23  ;;  %vm3882_vm0 = vcmp.lt.s32.totalorder %v3863_v4, 1  ;;  %vm3884_vm1 = vcmp.lt.s32.totalorder %v3863_v4, 3 }
 0x55a   : > { %4657 = vsinq.f32 %v3730_v47  ;;  %vm3885_vm2 = vcmp.lt.s32.totalorder %v3863_v4, 4  ;;  %v4318_v46 = vmin.u32 %v3812_v39, %v7315_v24  ;;  %v3890_v61 = vsel %vm3882_vm0, %v3869_v0, %v3872_v3 }
 0x55b   : > { %v3887_v19 = vsel %vm3885_vm2, %v3875_v58, 2102212464  ;;  %v3891_v53 = vsel %vm3885_vm2, %v3878_v13, 920167782  ;;  %v3735_v50 = vadd.s32 3, %v3731_v15  ;;  %v3894_v23 = vsel %vm3882_vm0, %v3872_v3, %v3875_v58 }
 0x55c   : > { %v3892_v49 = vsel %vm3884_vm1, %v3875_v58, %v3891_v53  ;;  %v3895_v16 = vsel %vm3885_vm2, %v3881_v11, 1326507024  ;;  %v3814_v63 = vclz %v4318_v46  ;;  %vm3883_vm3 = vcmp.lt.s32.totalorder %v3863_v4, 2 }
 0x55d   : > { %v3886_v18 = vsel %vm3882_vm0, %v3866_v51, %v3869_v0  ;;  %v3898_v62 = vshll.u32 %v3858_v9, 8  ;;  %v3888_v7 = vsel %vm3884_vm1, %v3872_v3, %v3887_v19  ;;  %v3893_v52 = vsel %vm3883_vm3, %v3890_v61, %v3892_v49 }
 0x55e   : > { %v3896_v27 = vsel %vm3884_vm1, %v3878_v13, %v3895_v16  ;;  %v4325_v22 = vadd.s32 4294967169, %v3958_v38  ;;  %v4319_v42 = vadd.s32 4294967294, %v3814_v63  ;;  %v3889_v21 = vsel %vm3883_vm3, %v3886_v18, %v3888_v7 }
 0x55f   : > { %v3897_v60 = vsel %vm3883_vm3, %v3894_v23, %v3896_v27  ;;  %v7328_v44 = vmul.u32.u64.low %v3898_v62, %v3893_v52  ;;  %v7329_v17 = vmul.u32.u64.high %v3898_v62, %v3893_v52, %v7328_v44  ;;  %v3736_v59 = vand.u32 3, %v3735_v50 }
 0x560   : > { %v7332_v5 = vmul.u32.u64.low %v3898_v62, %v3897_v60  ;;  %v7333_v31 = vmul.u32.u64.high %v3898_v62, %v3897_v60, %v7332_v5  ;;  %v3964_v40 = vadd.s32 1, %v4325_v22  ;;  %vm4320_vm4 = vcmp.lt.s32.totalorder %v4319_v42, 0 }
 0x561   : > { %v3817_v56 = vsel %vm4320_vm4, 0, %v4319_v42  ;;  %v3802_v37 = vadd.s32 %v7262_v2, %v7260_v57  ;;  %v3908_v55 = vadd.s32 1, %v7329_v17  ;;  %vm3734_vm5 = vweird.f32 %v7084_v54 }
 0x562   : > { %vm3965_vm6 = vcmp.gt.s32.totalorder %v3964_v40, 0  ;;  %v3818_v4 = vsub.s32 32, %v3817_v56  ;;  %v3822_v10 = vsub.s32 4294967266, %v3817_v56  ;;  %v3905_v33 = vmul.u32 %v3898_v62, %v3889_v21 }
 0x563   : > { %vm3907_vm7 = vc.u32 %v7333_v31, %v7328_v44  ;;  %v3966_v14 = vsel %vm3965_vm6, %v3964_v40, 0  ;;  %v3819_v25 = vshll.u32 %v7315_v24, %v3817_v56  ;;  %vm3748_vm8 = vcmp.lt.s32.totalorder %v7152_v6, 0 }
 0x564   : > { %v3820_v35 = vshrl.u32 %v3802_v37, %v3818_v4  ;;  %v3823_v48 = vadd.s32 127, %v3822_v10  ;;  %v3909_v0 = vsel %vm3907_vm7, %v3908_v55, %v7329_v17  ;;  %v3832_v57 = vsub.s32 4, %v7301_v29 }
 0x565   : > { %v3910_v2 = vadd.s32 %v3909_v0, %v3905_v33  ;;  %v3968_v26 = vand.u32 31, %v3966_v14  ;;  %vm3741_vm9 = vcmp.eq.s32.totalorder %v3736_v59, 2  ;;  %vm7347_vm10 = vcmp.le.f32.partialorder %v3746_v20, 0.7853982 }
 0x566   : > { %v4656_v3 = vpop.eup %4655  ;;  %v3821_v58 = vor.u32 %v3820_v35, %v3819_v25  ;;  %v3824_v13 = vshll.u32 %v3823_v48, 23  ;;  %v3954_v9 = vand.u32 2147483647, %v7287_v1  ;;  %vm3737_vm11 = vcmp.lt.s32.totalorder %v3736_v59, 2 }
 0x567   : > { %v4658_v41 = vpop.eup %4657  ;;  %v3742_v8 = vxor.u32 2147483648, %v4656_v3  ;;  %v3911_v15 = vadd.s32 536870912, %v3910_v2  ;;  %v3969_v11 = vsub.s32 32, %v3968_v26  ;;  %vm3738_vm12 = vcmp.eq.s32.totalorder %v3736_v59, 0 }
 0x568   : > { %v3739_v47 = vxor.u32 2147483648, %v4658_v41  ;;  %v3825_v51 = vor.u32 4788187, %v3824_v13  ;;  %v3828_v46 = vcvt.s32.f32 %v3821_v58  ;;  %v3833_v19 = vsel %vm3748_vm8, %v3832_v57, %v7301_v29 }
 0x569   : > { %v3743_v39 = vsel %vm3741_vm9, %v3742_v8, %v4658_v41  ;;  %v7355_v61 = vshrl.u32 %v3911_v15, 30  ;;  %v3972_v50 = vshrl.u32 %v4737_v30, %v3969_v11  ;;  %v3975_v49 = vshrl.u32 %v4738_v32, %v3969_v11 }
 0x56a   : > { %v3740_v38 = vsel %vm3738_vm12, %v4656_v3, %v3739_v47  ;;  %v3826_v53 = vand.u32 2147483647, %v3825_v51  ;;  %v3961_v63 = vand.u32 8388607, %v3954_v9  ;;  %v3967_v18 = vshrl.u32 %v3966_v14, 5 }
 0x56b   : > { %v3744_v20 = vsel %vm3737_vm11, %v3740_v38, %v3743_v39  ;;  %v3913_v16 = vshll.u32 %v7355_v61, 30  ;;  %v3971_v29 = vshll.u32 %v4736_v28, %v3968_v26  ;;  %v3974_v7 = vshll.u32 %v4737_v30, %v3968_v26 }
 0x56c   : > { %v3745_v23 = vsel %vm3734_vm5, nan, %v3744_v20  ;;  %v3829_v62 = vmul.f32 %v3828_v46, %v3826_v53  ;;  %v3978_v52 = vshrl.u32 %v4739_v34, %v3969_v11  ;;  %v3977_v22 = vshll.u32 %v4738_v32, %v3968_v26 }
 0x56d   : > { %4086 = vst [vmem:[%s5293_s20 + $0xe0] sm:$0xff] %v3745_v23  ;;  %v3914_v27 = vsub.s32 %v3910_v2, %v3913_v16  ;;  %v3980_v54 = vshll.u32 %v4739_v34, %v3968_v26  ;;  %v3981_v42 = vshrl.u32 %v4740_v36, %v3969_v11  ;;  %v3973_v17 = vor.u32 %v3972_v50, %v3971_v29 }
 0x56e   : > { %v3830_v60 = vxor.u32 2147483648, %v3829_v62  ;;  %v3976_v5 = vor.u32 %v3975_v49, %v3974_v7  ;;  %v3984_v40 = vshrl.u32 %v4741_v45, %v3969_v11  ;;  %v3979_v59 = vor.u32 %v3978_v52, %v3977_v22 }
 0x56f   : > { %v3916_v21 = vsub.s32 0, %v3914_v27  ;;  %v3982_v56 = vor.u32 %v3981_v42, %v3980_v54  ;;  %v3983_v37 = vshll.u32 %v4740_v36, %v3968_v26  ;;  %v3835_v32 = vsel %vm7347_vm10, 0, %v3833_v19 }
 0x570   : > { %v3831_v30 = vsel %vm3748_vm8, %v3830_v60, %v3829_v62  ;;  %v3962_v4 = vor.u32 8388608, %v3961_v63  ;;  %vm3986_vm13 = vcmp.lt.s32.totalorder %v3967_v18, 1  ;;  %vm3989_vm14 = vcmp.lt.s32.totalorder %v3967_v18, 4 }
 0x571   : > { %v3834_v34 = vsel %vm7347_vm10, %v7152_v6, %v3831_v30  ;;  %v4322_v10 = vmin.u32 %v3916_v21, %v3914_v27  ;;  %v3985_v55 = vor.u32 %v3984_v40, %v3983_v37  ;;  %v3970_v45 = vshrl.u32 %v4736_v28, %v3969_v11 }
 0x572   : > { %4659 = vcosq.f32 %v3834_v34  ;;  %v3994_v36 = vsel %vm3986_vm13, %v3973_v17, %v3976_v5  ;;  %v3995_v33 = vsel %vm3989_vm14, %v3982_v56, 920167782  ;;  %vm3988_vm15 = vcmp.lt.s32.totalorder %v3967_v18, 3 }
 0x573   : > { %4661 = vsinq.f32 %v3834_v34  ;;  %v3918_v14 = vclz %v4322_v10  ;;  %v3991_v25 = vsel %vm3989_vm14, %v3979_v59, 2102212464  ;;  %vm3987_vm0 = vcmp.lt.s32.totalorder %v3967_v18, 2 }
 0x574   : > { %v3996_v35 = vsel %vm3988_vm15, %v3979_v59, %v3995_v33  ;;  %v3998_v48 = vsel %vm3986_vm13, %v3976_v5, %v3979_v59  ;;  %v4002_v0 = vshll.u32 %v3962_v4, 8  ;;  %v3990_v57 = vsel %vm3986_vm13, %v3970_v45, %v3973_v17 }
 0x575   : > { %v4323_v3 = vadd.s32 4294967294, %v3918_v14  ;;  %v3997_v2 = vsel %vm3987_vm0, %v3994_v36, %v3996_v35  ;;  %v3999_v28 = vsel %vm3989_vm14, %v3985_v55, 1326507024  ;;  %v3992_v26 = vsel %vm3988_vm15, %v3976_v5, %v3991_v25 }
 0x576   : > { %v4000_v41 = vsel %vm3988_vm15, %v3982_v56, %v3999_v28  ;;  %v7388_v8 = vmul.u32.u64.low %v4002_v0, %v3997_v2  ;;  %v7389_v58 = vmul.u32.u64.high %v4002_v0, %v3997_v2, %v7388_v8  ;;  %v3839_v47 = vadd.s32 3, %v3835_v32 }
 0x577   : > { %vm4324_vm1 = vcmp.lt.s32.totalorder %v4323_v3, 0  ;;  %v4001_v13 = vsel %vm3987_vm0, %v3998_v48, %v4000_v41  ;;  %v3906_v39 = vadd.s32 %v7328_v44, %v7333_v31  ;;  %v3993_v46 = vsel %vm3987_vm0, %v3990_v57, %v3992_v26 }
 0x578   : > { %v3921_v24 = vsel %vm4324_vm1, 0, %v4323_v3  ;;  %v7392_v15 = vmul.u32.u64.low %v4002_v0, %v4001_v13  ;;  %v7393_v11 = vmul.u32.u64.high %v4002_v0, %v4001_v13, %v7392_v15  ;;  %v4012_v19 = vadd.s32 1, %v7389_v58 }
 0x579   : > { %v3922_v51 = vsub.s32 32, %v3921_v24  ;;  %v3926_v38 = vsub.s32 4294967266, %v3921_v24  ;;  %v3923_v20 = vshll.u32 %v3914_v27, %v3921_v24  ;;  %v4009_v49 = vmul.u32 %v4002_v0, %v3993_v46 }
 0x57a   : > { %vm4011_vm2 = vc.u32 %v7393_v11, %v7388_v8  ;;  %v3840_v23 = vand.u32 3, %v3839_v47  ;;  %vm3838_vm5 = vweird.f32 %v7152_v6  ;;  %vm3852_vm7 = vcmp.lt.s32.totalorder %v7244_v12, 0 }
 0x57b   : > { %v3924_v53 = vshrl.u32 %v3906_v39, %v3922_v51  ;;  %v3927_v50 = vadd.s32 127, %v3926_v38  ;;  %v4013_v62 = vsel %vm4011_vm2, %v4012_v19, %v7389_v58  ;;  %v3936_v37 = vsub.s32 4, %v7355_v61 }
 0x57c   : > { %v4014_v29 = vadd.s32 %v4013_v62, %v4009_v49  ;;  %vm3845_vm3 = vcmp.eq.s32.totalorder %v3840_v23, 2  ;;  %vm3842_vm4 = vcmp.eq.s32.totalorder %v3840_v23, 0  ;;  %vm3841_vm6 = vcmp.lt.s32.totalorder %v3840_v23, 2 }
 0x57d   : > { %v3925_v16 = vor.u32 %v3924_v53, %v3923_v20  ;;  %v3928_v63 = vshll.u32 %v3927_v50, 23  ;;  %vm3851_vm8 = vcmp.le.f32.partialorder %v3850_v43, 0.7853982  ;;  %v3937_v6 = vsel %vm3852_vm7, %v3936_v37, %v7355_v61 }
 0x57e   : > { %v4015_v18 = vadd.s32 536870912, %v4014_v29  ;;  %v3939_v45 = vsel %vm3851_vm8, 0, %v3937_v6  ;;  %v4010_v25 = vadd.s32 %v7388_v8, %v7393_v11  ;;  %vm3942_vm13 = vweird.f32 %v7244_v12 }
 0x57f   : > { %v4660_v7 = vpop.eup %4659  ;;  %v3929_v44 = vor.u32 4788187, %v3928_v63  ;;  %v3932_v54 = vcvt.s32.f32 %v3925_v16  ;;  %v3943_v33 = vadd.s32 3, %v3939_v45  ;;  %vm3956_vm14 = vcmp.lt.s32.totalorder %v7287_v1, 0 }
 0x580   : > { %v4662_v31 = vpop.eup %4661  ;;  %v3846_v52 = vxor.u32 2147483648, %v4660_v7  ;;  %v4016_v60 = vshrl.u32 %v4015_v18, 30  ;;  %vm3955_vm15 = vcmp.le.f32.partialorder %v3954_v9, 0.7853982 }
 0x581   : > { %v3843_v22 = vxor.u32 2147483648, %v4662_v31  ;;  %v3930_v27 = vand.u32 2147483647, %v3929_v44  ;;  %v3944_v43 = vand.u32 3, %v3943_v33 }
 0x582   : > { %v3847_v42 = vsel %vm3845_vm3, %v3846_v52, %v4662_v31  ;;  %v4017_v21 = vshll.u32 %v4016_v60, 30  ;;  %v4040_v46 = vsub.s32 4, %v4016_v60  ;;  %vm4046_vm3 = vweird.f32 %v7287_v1 }
 0x583   : > { %v3844_v17 = vsel %vm3842_vm4, %v4660_v7, %v3843_v22  ;;  %v3933_v5 = vmul.f32 %v3932_v54, %v3930_v27  ;;  %vm3949_vm10 = vcmp.eq.s32.totalorder %v3944_v43, 2  ;;  %vm3946_vm11 = vcmp.eq.s32.totalorder %v3944_v43, 0 }
 0x584   : > { %v3848_v40 = vsel %vm3841_vm6, %v3844_v17, %v3847_v42  ;;  %v4018_v30 = vsub.s32 %v4014_v29, %v4017_v21  ;;  %vm3945_vm12 = vcmp.lt.s32.totalorder %v3944_v43, 2  ;;  %v4041_v53 = vsel %vm3956_vm14, %v4040_v46, %v4016_v60 }
 0x585   : > { %v3849_v59 = vsel %vm3838_vm5, nan, %v3848_v40  ;;  %v3934_v56 = vxor.u32 2147483648, %v3933_v5 }
 0x586   : > { %4087 = vst [vmem:[%s5293_s20 + $0xe8] sm:$0xff] %v3849_v59  ;;  %v4020_v34 = vsub.s32 0, %v4018_v30 }
 0x587   : > { %v3935_v32 = vsel %vm3852_vm7, %v3934_v56, %v3933_v5 }
 0x588   : > { %v3938_v4 = vsel %vm3851_vm8, %v7244_v12, %v3935_v32  ;;  %v4326_v10 = vmin.u32 %v4020_v34, %v4018_v30  ;;  %v4043_v12 = vsel %vm3955_vm15, 0, %v4041_v53 }
 0x589   : > { %4663 = vcosq.f32 %v3938_v4  ;;  %v4047_v50 = vadd.s32 3, %v4043_v12 }
 0x58a   : > { %4665 = vsinq.f32 %v3938_v4  ;;  %v4022_v55 = vclz %v4326_v10 }
 0x58b   : > { %v4048_v49 = vand.u32 3, %v4047_v50 }
 0x58c   : > { %v4327_v36 = vadd.s32 4294967294, %v4022_v55 }
 0x58d   : > { %vm4053_vm0 = vcmp.eq.s32.totalorder %v4048_v49, 2  ;;  %vm4050_vm1 = vcmp.eq.s32.totalorder %v4048_v49, 0  ;;  %vm4049_vm2 = vcmp.lt.s32.totalorder %v4048_v49, 2 }
 0x58e   : > { %vm4328_vm9 = vcmp.lt.s32.totalorder %v4327_v36, 0 }
 0x58f   : > { %v4025_v14 = vsel %vm4328_vm9, 0, %v4327_v36 }
 0x590   : > { %v4026_v35 = vsub.s32 32, %v4025_v14  ;;  %v4030_v48 = vsub.s32 4294967266, %v4025_v14  ;;  %v4027_v0 = vshll.u32 %v4018_v30, %v4025_v14 }
 0x592   : > { %v4028_v3 = vshrl.u32 %v4010_v25, %v4026_v35  ;;  %v4031_v57 = vadd.s32 127, %v4030_v48 }
 0x594   : > { %v4029_v28 = vor.u32 %v4028_v3, %v4027_v0  ;;  %v4032_v26 = vshll.u32 %v4031_v57, 23 }
 0x596   : > { %v4664_v2 = vpop.eup %4663  ;;  %v4033_v13 = vor.u32 4788187, %v4032_v26  ;;  %v4036_v15 = vcvt.s32.f32 %v4029_v28 }
 0x597   : > { %v4666_v61 = vpop.eup %4665  ;;  %v3950_v41 = vxor.u32 2147483648, %v4664_v2 }
 0x598   : > { %v3947_v58 = vxor.u32 2147483648, %v4666_v61  ;;  %v4034_v8 = vand.u32 2147483647, %v4033_v13 }
 0x599   : > { %v3951_v47 = vsel %vm3949_vm10, %v3950_v41, %v4666_v61 }
 0x59a   : > { %v3948_v24 = vsel %vm3946_vm11, %v4664_v2, %v3947_v58  ;;  %v4037_v51 = vmul.f32 %v4036_v15, %v4034_v8 }
 0x59b   : > { %v3952_v11 = vsel %vm3945_vm12, %v3948_v24, %v3951_v47 }
 0x59c   : > { %v3953_v39 = vsel %vm3942_vm13, nan, %v3952_v11  ;;  %v4038_v38 = vxor.u32 2147483648, %v4037_v51 }
 0x59d   : > { %4088 = vst [vmem:[%s5293_s20 + $0xf0] sm:$0xff] %v3953_v39 }
 0x59e   : > { %v4039_v19 = vsel %vm3956_vm14, %v4038_v38, %v4037_v51 }
 0x59f   : > { %v4042_v20 = vsel %vm3955_vm15, %v7287_v1, %v4039_v19 }
 0x5a0   : > { %4667 = vcosq.f32 %v4042_v20 }
 0x5a1   : > { %4669 = vsinq.f32 %v4042_v20 }
 0x5ad   : > { %v4668_v23 = vpop.eup %4667 }
 0x5ae   : > { %v4670_v16 = vpop.eup %4669  ;;  %v4054_v63 = vxor.u32 2147483648, %v4668_v23 }
 0x5af   : > { %v4051_v62 = vxor.u32 2147483648, %v4670_v16 }
 0x5b0   : > { %v4055_v9 = vsel %vm4053_vm0, %v4054_v63, %v4670_v16 }
 0x5b1   : > { %v4052_v29 = vsel %vm4050_vm1, %v4668_v23, %v4051_v62 }
 0x5b2   : > { %v4056_v7 = vsel %vm4049_vm2, %v4052_v29, %v4055_v9 }
 0x5b3   : > { %v4057_v44 = vsel %vm4046_vm3, nan, %v4056_v7 }
 0x5b4   : > { %4089 = vst [vmem:[%s5293_s20 + $0xf8] sm:$0xff] %v4057_v44 }
 0x5b5   : > { %4684 = shalt.err (!%p4681_p3)
}
 0x5b6   : > { %s4685_s15 = scalar_lea.hbm %s7421_s10, 4096  ;;  %s4689_s18 = scalar_lea.hbm %s7475_s6, 8192 }
 0x5b7   : > { %p4686_p4 = scmp.ne.s32.totalorder %s7421_s10, %s4685_s15  ;;  %p4690_p9 = scmp.lt.s32.totalorder %s7421_s10, %s7475_s6 }
 0x5b8   : > { %p4691_p10 = scmp.lt.s32.totalorder %s4689_s18, %s4685_s15 }
 0x5b9   : > { %p4687_p7 = pnand %p4686_p4, %p4818_p5 }
 0x5ba   : > { %p4692_p11 = por %p4691_p10, %p4690_p9 }
 0x5bb   : > { %p4688_p8 = pneg %p4687_p7 }
 0x5bd   : > { %p4693_p12 = pnand %p4692_p11, %p4688_p8 }
 0x5bf   : > { %4696 = shalt.err (!%p4693_p12)
}
 0x5c0   : > { %s4743_s26 = smov 256   ;;  %s4744_s29 = smov 16  }
 0x5c1   : > { %4490 = dma.vmem_to_hbm [thread:$0]  (%p4818_p5), %s7423_s28, 4096, %s7421_s10, %s7429_s25, %s4743_s26, %s4743_s26, %s4744_s29  }
 0x5c2 PF: > { %p4496_p13 = scmp.ge.s32.totalorder %s4731_s24, 2  ;;  %s4119_s9 = sand.u32 1, %s4719_s21  }
 0x5c3   : > { %s4120_s11 = scalar_lea.sflag [#allocation3], %s4119_s9 }
 0x5c4   : > { %p4493_p0 = pnand %p4496_p13, %p4822_p6 }
 0x5c6   : > { %p4494_p1 = pneg %p4493_p0 }
 0x5c8   : > { %4714 = dma.done.wait (%p4494_p1), %s4120_s11, 4096  }
 0x5c9   : > { %4716 = vsyncadd (%p4494_p1), %s4120_s11, 4294963200  ;;  %p16_p2 = scmp.ge.s32.totalorder %s4805_s27, 4   ;;  %s7538_s21 = smov %s4723_s22 }
 0x5ca   : > { %s7539_s22 = smov %s4727_s23  ;;  %s7540_s23 = smov %s4816_s30 }
 0x5cb   : > { %s7541_s24 = smov %s4805_s27  ;;  %18 = sbr.rel (!%p16_p2) target bundleno = 3 (0x3), region = 79 }
 0x5d0   :  { %4125 = vsyncpa [#allocation3], 1 }
 0x5d1   :  { %4127 = vsyncpa [#allocation3 + $0x1], 1 }

</bundles_post_ra>
